<compile_context>
chip_gen: v5e
topology: v5e:2x2
jax: 0.10.0
libtpu: 0.0.40
codegen_flags: <defaults>
</compile_context>

<pallas_src>
import jax
import jax.numpy as jnp
from jax.experimental import pallas as pl
from jax.experimental.pallas import tpu as pltpu

# ---- model dims (small, synthetic) -----------------------------------------
B, C, H, W = 2, 4, 16, 16            # input  [B, C, H, W]
D = C * H * W                        # 1024 flattened features (lane axis)
HID = 256                            # encoder/decoder hidden width
LAT = 32                             # num_latent
TB_MAX = 128                         # max batch tile (fills MXU rows, v5e-safe)
TB_MIN = 16                          # full packed bf16 sublane group


def _round_up(n, m):
    return ((n + m - 1) // m) * m


# ---- Pallas kernel: fused encoder -> reparam -> decoder ---------------------
def betavae_kernel(x_ref, eps_ref,
                   w1_ref, s1_ref, b1_ref,        # encoder hidden  [D,HID] int8 + scale
                   wmu_ref, bmu_ref,              # mu head         [HID,LAT] bf16
                   wls_ref, bls_ref,              # log_sigma head  [HID,LAT] bf16
                   w2_ref, b2_ref,                # decoder hidden  [LAT,HID] bf16
                   wab_ref, sab_ref, bab_ref,     # fused log_a||log_b [HID,2*D] int8 + scale
                   out_ref):
    x = x_ref[...]                                           # [TB, D] bf16

    # ---- encoder hidden (int8 weight; dequant scale folded onto the result) --
    w1 = w1_ref[...].astype(jnp.float32).astype(jnp.bfloat16)   # |q|<=127, exact
    h = (jnp.dot(x, w1, preferred_element_type=jnp.float32)
         * s1_ref[...] + b1_ref[...])                        # [TB, HID] f32
    h = jnp.maximum(h, 0.0)                                  # ReLU (VPU)
    h16 = h.astype(jnp.bfloat16)

    # ---- latent heads (separate matmuls -> no sub-lane split) ----------------
    mu = jnp.dot(h16, wmu_ref[...],
                 preferred_element_type=jnp.float32) + bmu_ref[...]        # [TB, LAT]
    log_sigma = jnp.dot(h16, wls_ref[...],
                        preferred_element_type=jnp.float32) + bls_ref[...]  # [TB, LAT]

    # ---- reparameterization (eps supplied from outside for determinism) ------
    z = mu + jnp.exp(log_sigma) * eps_ref[...]               # [TB, LAT] f32

    # ---- decoder ----
    hd = jnp.dot(z.astype(jnp.bfloat16), w2_ref[...],
                 preferred_element_type=jnp.float32) + b2_ref[...]
    hd = jnp.maximum(hd, 0.0)                                # ReLU

    wab = wab_ref[...].astype(jnp.float32).astype(jnp.bfloat16)
    lab = (jnp.dot(hd.astype(jnp.bfloat16), wab,
                   preferred_element_type=jnp.float32)
           * sab_ref[...] + bab_ref[...])                    # [TB, 2*D] f32
    log_alpha = lab[:, :D]                                   # lane-aligned split (D=1024)
    log_beta = lab[:, D:]

    # Beta(alpha, beta) mean = alpha/(alpha+beta) = sigmoid(log_alpha - log_beta)
    out_ref[...] = jax.nn.sigmoid(log_alpha - log_beta).astype(out_ref.dtype)


def betavae_forward(x_nchw, eps, params):
    """x_nchw: [B, C, H, W] float32; returns reconstruction [B, C, H, W] f32."""
    b = x_nchw.shape[0]
    # x goes to the MXU in bf16 anyway; feed it in bf16 to halve activation DMA.
    x_flat = x_nchw.reshape(b, -1).astype(jnp.bfloat16)       # [B, D]
    eps = eps.astype(jnp.float32)

    # Adaptive batch tile: large batches fill MXU rows / amortize weight DMA,
    # small batches don't pay for padded activation traffic.
    tb = min(TB_MAX, _round_up(b, TB_MIN))
    pad = (-b) % tb
    if pad:  # only fires for ragged batches; zero-padding outside the kernel
        x_flat = jnp.pad(x_flat, ((0, pad), (0, 0)))
        eps = jnp.pad(eps, ((0, pad), (0, 0)))
    bp = b + pad
    num_tiles = bp // tb

    (w1_q, s1, b1, wmu, bmu, wls, bls, w2, b2, wab_q, sab, bab) = params
    operands = (x_flat, eps,
                w1_q, s1, b1, wmu, bmu, wls, bls, w2, b2, wab_q, sab, bab)

    # batch-tiled operands march with the grid; weights/scales/biases get
    # constant index_maps so they stay resident in VMEM across grid steps.
    def batch_spec(arr):
        return pl.BlockSpec((tb,) + tuple(arr.shape[1:]), lambda i: (i, 0))

    def resident_spec(arr):
        return pl.BlockSpec(tuple(arr.shape), lambda i: (0, 0))

    in_specs = ([batch_spec(x_flat), batch_spec(eps)]
                + [resident_spec(p) for p in params])

    # Only shard across TensorCores (v7x) when there is more than one tile;
    # otherwise each core would just duplicate the resident-weight DMA.
    dim_sem = ("parallel",) if num_tiles >= 2 else ("arbitrary",)

    # advisory cost estimate for XLA scheduling
    weight_bytes = sum(int(p.size) * p.dtype.itemsize for p in params)
    act_bytes = int(x_flat.size) * 2 + int(eps.size) * 4 + int(bp * D) * 2
    flops = 2 * bp * (D * HID + 2 * HID * LAT + LAT * HID + HID * 2 * D)
    transcendentals = bp * (LAT + D)

    out_flat = pl.pallas_call(
        betavae_kernel,
        out_shape=jax.ShapeDtypeStruct((bp, D), jnp.bfloat16),
        grid=(num_tiles,),
        in_specs=in_specs,
        out_specs=pl.BlockSpec((tb, D), lambda i: (i, 0)),
        compiler_params=pltpu.CompilerParams(
            dimension_semantics=dim_sem),
        cost_estimate=pl.CostEstimate(
            flops=flops,
            transcendentals=transcendentals,
            bytes_accessed=weight_bytes + act_bytes),
    )(*operands)

    return out_flat[:b].astype(jnp.float32).reshape(x_nchw.shape)


# ---- deterministic parameter init + int8 per-channel weight quantization ----
def _quantize_per_col(w):
    """Symmetric int8 quantization with one scale per output channel (column)."""
    amax = jnp.max(jnp.abs(w), axis=0, keepdims=True)         # [1, N]
    scale = jnp.maximum(amax, 1e-8) / 127.0
    q = jnp.clip(jnp.round(w / scale), -127, 127).astype(jnp.int8)
    return q, scale.astype(jnp.float32)


def init_params(key):
    ks = jax.random.split(key, 6)

    def lin_w(k, fan_in, fan_out):
        scale = 1.0 / jnp.sqrt(jnp.float32(fan_in))
        return jax.random.uniform(k, (fan_in, fan_out), jnp.float32, -scale, scale)

    # large weights -> int8 + per-output-channel scale (weight-DMA dominates)
    w1_q, s1 = _quantize_per_col(lin_w(ks[0], D, HID))              # encoder hidden
    b1 = jnp.zeros((1, HID), jnp.float32)

    # small latent heads stay bf16 (separate matmuls -> lane-friendly)
    wmu = lin_w(ks[1], HID, LAT).astype(jnp.bfloat16)               # mu head
    bmu = jnp.zeros((1, LAT), jnp.float32)
    wls = lin_w(ks[2], HID, LAT).astype(jnp.bfloat16)               # log_sigma head
    bls = jnp.zeros((1, LAT), jnp.float32)

    w2 = lin_w(ks[3], LAT, HID).astype(jnp.bfloat16)                # decoder hidden
    b2 = jnp.zeros((1, HID), jnp.float32)

    wa = lin_w(ks[4], HID, D)                                       # log_alpha head
    wb = lin_w(ks[5], HID, D)                                       # log_beta head
    wab_q, sab = _quantize_per_col(jnp.concatenate([wa, wb], axis=1))  # fused [HID, 2*D]
    bab = jnp.zeros((1, 2 * D), jnp.float32)

    return (w1_q, s1, b1, wmu, bmu, wls, bls, w2, b2, wab_q, sab, bab)


if __name__ == "__main__":
    root = jax.random.PRNGKey(0)
    k_params, k_x, k_eps = jax.random.split(root, 3)

    params = init_params(k_params)
    # Beta-VAE data lives in (0, 1)
    x = jax.random.uniform(k_x, (B, C, H, W), jnp.float32, 0.0, 1.0)
    # reparameterization noise (fixed for determinism)
    eps = jax.random.normal(k_eps, (B, LAT), jnp.float32)

    x_reconstr = betavae_forward(x, eps, params)
    jax.block_until_ready(x_reconstr)

    assert x_reconstr.shape == (B, C, H, W)
    assert x_reconstr.dtype == jnp.float32
    assert bool(jnp.all(jnp.isfinite(x_reconstr)))
    # Beta mean lies in [0,1]; non-strict bound avoids bf16/sigmoid saturation flakiness.
    assert bool(jnp.all((x_reconstr >= 0.0) & (x_reconstr <= 1.0)))
    print("KERNEL_OK")
</pallas_src>

<mosaic_0001>
module attributes {stable_mosaic.version = 11 : i64} {
  func.func @betavae_kernel(%arg0: i32, %arg1: memref<16x1024xbf16, #tpu.memory_space<vmem>>, %arg2: memref<16x32xf32, #tpu.memory_space<vmem>>, %arg3: memref<1024x256xi8, #tpu.memory_space<vmem>>, %arg4: memref<1x256xf32, #tpu.memory_space<vmem>>, %arg5: memref<1x256xf32, #tpu.memory_space<vmem>>, %arg6: memref<256x32xbf16, #tpu.memory_space<vmem>>, %arg7: memref<1x32xf32, #tpu.memory_space<vmem>>, %arg8: memref<256x32xbf16, #tpu.memory_space<vmem>>, %arg9: memref<1x32xf32, #tpu.memory_space<vmem>>, %arg10: memref<32x256xbf16, #tpu.memory_space<vmem>>, %arg11: memref<1x256xf32, #tpu.memory_space<vmem>>, %arg12: memref<256x2048xi8, #tpu.memory_space<vmem>>, %arg13: memref<1x2048xf32, #tpu.memory_space<vmem>>, %arg14: memref<1x2048xf32, #tpu.memory_space<vmem>>, %arg15: memref<16x1024xbf16, #tpu.memory_space<vmem>>) attributes {dimension_semantics = [#tpu.dimension_semantics<arbitrary>], iteration_bounds = array<i64: 1>, scalar_prefetch = 0 : i64, scratch_operands = 0 : i64, tpu.core_type = #tpu.core_type<tc>, window_params = [{transform_indices = @transform_0, window_bounds = array<i64: 16, 1024>}, {transform_indices = @transform_1, window_bounds = array<i64: 16, 32>}, {pipeline_mode = #tpu.pipeline_mode<synchronous>, transform_indices = @transform_2, window_bounds = array<i64: 1024, 256>}, {pipeline_mode = #tpu.pipeline_mode<synchronous>, transform_indices = @transform_3, window_bounds = array<i64: 1, 256>}, {pipeline_mode = #tpu.pipeline_mode<synchronous>, transform_indices = @transform_4, window_bounds = array<i64: 1, 256>}, {pipeline_mode = #tpu.pipeline_mode<synchronous>, transform_indices = @transform_5, window_bounds = array<i64: 256, 32>}, {pipeline_mode = #tpu.pipeline_mode<synchronous>, transform_indices = @transform_6, window_bounds = array<i64: 1, 32>}, {pipeline_mode = #tpu.pipeline_mode<synchronous>, transform_indices = @transform_7, window_bounds = array<i64: 256, 32>}, {pipeline_mode = #tpu.pipeline_mode<synchronous>, transform_indices = @transform_8, window_bounds = array<i64: 1, 32>}, {pipeline_mode = #tpu.pipeline_mode<synchronous>, transform_indices = @transform_9, window_bounds = array<i64: 32, 256>}, {pipeline_mode = #tpu.pipeline_mode<synchronous>, transform_indices = @transform_10, window_bounds = array<i64: 1, 256>}, {pipeline_mode = #tpu.pipeline_mode<synchronous>, transform_indices = @transform_11, window_bounds = array<i64: 256, 2048>}, {pipeline_mode = #tpu.pipeline_mode<synchronous>, transform_indices = @transform_12, window_bounds = array<i64: 1, 2048>}, {pipeline_mode = #tpu.pipeline_mode<synchronous>, transform_indices = @transform_13, window_bounds = array<i64: 1, 2048>}, {transform_indices = @transform_14, window_bounds = array<i64: 16, 1024>}]} {
    %c0 = arith.constant 0 : index
    %c0_0 = arith.constant 0 : index
    %0 = vector.load %arg1[%c0, %c0_0] : memref<16x1024xbf16, #tpu.memory_space<vmem>>, vector<16x1024xbf16>
    %c0_1 = arith.constant 0 : index
    %c0_2 = arith.constant 0 : index
    %1 = vector.load %arg3[%c0_1, %c0_2] : memref<1024x256xi8, #tpu.memory_space<vmem>>, vector<1024x256xi8>
    %2 = arith.sitofp %1 : vector<1024x256xi8> to vector<1024x256xf32>
    %3 = arith.truncf %2 : vector<1024x256xf32> to vector<1024x256xbf16>
    %cst = arith.constant dense<0.000000e+00> : vector<16x256xf32>
    %4 = tpu.matmul %0, %3, %cst {dimension_numbers = #tpu.dot_dimension_numbers<[1], [0], [0], [1], [0, 0, 1, 1], [], []>} : vector<16x1024xbf16>, vector<1024x256xbf16>, vector<16x256xf32> -> vector<16x256xf32>
    %c0_3 = arith.constant 0 : index
    %c0_4 = arith.constant 0 : index
    %5 = vector.load %arg4[%c0_3, %c0_4] : memref<1x256xf32, #tpu.memory_space<vmem>>, vector<1x256xf32>
    %6 = vector.broadcast %5 : vector<1x256xf32> to vector<16x256xf32>
    %7 = arith.mulf %4, %6 : vector<16x256xf32>
    %c0_5 = arith.constant 0 : index
    %c0_6 = arith.constant 0 : index
    %8 = vector.load %arg5[%c0_5, %c0_6] : memref<1x256xf32, #tpu.memory_space<vmem>>, vector<1x256xf32>
    %9 = vector.broadcast %8 : vector<1x256xf32> to vector<16x256xf32>
    %10 = arith.addf %7, %9 : vector<16x256xf32>
    %cst_7 = arith.constant 0.000000e+00 : f32
    %11 = vector.broadcast %cst_7 : f32 to vector<16x256xf32>
    %12 = arith.maximumf %10, %11 : vector<16x256xf32>
    %13 = arith.truncf %12 : vector<16x256xf32> to vector<16x256xbf16>
    %c0_8 = arith.constant 0 : index
    %c0_9 = arith.constant 0 : index
    %14 = vector.load %arg6[%c0_8, %c0_9] : memref<256x32xbf16, #tpu.memory_space<vmem>>, vector<256x32xbf16>
    %cst_10 = arith.constant dense<0.000000e+00> : vector<16x32xf32>
    %15 = tpu.matmul %13, %14, %cst_10 {dimension_numbers = #tpu.dot_dimension_numbers<[1], [0], [0], [1], [0, 0, 1, 1], [], []>} : vector<16x256xbf16>, vector<256x32xbf16>, vector<16x32xf32> -> vector<16x32xf32>
    %c0_11 = arith.constant 0 : index
    %c0_12 = arith.constant 0 : index
    %16 = vector.load %arg7[%c0_11, %c0_12] : memref<1x32xf32, #tpu.memory_space<vmem>>, vector<1x32xf32>
    %17 = vector.broadcast %16 : vector<1x32xf32> to vector<16x32xf32>
    %18 = arith.addf %15, %17 : vector<16x32xf32>
    %c0_13 = arith.constant 0 : index
    %c0_14 = arith.constant 0 : index
    %19 = vector.load %arg8[%c0_13, %c0_14] : memref<256x32xbf16, #tpu.memory_space<vmem>>, vector<256x32xbf16>
    %cst_15 = arith.constant dense<0.000000e+00> : vector<16x32xf32>
    %20 = tpu.matmul %13, %19, %cst_15 {dimension_numbers = #tpu.dot_dimension_numbers<[1], [0], [0], [1], [0, 0, 1, 1], [], []>} : vector<16x256xbf16>, vector<256x32xbf16>, vector<16x32xf32> -> vector<16x32xf32>
    %c0_16 = arith.constant 0 : index
    %c0_17 = arith.constant 0 : index
    %21 = vector.load %arg9[%c0_16, %c0_17] : memref<1x32xf32, #tpu.memory_space<vmem>>, vector<1x32xf32>
    %22 = vector.broadcast %21 : vector<1x32xf32> to vector<16x32xf32>
    %23 = arith.addf %20, %22 : vector<16x32xf32>
    %24 = math.exp %23 : vector<16x32xf32>
    %c0_18 = arith.constant 0 : index
    %c0_19 = arith.constant 0 : index
    %25 = vector.load %arg2[%c0_18, %c0_19] : memref<16x32xf32, #tpu.memory_space<vmem>>, vector<16x32xf32>
    %26 = arith.mulf %24, %25 : vector<16x32xf32>
    %27 = arith.addf %18, %26 : vector<16x32xf32>
    %28 = arith.truncf %27 : vector<16x32xf32> to vector<16x32xbf16>
    %c0_20 = arith.constant 0 : index
    %c0_21 = arith.constant 0 : index
    %29 = vector.load %arg10[%c0_20, %c0_21] : memref<32x256xbf16, #tpu.memory_space<vmem>>, vector<32x256xbf16>
    %cst_22 = arith.constant dense<0.000000e+00> : vector<16x256xf32>
    %30 = tpu.matmul %28, %29, %cst_22 {dimension_numbers = #tpu.dot_dimension_numbers<[1], [0], [0], [1], [0, 0, 1, 1], [], []>} : vector<16x32xbf16>, vector<32x256xbf16>, vector<16x256xf32> -> vector<16x256xf32>
    %c0_23 = arith.constant 0 : index
    %c0_24 = arith.constant 0 : index
    %31 = vector.load %arg11[%c0_23, %c0_24] : memref<1x256xf32, #tpu.memory_space<vmem>>, vector<1x256xf32>
    %32 = vector.broadcast %31 : vector<1x256xf32> to vector<16x256xf32>
    %33 = arith.addf %30, %32 : vector<16x256xf32>
    %cst_25 = arith.constant 0.000000e+00 : f32
    %34 = vector.broadcast %cst_25 : f32 to vector<16x256xf32>
    %35 = arith.maximumf %33, %34 : vector<16x256xf32>
    %c0_26 = arith.constant 0 : index
    %c0_27 = arith.constant 0 : index
    %36 = vector.load %arg12[%c0_26, %c0_27] : memref<256x2048xi8, #tpu.memory_space<vmem>>, vector<256x2048xi8>
    %37 = arith.sitofp %36 : vector<256x2048xi8> to vector<256x2048xf32>
    %38 = arith.truncf %37 : vector<256x2048xf32> to vector<256x2048xbf16>
    %39 = arith.truncf %35 : vector<16x256xf32> to vector<16x256xbf16>
    %cst_28 = arith.constant dense<0.000000e+00> : vector<16x2048xf32>
    %40 = tpu.matmul %39, %38, %cst_28 {dimension_numbers = #tpu.dot_dimension_numbers<[1], [0], [0], [1], [0, 0, 1, 1], [], []>} : vector<16x256xbf16>, vector<256x2048xbf16>, vector<16x2048xf32> -> vector<16x2048xf32>
    %c0_29 = arith.constant 0 : index
    %c0_30 = arith.constant 0 : index
    %41 = vector.load %arg13[%c0_29, %c0_30] : memref<1x2048xf32, #tpu.memory_space<vmem>>, vector<1x2048xf32>
    %42 = vector.broadcast %41 : vector<1x2048xf32> to vector<16x2048xf32>
    %43 = arith.mulf %40, %42 : vector<16x2048xf32>
    %c0_31 = arith.constant 0 : index
    %c0_32 = arith.constant 0 : index
    %44 = vector.load %arg14[%c0_31, %c0_32] : memref<1x2048xf32, #tpu.memory_space<vmem>>, vector<1x2048xf32>
    %45 = vector.broadcast %44 : vector<1x2048xf32> to vector<16x2048xf32>
    %46 = arith.addf %43, %45 : vector<16x2048xf32>
    %47 = vector.extract_strided_slice %46 {offsets = [0, 0], sizes = [16, 1024], strides = [1, 1]} : vector<16x2048xf32> to vector<16x1024xf32>
    %48 = vector.extract_strided_slice %46 {offsets = [0, 1024], sizes = [16, 1024], strides = [1, 1]} : vector<16x2048xf32> to vector<16x1024xf32>
    %49 = arith.subf %47, %48 : vector<16x1024xf32>
    %50 = arith.negf %49 : vector<16x1024xf32>
    %51 = math.exp %50 : vector<16x1024xf32>
    %cst_33 = arith.constant 1.000000e+00 : f32
    %52 = vector.broadcast %cst_33 : f32 to vector<16x1024xf32>
    %53 = arith.addf %52, %51 : vector<16x1024xf32>
    %54 = arith.divf %52, %53 : vector<16x1024xf32>
    %55 = arith.truncf %54 : vector<16x1024xf32> to vector<16x1024xbf16>
    %c0_34 = arith.constant 0 : index
    %c0_35 = arith.constant 0 : index
    %56 = vector.load %arg15[%c0_34, %c0_35] : memref<16x1024xbf16, #tpu.memory_space<vmem>>, vector<16x1024xbf16>
    tpu.vector_store %arg15[%c0_34, %c0_35], %55 {strides = array<i32>} : memref<16x1024xbf16, #tpu.memory_space<vmem>>, vector<16x1024xbf16>,
    return
  }
  func.func @transform_0(%arg0: i32) -> (i32, i32) {
    %c0_i32 = arith.constant 0 : i32
    %c0_i32_0 = arith.constant 0 : i32
    return %arg0, %c0_i32 : i32, i32
  }
  func.func @transform_1(%arg0: i32) -> (i32, i32) {
    %c0_i32 = arith.constant 0 : i32
    %c0_i32_0 = arith.constant 0 : i32
    return %arg0, %c0_i32 : i32, i32
  }
  func.func @transform_2(%arg0: i32) -> (i32, i32) {
    %c0_i32 = arith.constant 0 : i32
    %c0_i32_0 = arith.constant 0 : i32
    %c0_i32_1 = arith.constant 0 : i32
    return %c0_i32, %c0_i32_0 : i32, i32
  }
  func.func @transform_3(%arg0: i32) -> (i32, i32) {
    %c0_i32 = arith.constant 0 : i32
    %c0_i32_0 = arith.constant 0 : i32
    %c0_i32_1 = arith.constant 0 : i32
    return %c0_i32, %c0_i32_0 : i32, i32
  }
  func.func @transform_4(%arg0: i32) -> (i32, i32) {
    %c0_i32 = arith.constant 0 : i32
    %c0_i32_0 = arith.constant 0 : i32
    %c0_i32_1 = arith.constant 0 : i32
    return %c0_i32, %c0_i32_0 : i32, i32
  }
  func.func @transform_5(%arg0: i32) -> (i32, i32) {
    %c0_i32 = arith.constant 0 : i32
    %c0_i32_0 = arith.constant 0 : i32
    %c0_i32_1 = arith.constant 0 : i32
    return %c0_i32, %c0_i32_0 : i32, i32
  }
  func.func @transform_6(%arg0: i32) -> (i32, i32) {
    %c0_i32 = arith.constant 0 : i32
    %c0_i32_0 = arith.constant 0 : i32
    %c0_i32_1 = arith.constant 0 : i32
    return %c0_i32, %c0_i32_0 : i32, i32
  }
  func.func @transform_7(%arg0: i32) -> (i32, i32) {
    %c0_i32 = arith.constant 0 : i32
    %c0_i32_0 = arith.constant 0 : i32
    %c0_i32_1 = arith.constant 0 : i32
    return %c0_i32, %c0_i32_0 : i32, i32
  }
  func.func @transform_8(%arg0: i32) -> (i32, i32) {
    %c0_i32 = arith.constant 0 : i32
    %c0_i32_0 = arith.constant 0 : i32
    %c0_i32_1 = arith.constant 0 : i32
    return %c0_i32, %c0_i32_0 : i32, i32
  }
  func.func @transform_9(%arg0: i32) -> (i32, i32) {
    %c0_i32 = arith.constant 0 : i32
    %c0_i32_0 = arith.constant 0 : i32
    %c0_i32_1 = arith.constant 0 : i32
    return %c0_i32, %c0_i32_0 : i32, i32
  }
  func.func @transform_10(%arg0: i32) -> (i32, i32) {
    %c0_i32 = arith.constant 0 : i32
    %c0_i32_0 = arith.constant 0 : i32
    %c0_i32_1 = arith.constant 0 : i32
    return %c0_i32, %c0_i32_0 : i32, i32
  }
  func.func @transform_11(%arg0: i32) -> (i32, i32) {
    %c0_i32 = arith.constant 0 : i32
    %c0_i32_0 = arith.constant 0 : i32
    %c0_i32_1 = arith.constant 0 : i32
    return %c0_i32, %c0_i32_0 : i32, i32
  }
  func.func @transform_12(%arg0: i32) -> (i32, i32) {
    %c0_i32 = arith.constant 0 : i32
    %c0_i32_0 = arith.constant 0 : i32
    %c0_i32_1 = arith.constant 0 : i32
    return %c0_i32, %c0_i32_0 : i32, i32
  }
  func.func @transform_13(%arg0: i32) -> (i32, i32) {
    %c0_i32 = arith.constant 0 : i32
    %c0_i32_0 = arith.constant 0 : i32
    %c0_i32_1 = arith.constant 0 : i32
    return %c0_i32, %c0_i32_0 : i32, i32
  }
  func.func @transform_14(%arg0: i32) -> (i32, i32) {
    %c0_i32 = arith.constant 0 : i32
    %c0_i32_0 = arith.constant 0 : i32
    return %arg0, %c0_i32 : i32, i32
  }
}

</mosaic_0001>

<bundles_post_ra>
// kernel: tpu_custom_call.1
= control target key start
LH: loop header
LB: loop body
LE: loop exit
PB: predicated region body
PF: predicated region fallthrough
CT: control target
= control target key end

     0   :  { %19 = vsyncpa [#allocation3], 0  ;;  %s5371_s0 = inlined_call_operand.vmem [shape: bf16[16,1024], index: 0, kind: input, shape index: {}]   ;;  %s5372_s1 = inlined_call_operand.vmem [shape: f32[16,32], index: 1, kind: input, shape index: {}]   ;;  %s5373_s2 = inlined_call_operand.hbm [shape: s8[1024,256], index: 2, kind: input, shape index: {}]   ;;  %s5374_s3 = inlined_call_operand.vmem [shape: f32[1,256], index: 3, kind: input, shape index: {}]   ;;  %s5375_s4 = inlined_call_operand.vmem [shape: f32[1,256], index: 4, kind: input, shape index: {}]   ;;  %s5376_s5 = inlined_call_operand.vmem [shape: bf16[256,32], index: 5, kind: input, shape index: {}]   ;;  %s5377_s6 = inlined_call_operand.vmem [shape: f32[1,32], index: 6, kind: input, shape index: {}]   ;;  %s5378_s7 = inlined_call_operand.vmem [shape: bf16[256,32], index: 7, kind: input, shape index: {}]   ;;  %s5379_s8 = inlined_call_operand.vmem [shape: f32[1,32], index: 8, kind: input, shape index: {}]   ;;  %s5380_s9 = inlined_call_operand.vmem [shape: bf16[32,256], index: 9, kind: input, shape index: {}]   ;;  %s5381_s10 = inlined_call_operand.vmem [shape: f32[1,256], index: 10, kind: input, shape index: {}]   ;;  %s5382_s11 = inlined_call_operand.hbm [shape: s8[256,2048], index: 11, kind: input, shape index: {}]   ;;  %s5383_s12 = inlined_call_operand.vmem [shape: f32[1,2048], index: 12, kind: input, shape index: {}]   ;;  %s5384_s13 = inlined_call_operand.vmem [shape: f32[1,2048], index: 13, kind: input, shape index: {}]   ;;  %s5385_s14 = inlined_call_operand.hbm [shape: bf16[16,1024], index: 14, kind: output, shape index: {}]  }
   0x1   :  { %20 = vsyncpa [#allocation6], 0 }
   0x2   :  { %21 = vsyncpa [#allocation4], 0  ;;  %s30_s15 = sshll.u32 %s5373_s2, 4  ;;  %s4225_s16 = smov [#allocation2]   ;;  %s31_s15 = int_to_ptr.hbm [resolvable:$true] %s30_s15 }
   0x3   :  { %s32_s17 = sshll.u32 %s4225_s16, 4  ;;  %s59_s20 = sshll.u32 %s5382_s11, 4  ;;  %s33_s17 = int_to_ptr.vmem [resolvable:$true] %s32_s17  ;;  %s60_s20 = int_to_ptr.hbm [resolvable:$true] %s59_s20 }
   0x4   :  { %s4226_s21 = smov 256   ;;  %s4227_s22 = smov 16  }
   0x5   :  { %38 = dma.hbm_to_vmem [thread:$0]  %s31_s15, 8192, %s33_s17, [#allocation3], %s4226_s21, %s4226_s21, %s4227_s22  }
   0x6   :  { %s4228_s23 = smov [#allocation5]   ;;  %s4229_s25 = smov 2048  }
   0x7   :  { %s61_s24 = sshll.u32 %s4228_s23, 4  ;;  %s4230_s26 = smov 128   ;;  %s62_s24 = int_to_ptr.vmem [resolvable:$true] %s61_s24 }
   0x8   :  { %67 = dma.hbm_to_vmem [thread:$0]  %s60_s20, 16384, %s62_s24, [#allocation6], %s4229_s25, %s4229_s25, %s4230_s26  }
   0x9   :  { %4219 = dma.done.wait [#allocation3], 8192  }
   0xa   :  { %4220 = vsyncadd [#allocation3], 4294959104 }
   0xb   :  { %4221 = dma.done.wait [#allocation6], 16384  }
   0xc   :  { %4222 = vsyncadd [#allocation6], 4294950912  ;;  %v95_v0 = vld [vmem:[#allocation2 + $0x30] sm:$0xff]  ;;  %v93_v28 = vld [vmem:[#allocation2 + $0x20] sm:$0xff]  ;;  %vm1444_vm0 = vcmask 261120   ;;  %s3816_s17 = sshll.u32 %s5385_s14, 4  ;;  %s3817_s17 = int_to_ptr.hbm [resolvable:$true] %s3816_s17 }
   0xd   :  { %v103_v1 = vld [vmem:[#allocation2 + $0x70] sm:$0xff]  ;;  %v181_v3 = vunpack.c.2.s8 %v95_v0  ;;  %v183_v4 = vunpack.c.3.s8 %v95_v0  ;;  %v177_v22 = vunpack.c.0.s8 %v95_v0  ;;  %v179_v23 = vunpack.c.1.s8 %v95_v0  ;;  %v101_v37 = vld [vmem:[#allocation2 + $0x60] sm:$0xff]  ;;  %s4232_s18 = smov 512   ;;  %s4233_s19 = smov 32  }
   0xe   :  { %v111_v2 = vld [vmem:[#allocation2 + $0xb0] sm:$0xff]  ;;  %v213_v5 = vunpack.c.2.s8 %v103_v1  ;;  %v215_v6 = vunpack.c.3.s8 %v103_v1  ;;  %v209_v26 = vunpack.c.0.s8 %v103_v1  ;;  %v211_v27 = vunpack.c.1.s8 %v103_v1  ;;  %v109_v42 = vld [vmem:[#allocation2 + $0xa0] sm:$0xff] }
   0xf   :  { %v119_v7 = vld [vmem:[#allocation2 + $0xf0] sm:$0xff]  ;;  %v245_v8 = vunpack.c.2.s8 %v111_v2  ;;  %v247_v9 = vunpack.c.3.s8 %v111_v2  ;;  %v437_v12 = vcvt.s32.f32 %v181_v3  ;;  %v439_v13 = vcvt.s32.f32 %v183_v4  ;;  %v117_v47 = vld [vmem:[#allocation2 + $0xe0] sm:$0xff] }
  0x10   :  { %v277_v10 = vunpack.c.2.s8 %v119_v7  ;;  %v279_v11 = vunpack.c.3.s8 %v119_v7  ;;  %v469_v14 = vcvt.s32.f32 %v213_v5  ;;  %v471_v15 = vcvt.s32.f32 %v215_v6 }
  0x11   :  { %v501_v16 = vcvt.s32.f32 %v245_v8  ;;  %v503_v17 = vcvt.s32.f32 %v247_v9  ;;  %v679_v20 = vpack.c.bf16 %v439_v13, %v437_v12  ;;  %v433_v29 = vcvt.s32.f32 %v177_v22  ;;  %v91_v8 = vld [vmem:[#allocation2 + $0x10] sm:$0xff] }
  0x12   :  { %v533_v18 = vcvt.s32.f32 %v277_v10  ;;  %v535_v19 = vcvt.s32.f32 %v279_v11  ;;  %v695_v21 = vpack.c.bf16 %v471_v15, %v469_v14  ;;  %v435_v30 = vcvt.s32.f32 %v179_v23  ;;  %v107_v22 = vld [vmem:[#allocation2 + $0x90] sm:$0xff] }
  0x13   :  { %v711_v24 = vpack.c.bf16 %v503_v17, %v501_v16  ;;  %833 = vmatpush.bf16.msra.mxu0 %v679_v20  ;;  %v241_v31 = vunpack.c.0.s8 %v111_v2  ;;  %v243_v32 = vunpack.c.1.s8 %v111_v2  ;;  %v465_v33 = vcvt.s32.f32 %v209_v26  ;;  %v99_v17 = vld [vmem:[#allocation2 + $0x50] sm:$0xff] }
  0x14   :  { %v727_v25 = vpack.c.bf16 %v535_v19, %v533_v18  ;;  %847 = vmatpush.bf16.msra.mxu1 %v695_v21  ;;  %v467_v34 = vcvt.s32.f32 %v211_v27  ;;  %v273_v35 = vunpack.c.0.s8 %v119_v7  ;;  %v275_v36 = vunpack.c.1.s8 %v119_v7  ;;  %v115_v27 = vld [vmem:[#allocation2 + $0xd0] sm:$0xff] }
  0x15   :  { %861 = vmatpush.bf16.msra.mxu2 %v711_v24  ;;  %v677_v38 = vpack.c.bf16 %v435_v30, %v433_v29  ;;  %v497_v39 = vcvt.s32.f32 %v241_v31  ;;  %v499_v40 = vcvt.s32.f32 %v243_v32  ;;  %v173_v41 = vunpack.c.2.s8 %v93_v28 }
  0x16   :  { %875 = vmatpush.bf16.msra.mxu3 %v727_v25  ;;  %v693_v43 = vpack.c.bf16 %v467_v34, %v465_v33  ;;  %v529_v44 = vcvt.s32.f32 %v273_v35  ;;  %v531_v45 = vcvt.s32.f32 %v275_v36  ;;  %v175_v46 = vunpack.c.3.s8 %v93_v28 }
  0x17   :  { %834 = vmatpush.bf16.msra.mxu0 %v677_v38  ;;  %v709_v48 = vpack.c.bf16 %v499_v40, %v497_v39  ;;  %v429_v49 = vcvt.s32.f32 %v173_v41  ;;  %v205_v50 = vunpack.c.2.s8 %v101_v37  ;;  %v207_v51 = vunpack.c.3.s8 %v101_v37 }
  0x18   :  { %848 = vmatpush.bf16.msra.mxu1 %v693_v43  ;;  %v725_v52 = vpack.c.bf16 %v531_v45, %v529_v44  ;;  %v431_v53 = vcvt.s32.f32 %v175_v46  ;;  %v237_v54 = vunpack.c.2.s8 %v109_v42  ;;  %v239_v55 = vunpack.c.3.s8 %v109_v42 }
  0x19   :  { %862 = vmatpush.bf16.msra.mxu2 %v709_v48  ;;  %v461_v56 = vcvt.s32.f32 %v205_v50  ;;  %v463_v57 = vcvt.s32.f32 %v207_v51  ;;  %v269_v58 = vunpack.c.2.s8 %v117_v47  ;;  %v271_v59 = vunpack.c.3.s8 %v117_v47 }
  0x1a   :  { %876 = vmatpush.bf16.msra.mxu3 %v725_v52  ;;  %v675_v60 = vpack.c.bf16 %v431_v53, %v429_v49  ;;  %v493_v61 = vcvt.s32.f32 %v237_v54  ;;  %v495_v62 = vcvt.s32.f32 %v239_v55  ;;  %v169_v63 = vunpack.c.0.s8 %v93_v28  ;;  %v89_v52 = vld [vmem:[#allocation2] sm:$0xff] }
  0x1b   :  { %v691_v0 = vpack.c.bf16 %v463_v57, %v461_v56  ;;  %v525_v1 = vcvt.s32.f32 %v269_v58  ;;  %v527_v2 = vcvt.s32.f32 %v271_v59  ;;  %v171_v3 = vunpack.c.1.s8 %v93_v28 }
  0x1c   :  { %835 = vmatpush.bf16.msra.mxu0 %v675_v60  ;;  %v707_v4 = vpack.c.bf16 %v495_v62, %v493_v61  ;;  %v425_v5 = vcvt.s32.f32 %v169_v63  ;;  %v201_v6 = vunpack.c.0.s8 %v101_v37  ;;  %v203_v7 = vunpack.c.1.s8 %v101_v37  ;;  %v97_v61 = vld [vmem:[#allocation2 + $0x40] sm:$0xff] }
  0x1d   :  { %849 = vmatpush.bf16.msra.mxu1 %v691_v0  ;;  %v723_v9 = vpack.c.bf16 %v527_v2, %v525_v1  ;;  %v427_v10 = vcvt.s32.f32 %v171_v3  ;;  %v233_v11 = vunpack.c.0.s8 %v109_v42  ;;  %v235_v12 = vunpack.c.1.s8 %v109_v42  ;;  %v105_v2 = vld [vmem:[#allocation2 + $0x80] sm:$0xff] }
  0x1e   :  { %863 = vmatpush.bf16.msra.mxu2 %v707_v4  ;;  %v457_v13 = vcvt.s32.f32 %v201_v6  ;;  %v459_v14 = vcvt.s32.f32 %v203_v7  ;;  %v265_v15 = vunpack.c.0.s8 %v117_v47  ;;  %v267_v16 = vunpack.c.1.s8 %v117_v47  ;;  %v113_v7 = vld [vmem:[#allocation2 + $0xc0] sm:$0xff] }
  0x1f   :  { %877 = vmatpush.bf16.msra.mxu3 %v723_v9  ;;  %v673_v18 = vpack.c.bf16 %v427_v10, %v425_v5  ;;  %v489_v19 = vcvt.s32.f32 %v233_v11  ;;  %v491_v20 = vcvt.s32.f32 %v235_v12  ;;  %v165_v21 = vunpack.c.2.s8 %v91_v8 }
  0x20   :  { %v689_v23 = vpack.c.bf16 %v459_v14, %v457_v13  ;;  %v521_v24 = vcvt.s32.f32 %v265_v15  ;;  %v523_v25 = vcvt.s32.f32 %v267_v16  ;;  %v167_v26 = vunpack.c.3.s8 %v91_v8 }
  0x21   :  { %836 = vmatpush.bf16.msra.mxu0 %v673_v18  ;;  %v705_v28 = vpack.c.bf16 %v491_v20, %v489_v19  ;;  %v421_v29 = vcvt.s32.f32 %v165_v21  ;;  %v197_v30 = vunpack.c.2.s8 %v99_v17  ;;  %v199_v31 = vunpack.c.3.s8 %v99_v17 }
  0x22   :  { %850 = vmatpush.bf16.msra.mxu1 %v689_v23  ;;  %v721_v32 = vpack.c.bf16 %v523_v25, %v521_v24  ;;  %v423_v33 = vcvt.s32.f32 %v167_v26  ;;  %v229_v34 = vunpack.c.2.s8 %v107_v22  ;;  %v231_v35 = vunpack.c.3.s8 %v107_v22 }
  0x23   :  { %864 = vmatpush.bf16.msra.mxu2 %v705_v28  ;;  %v453_v36 = vcvt.s32.f32 %v197_v30  ;;  %v455_v37 = vcvt.s32.f32 %v199_v31  ;;  %v261_v38 = vunpack.c.2.s8 %v115_v27  ;;  %v263_v39 = vunpack.c.3.s8 %v115_v27 }
  0x24   :  { %878 = vmatpush.bf16.msra.mxu3 %v721_v32  ;;  %v671_v40 = vpack.c.bf16 %v423_v33, %v421_v29  ;;  %v485_v41 = vcvt.s32.f32 %v229_v34  ;;  %v487_v42 = vcvt.s32.f32 %v231_v35  ;;  %v161_v43 = vunpack.c.0.s8 %v91_v8  ;;  %v127_v32 = vld [vmem:[#allocation2 + $0x130] sm:$0xff] }
  0x25   :  { %v687_v44 = vpack.c.bf16 %v455_v37, %v453_v36  ;;  %v517_v45 = vcvt.s32.f32 %v261_v38  ;;  %v519_v46 = vcvt.s32.f32 %v263_v39  ;;  %v163_v47 = vunpack.c.1.s8 %v91_v8 }
  0x26   :  { %837 = vmatpush.bf16.msra.mxu0 %v671_v40  ;;  %v703_v48 = vpack.c.bf16 %v487_v42, %v485_v41  ;;  %v417_v49 = vcvt.s32.f32 %v161_v43  ;;  %v193_v50 = vunpack.c.0.s8 %v99_v17  ;;  %v195_v51 = vunpack.c.1.s8 %v99_v17  ;;  %v135_v41 = vld [vmem:[#allocation2 + $0x170] sm:$0xff] }
  0x27   :  { %851 = vmatpush.bf16.msra.mxu1 %v687_v44  ;;  %v719_v53 = vpack.c.bf16 %v519_v46, %v517_v45  ;;  %v419_v54 = vcvt.s32.f32 %v163_v47  ;;  %v225_v55 = vunpack.c.0.s8 %v107_v22  ;;  %v227_v56 = vunpack.c.1.s8 %v107_v22  ;;  %v143_v46 = vld [vmem:[#allocation2 + $0x1b0] sm:$0xff] }
  0x28   :  { %865 = vmatpush.bf16.msra.mxu2 %v703_v48  ;;  %v449_v57 = vcvt.s32.f32 %v193_v50  ;;  %v451_v58 = vcvt.s32.f32 %v195_v51  ;;  %v257_v59 = vunpack.c.0.s8 %v115_v27  ;;  %v259_v60 = vunpack.c.1.s8 %v115_v27  ;;  %v151_v51 = vld [vmem:[#allocation2 + $0x1f0] sm:$0xff] }
  0x29   :  { %879 = vmatpush.bf16.msra.mxu3 %v719_v53  ;;  %v669_v62 = vpack.c.bf16 %v419_v54, %v417_v49  ;;  %v481_v63 = vcvt.s32.f32 %v225_v55  ;;  %v483_v0 = vcvt.s32.f32 %v227_v56  ;;  %v157_v1 = vunpack.c.2.s8 %v89_v52 }
  0x2a   :  { %v685_v3 = vpack.c.bf16 %v451_v58, %v449_v57  ;;  %v513_v4 = vcvt.s32.f32 %v257_v59  ;;  %v515_v5 = vcvt.s32.f32 %v259_v60  ;;  %v159_v6 = vunpack.c.3.s8 %v89_v52 }
  0x2b   :  { %838 = vmatpush.bf16.msra.mxu0 %v669_v62  ;;  %v701_v8 = vpack.c.bf16 %v483_v0, %v481_v63  ;;  %v413_v9 = vcvt.s32.f32 %v157_v1  ;;  %v189_v10 = vunpack.c.2.s8 %v97_v61  ;;  %v191_v11 = vunpack.c.3.s8 %v97_v61 }
  0x2c   :  { %852 = vmatpush.bf16.msra.mxu1 %v685_v3  ;;  %v717_v12 = vpack.c.bf16 %v515_v5, %v513_v4  ;;  %v415_v13 = vcvt.s32.f32 %v159_v6  ;;  %v221_v14 = vunpack.c.2.s8 %v105_v2  ;;  %v223_v15 = vunpack.c.3.s8 %v105_v2 }
  0x2d   :  { %866 = vmatpush.bf16.msra.mxu2 %v701_v8  ;;  %v445_v16 = vcvt.s32.f32 %v189_v10  ;;  %v447_v17 = vcvt.s32.f32 %v191_v11  ;;  %v253_v18 = vunpack.c.2.s8 %v113_v7  ;;  %v255_v19 = vunpack.c.3.s8 %v113_v7 }
  0x2e   :  { %880 = vmatpush.bf16.msra.mxu3 %v717_v12  ;;  %v667_v20 = vpack.c.bf16 %v415_v13, %v413_v9  ;;  %v477_v21 = vcvt.s32.f32 %v221_v14  ;;  %v479_v22 = vcvt.s32.f32 %v223_v15  ;;  %v153_v23 = vunpack.c.0.s8 %v89_v52  ;;  %v125_v12 = vld [vmem:[#allocation2 + $0x120] sm:$0xff] }
  0x2f   :  { %v683_v24 = vpack.c.bf16 %v447_v17, %v445_v16  ;;  %v509_v25 = vcvt.s32.f32 %v253_v18  ;;  %v511_v26 = vcvt.s32.f32 %v255_v19  ;;  %v155_v27 = vunpack.c.1.s8 %v89_v52 }
  0x30   :  { %839 = vmatpush.bf16.msra.mxu0 %v667_v20  ;;  %v699_v28 = vpack.c.bf16 %v479_v22, %v477_v21  ;;  %v409_v29 = vcvt.s32.f32 %v153_v23  ;;  %v185_v30 = vunpack.c.0.s8 %v97_v61  ;;  %v187_v31 = vunpack.c.1.s8 %v97_v61  ;;  %v133_v21 = vld [vmem:[#allocation2 + $0x160] sm:$0xff] }
  0x31   :  { %853 = vmatpush.bf16.msra.mxu1 %v683_v24  ;;  %v715_v33 = vpack.c.bf16 %v511_v26, %v509_v25  ;;  %v411_v34 = vcvt.s32.f32 %v155_v27  ;;  %v217_v35 = vunpack.c.0.s8 %v105_v2  ;;  %v219_v36 = vunpack.c.1.s8 %v105_v2  ;;  %v141_v26 = vld [vmem:[#allocation2 + $0x1a0] sm:$0xff] }
  0x32   :  { %867 = vmatpush.bf16.msra.mxu2 %v699_v28  ;;  %v441_v37 = vcvt.s32.f32 %v185_v30  ;;  %v443_v38 = vcvt.s32.f32 %v187_v31  ;;  %v249_v39 = vunpack.c.0.s8 %v113_v7  ;;  %v251_v40 = vunpack.c.1.s8 %v113_v7  ;;  %v149_v31 = vld [vmem:[#allocation2 + $0x1e0] sm:$0xff] }
  0x33   :  { %881 = vmatpush.bf16.msra.mxu3 %v715_v33  ;;  %v665_v42 = vpack.c.bf16 %v411_v34, %v409_v29  ;;  %v473_v43 = vcvt.s32.f32 %v217_v35  ;;  %v475_v44 = vcvt.s32.f32 %v219_v36  ;;  %v309_v45 = vunpack.c.2.s8 %v127_v32 }
  0x34   :  { %v681_v47 = vpack.c.bf16 %v443_v38, %v441_v37  ;;  %v505_v48 = vcvt.s32.f32 %v249_v39  ;;  %v507_v49 = vcvt.s32.f32 %v251_v40  ;;  %v311_v50 = vunpack.c.3.s8 %v127_v32 }
  0x35   :  { %840 = vmatpush.bf16.msra.mxu0 %v665_v42  ;;  %v697_v52 = vpack.c.bf16 %v475_v44, %v473_v43  ;;  %v565_v53 = vcvt.s32.f32 %v309_v45  ;;  %v341_v54 = vunpack.c.2.s8 %v135_v41  ;;  %v343_v55 = vunpack.c.3.s8 %v135_v41 }
  0x36   :  { %854 = vmatpush.bf16.msra.mxu1 %v681_v47  ;;  %v713_v56 = vpack.c.bf16 %v507_v49, %v505_v48  ;;  %v567_v57 = vcvt.s32.f32 %v311_v50  ;;  %v373_v58 = vunpack.c.2.s8 %v143_v46  ;;  %v375_v59 = vunpack.c.3.s8 %v143_v46 }
  0x37   :  { %868 = vmatpush.bf16.msra.mxu2 %v697_v52  ;;  %v597_v60 = vcvt.s32.f32 %v341_v54  ;;  %v599_v61 = vcvt.s32.f32 %v343_v55  ;;  %v405_v62 = vunpack.c.2.s8 %v151_v51  ;;  %v407_v63 = vunpack.c.3.s8 %v151_v51 }
  0x38   :  { %882 = vmatpush.bf16.msra.mxu3 %v713_v56  ;;  %v743_v0 = vpack.c.bf16 %v567_v57, %v565_v53  ;;  %v629_v1 = vcvt.s32.f32 %v373_v58  ;;  %v631_v2 = vcvt.s32.f32 %v375_v59  ;;  %v305_v3 = vunpack.c.0.s8 %v127_v32  ;;  %v3832_v56 = vld [vmem:[%s5371_s0] sm:$0xf] }
  0x39   :  { %v759_v4 = vpack.c.bf16 %v599_v61, %v597_v60  ;;  %v661_v5 = vcvt.s32.f32 %v405_v62  ;;  %v663_v6 = vcvt.s32.f32 %v407_v63  ;;  %v307_v7 = vunpack.c.1.s8 %v127_v32  ;;  %v4028_v57 = vld [vmem:[%s5371_s0 + $0x1c] sm:$0xf0]  ;;  %v3840_v62 = vld [vmem:[%s5371_s0 + $0x8] sm:$0xf] }
  0x3a   :  { %889 = vmatpush.bf16.msrb.mxu0 %v743_v0  ;;  %v775_v8 = vpack.c.bf16 %v631_v2, %v629_v1  ;;  %v561_v9 = vcvt.s32.f32 %v305_v3  ;;  %v337_v10 = vunpack.c.0.s8 %v135_v41  ;;  %v339_v11 = vunpack.c.1.s8 %v135_v41  ;;  %v4029_v63 = vld [vmem:[%s5371_s0 + $0x24] sm:$0xf0] }
  0x3b   :  { %903 = vmatpush.bf16.msrb.mxu1 %v759_v4  ;;  %v791_v13 = vpack.c.bf16 %v663_v6, %v661_v5  ;;  %v563_v14 = vcvt.s32.f32 %v307_v7  ;;  %v369_v15 = vunpack.c.0.s8 %v143_v46  ;;  %v371_v16 = vunpack.c.1.s8 %v143_v46  ;;  %v123_v4 = vld [vmem:[#allocation2 + $0x110] sm:$0xff] }
  0x3c   :  { %917 = vmatpush.bf16.msrb.mxu2 %v775_v8  ;;  %v593_v17 = vcvt.s32.f32 %v337_v10  ;;  %v595_v18 = vcvt.s32.f32 %v339_v11  ;;  %v401_v19 = vunpack.c.0.s8 %v151_v51  ;;  %v403_v20 = vunpack.c.1.s8 %v151_v51  ;;  %v4327_v5 = vld [vmem:[#allocation2 + $0x150] sm:$0xff] }
  0x3d   :  { %931 = vmatpush.bf16.msrb.mxu3 %v791_v13  ;;  %v741_v22 = vpack.c.bf16 %v563_v14, %v561_v9  ;;  %v625_v23 = vcvt.s32.f32 %v369_v15  ;;  %v627_v24 = vcvt.s32.f32 %v371_v16  ;;  %v301_v25 = vunpack.c.2.s8 %v125_v12  ;;  %v139_v10 = vld [vmem:[#allocation2 + $0x190] sm:$0xff] }
  0x3e   :  { %v757_v27 = vpack.c.bf16 %v595_v18, %v593_v17  ;;  %v657_v28 = vcvt.s32.f32 %v401_v19  ;;  %v659_v29 = vcvt.s32.f32 %v403_v20  ;;  %v303_v30 = vunpack.c.3.s8 %v125_v12  ;;  %v4333_v15 = vld [vmem:[#allocation2 + $0x1d0] sm:$0xff]  ;;  %v4024_v20 = vld [vmem:[%s5371_s0 + $0x4] sm:$0xf] }
  0x3f   :  { %890 = vmatpush.bf16.msrb.mxu0 %v741_v22  ;;  %v773_v32 = vpack.c.bf16 %v627_v24, %v625_v23  ;;  %v557_v33 = vcvt.s32.f32 %v301_v25  ;;  %v333_v34 = vunpack.c.2.s8 %v133_v21  ;;  %v335_v35 = vunpack.c.3.s8 %v133_v21  ;;  %v3834_v25 = vld [vmem:[%s5371_s0 + $0x20] sm:$0xf0] }
  0x40   :  { %904 = vmatpush.bf16.msrb.mxu1 %v757_v27  ;;  %v789_v36 = vpack.c.bf16 %v659_v29, %v657_v28  ;;  %v559_v37 = vcvt.s32.f32 %v303_v30  ;;  %v365_v38 = vunpack.c.2.s8 %v141_v26  ;;  %v367_v39 = vunpack.c.3.s8 %v141_v26  ;;  %v3842_v27 = vld [vmem:[%s5371_s0 + $0x28] sm:$0xf0] }
  0x41   :  { %918 = vmatpush.bf16.msrb.mxu2 %v773_v32  ;;  %v589_v40 = vcvt.s32.f32 %v333_v34  ;;  %v591_v41 = vcvt.s32.f32 %v335_v35  ;;  %v397_v42 = vunpack.c.2.s8 %v149_v31  ;;  %v399_v43 = vunpack.c.3.s8 %v149_v31 }
  0x42   :  { %932 = vmatpush.bf16.msrb.mxu3 %v789_v36  ;;  %v739_v44 = vpack.c.bf16 %v559_v37, %v557_v33  ;;  %v621_v45 = vcvt.s32.f32 %v365_v38  ;;  %v623_v46 = vcvt.s32.f32 %v367_v39  ;;  %v297_v47 = vunpack.c.0.s8 %v125_v12 }
  0x43   :  { %v755_v48 = vpack.c.bf16 %v591_v41, %v589_v40  ;;  %v653_v49 = vcvt.s32.f32 %v397_v42  ;;  %v655_v50 = vcvt.s32.f32 %v399_v43  ;;  %v299_v51 = vunpack.c.1.s8 %v125_v12 }
  0x44   :  { %891 = vmatpush.bf16.msrb.mxu0 %v739_v44  ;;  %v771_v52 = vpack.c.bf16 %v623_v46, %v621_v45  ;;  %v553_v53 = vcvt.s32.f32 %v297_v47  ;;  %v329_v54 = vunpack.c.0.s8 %v133_v21  ;;  %v331_v55 = vunpack.c.1.s8 %v133_v21 }
  0x45   :  { %905 = vmatpush.bf16.msrb.mxu1 %v755_v48  ;;  %v787_v58 = vpack.c.bf16 %v655_v50, %v653_v49  ;;  %v555_v59 = vcvt.s32.f32 %v299_v51  ;;  %v361_v60 = vunpack.c.0.s8 %v141_v26  ;;  %v363_v61 = vunpack.c.1.s8 %v141_v26  ;;  %v4025_v26 = vld [vmem:[%s5371_s0 + $0xc] sm:$0xf]  ;;  %v121_v48 = vld [vmem:[#allocation2 + $0x100] sm:$0xff] }
  0x46   :  { %919 = vmatpush.bf16.msrb.mxu2 %v771_v52  ;;  %v585_v0 = vcvt.s32.f32 %v329_v54  ;;  %v587_v1 = vcvt.s32.f32 %v331_v55  ;;  %v393_v2 = vunpack.c.0.s8 %v149_v31  ;;  %v395_v3 = vunpack.c.1.s8 %v149_v31 }
  0x47   :  { %933 = vmatpush.bf16.msrb.mxu3 %v787_v58  ;;  %v737_v6 = vpack.c.bf16 %v555_v59, %v553_v53  ;;  %v617_v7 = vcvt.s32.f32 %v361_v60  ;;  %v619_v8 = vcvt.s32.f32 %v363_v61  ;;  %v4329_v9 = vor.u32 %v4028_v57, %v3832_v56  ;;  %v129_v53 = vld [vmem:[#allocation2 + $0x140] sm:$0xff] }
  0x48   :  { %v753_v11 = vpack.c.bf16 %v587_v1, %v585_v0  ;;  %v649_v12 = vcvt.s32.f32 %v393_v2  ;;  %v651_v13 = vcvt.s32.f32 %v395_v3  ;;  %v4331_v14 = vor.u32 %v4029_v63, %v3840_v62  ;;  %v137_v62 = vld [vmem:[#allocation2 + $0x180] sm:$0xff] }
  0x49   :  { %892 = vmatpush.bf16.msrb.mxu0 %v737_v6  ;;  %v769_v16 = vpack.c.bf16 %v619_v8, %v617_v7  ;;  %v293_v17 = vunpack.c.2.s8 %v123_v4  ;;  %v295_v18 = vunpack.c.3.s8 %v123_v4  ;;  %v325_v19 = vunpack.c.2.s8 %v4327_v5  ;;  %v145_v3 = vld [vmem:[#allocation2 + $0x1c0] sm:$0xff] }
  0x4a   :  { %906 = vmatpush.bf16.msrb.mxu1 %v753_v11  ;;  %v785_v21 = vpack.c.bf16 %v651_v13, %v649_v12  ;;  %841 = vmatmul.bf16.vlgmr.msra.gmra.mxu0 %v4329_v9  ;;  %v327_v22 = vunpack.c.3.s8 %v4327_v5  ;;  %v357_v23 = vunpack.c.2.s8 %v139_v10  ;;  %v359_v24 = vunpack.c.3.s8 %v139_v10 }
  0x4b   :  { %920 = vmatpush.bf16.msrb.mxu2 %v769_v16  ;;  %v549_v28 = vcvt.s32.f32 %v293_v17  ;;  %v551_v29 = vcvt.s32.f32 %v295_v18  ;;  %v581_v30 = vcvt.s32.f32 %v325_v19  ;;  %v389_v31 = vunpack.c.2.s8 %v4333_v15 }
  0x4c   :  { %934 = vmatpush.bf16.msrb.mxu3 %v785_v21  ;;  %869 = vmatmul.bf16.vlgmr.msra.gmra.mxu2 %v4331_v14  ;;  %v583_v32 = vcvt.s32.f32 %v327_v22  ;;  %v613_v33 = vcvt.s32.f32 %v357_v23  ;;  %v615_v34 = vcvt.s32.f32 %v359_v24  ;;  %v391_v35 = vunpack.c.3.s8 %v4333_v15 }
  0x4d   :  { %v735_v36 = vpack.c.bf16 %v551_v29, %v549_v28  ;;  %v645_v37 = vcvt.s32.f32 %v389_v31  ;;  %v4353_v38 = vor.u32 %v4024_v20, %v3834_v25  ;;  %v4355_v39 = vor.u32 %v4025_v26, %v3842_v27 }
  0x4e   :  { %v751_v40 = vpack.c.bf16 %v583_v32, %v581_v30  ;;  %v767_v41 = vpack.c.bf16 %v615_v34, %v613_v33  ;;  %v647_v42 = vcvt.s32.f32 %v391_v35  ;;  %v289_v43 = vunpack.c.0.s8 %v123_v4  ;;  %v4363_v30 = vld [vmem:[#allocation2 + $0x38] sm:$0xff] }
  0x4f   :  { %893 = vmatpush.bf16.msrb.mxu0 %v735_v36  ;;  %855 = vmatmul.bf16.vlgmr.msra.gmra.mxu1 %v4353_v38  ;;  %v291_v44 = vunpack.c.1.s8 %v123_v4  ;;  %v321_v45 = vunpack.c.0.s8 %v4327_v5  ;;  %v323_v46 = vunpack.c.1.s8 %v4327_v5  ;;  %v353_v47 = vunpack.c.0.s8 %v139_v10 }
  0x50   :  { %907 = vmatpush.bf16.msrb.mxu1 %v751_v40  ;;  %921 = vmatpush.bf16.msrb.mxu2 %v767_v41  ;;  %v783_v49 = vpack.c.bf16 %v647_v42, %v645_v37  ;;  %v545_v50 = vcvt.s32.f32 %v289_v43  ;;  %v355_v51 = vunpack.c.1.s8 %v139_v10  ;;  %v385_v52 = vunpack.c.0.s8 %v4333_v15  ;;  %v4365_v41 = vld [vmem:[#allocation2 + $0x78] sm:$0xff] }
  0x51   :  { %883 = vmatmul.bf16.vlgmr.msra.gmra.mxu3 %v4355_v39  ;;  %v547_v54 = vcvt.s32.f32 %v291_v44  ;;  %v577_v55 = vcvt.s32.f32 %v321_v45  ;;  %v579_v56 = vcvt.s32.f32 %v323_v46  ;;  %v609_v57 = vcvt.s32.f32 %v353_v47  ;;  %v4368_v46 = vld [vmem:[#allocation2 + $0xb8] sm:$0xff] }
  0x52   :  { %935 = vmatpush.bf16.msrb.mxu3 %v783_v49  ;;  %v611_v58 = vcvt.s32.f32 %v355_v51  ;;  %v387_v59 = vunpack.c.1.s8 %v4333_v15  ;;  %v641_v60 = vcvt.s32.f32 %v385_v52  ;;  %v285_v61 = vunpack.c.2.s8 %v121_v48  ;;  %v4371_v51 = vld [vmem:[#allocation2 + $0xf8] sm:$0xff] }
  0x53   :  { %v733_v63 = vpack.c.bf16 %v547_v54, %v545_v50  ;;  %v749_v0 = vpack.c.bf16 %v579_v56, %v577_v55  ;;  %v287_v1 = vunpack.c.3.s8 %v121_v48  ;;  %v317_v2 = vunpack.c.2.s8 %v129_v53  ;;  %v3848_v56 = vld [vmem:[%s5371_s0 + $0x10] sm:$0xf] }
  0x54   :  { %v765_v4 = vpack.c.bf16 %v611_v58, %v609_v57  ;;  %v643_v5 = vcvt.s32.f32 %v387_v59  ;;  %v541_v6 = vcvt.s32.f32 %v285_v61  ;;  %v319_v7 = vunpack.c.3.s8 %v129_v53  ;;  %v4030_v57 = vld [vmem:[%s5371_s0 + $0x2c] sm:$0xf0] }
  0x55   :  { %894 = vmatpush.bf16.msrb.mxu0 %v733_v63  ;;  %908 = vmatpush.bf16.msrb.mxu1 %v749_v0  ;;  %v543_v8 = vcvt.s32.f32 %v287_v1  ;;  %v573_v10 = vcvt.s32.f32 %v317_v2  ;;  %v349_v11 = vunpack.c.2.s8 %v137_v62  ;;  %v351_v12 = vunpack.c.3.s8 %v137_v62  ;;  %v4031_v63 = vld [vmem:[%s5371_s0 + $0x34] sm:$0xf0]  ;;  %v4026_v0 = vld [vmem:[%s5371_s0 + $0x14] sm:$0xf] }
  0x56   :  { %922 = vmatpush.bf16.msrb.mxu2 %v765_v4  ;;  %v781_v13 = vpack.c.bf16 %v643_v5, %v641_v60  ;;  %v575_v15 = vcvt.s32.f32 %v319_v7  ;;  %v381_v16 = vunpack.c.2.s8 %v145_v3  ;;  %v383_v17 = vunpack.c.3.s8 %v145_v3  ;;  %v3850_v5 = vld [vmem:[%s5371_s0 + $0x30] sm:$0xf0]  ;;  %v3858_v7 = vld [vmem:[%s5371_s0 + $0x38] sm:$0xf0] }
  0x57   :  { %v731_v18 = vpack.c.bf16 %v543_v8, %v541_v6  ;;  %v605_v19 = vcvt.s32.f32 %v349_v11  ;;  %v607_v20 = vcvt.s32.f32 %v351_v12  ;;  %v281_v21 = vunpack.c.0.s8 %v121_v48  ;;  %v4027_v6 = vld [vmem:[%s5371_s0 + $0x1c] sm:$0xf] }
  0x58   :  { %936 = vmatpush.bf16.msrb.mxu3 %v781_v13  ;;  %v747_v22 = vpack.c.bf16 %v575_v15, %v573_v10  ;;  %v637_v23 = vcvt.s32.f32 %v381_v16  ;;  %v639_v24 = vcvt.s32.f32 %v383_v17  ;;  %v283_v25 = vunpack.c.1.s8 %v121_v48 }
  0x59   :  { %895 = vmatpush.bf16.msrb.mxu0 %v731_v18  ;;  %v763_v26 = vpack.c.bf16 %v607_v20, %v605_v19  ;;  %v537_v27 = vcvt.s32.f32 %v281_v21  ;;  %v313_v28 = vunpack.c.0.s8 %v129_v53  ;;  %v315_v29 = vunpack.c.1.s8 %v129_v53 }
  0x5a   :  { %909 = vmatpush.bf16.msrb.mxu1 %v747_v22  ;;  %v779_v31 = vpack.c.bf16 %v639_v24, %v637_v23  ;;  %v539_v32 = vcvt.s32.f32 %v283_v25  ;;  %v345_v33 = vunpack.c.0.s8 %v137_v62  ;;  %v347_v34 = vunpack.c.1.s8 %v137_v62  ;;  %v3856_v62 = vld [vmem:[%s5371_s0 + $0x18] sm:$0xf] }
  0x5b   :  { %923 = vmatpush.bf16.msrb.mxu2 %v763_v26  ;;  %v569_v35 = vcvt.s32.f32 %v313_v28  ;;  %v571_v36 = vcvt.s32.f32 %v315_v29  ;;  %v377_v37 = vunpack.c.0.s8 %v145_v3  ;;  %v379_v40 = vunpack.c.1.s8 %v145_v3  ;;  %v94_v26 = vld [vmem:[#allocation2 + $0x28] sm:$0xff] }
  0x5c   :  { %937 = vmatpush.bf16.msrb.mxu3 %v779_v31  ;;  %v729_v42 = vpack.c.bf16 %v539_v32, %v537_v27  ;;  %v601_v43 = vcvt.s32.f32 %v345_v33  ;;  %v603_v44 = vcvt.s32.f32 %v347_v34  ;;  %v182_v45 = vunpack.c.2.s8 %v4363_v30 }
  0x5d   :  { %v745_v47 = vpack.c.bf16 %v571_v36, %v569_v35  ;;  %v633_v48 = vcvt.s32.f32 %v377_v37  ;;  %v635_v49 = vcvt.s32.f32 %v379_v40  ;;  %v184_v50 = vunpack.c.3.s8 %v4363_v30  ;;  %v102_v35 = vld [vmem:[#allocation2 + $0x68] sm:$0xff] }
  0x5e   :  { %896 = vmatpush.bf16.msrb.mxu0 %v729_v42  ;;  %v761_v52 = vpack.c.bf16 %v603_v44, %v601_v43  ;;  %v438_v53 = vcvt.s32.f32 %v182_v45  ;;  %v214_v54 = vunpack.c.2.s8 %v4365_v41  ;;  %v216_v55 = vunpack.c.3.s8 %v4365_v41  ;;  %v110_v42 = vld [vmem:[#allocation2 + $0xa8] sm:$0xff] }
  0x5f   :  { %910 = vmatpush.bf16.msrb.mxu1 %v745_v47  ;;  %v777_v58 = vpack.c.bf16 %v635_v49, %v633_v48  ;;  %v440_v59 = vcvt.s32.f32 %v184_v50  ;;  %v246_v60 = vunpack.c.2.s8 %v4368_v46  ;;  %v248_v61 = vunpack.c.3.s8 %v4368_v46  ;;  %v118_v47 = vld [vmem:[#allocation2 + $0xe8] sm:$0xff] }
  0x60   :  { %924 = vmatpush.bf16.msrb.mxu2 %v761_v52  ;;  %v470_v1 = vcvt.s32.f32 %v214_v54  ;;  %v472_v2 = vcvt.s32.f32 %v216_v55  ;;  %v278_v3 = vunpack.c.2.s8 %v4371_v51  ;;  %v280_v4 = vunpack.c.3.s8 %v4371_v51 }
  0x61   :  { %938 = vmatpush.bf16.msrb.mxu3 %v777_v58  ;;  %v680_v8 = vpack.c.bf16 %v440_v59, %v438_v53  ;;  %v502_v10 = vcvt.s32.f32 %v246_v60  ;;  %v504_v11 = vcvt.s32.f32 %v248_v61  ;;  %v4403_v12 = vor.u32 %v4030_v57, %v3848_v56 }
  0x62   :  { %v696_v13 = vpack.c.bf16 %v472_v2, %v470_v1  ;;  %v534_v15 = vcvt.s32.f32 %v278_v3  ;;  %v536_v16 = vcvt.s32.f32 %v280_v4  ;;  %v4405_v17 = vor.u32 %v4031_v63, %v3856_v62 }
  0x63   :  { %945 = vmatpush.bf16.msra.mxu0 %v680_v8  ;;  %v712_v18 = vpack.c.bf16 %v504_v11, %v502_v10  ;;  %v4407_v19 = vor.u32 %v4026_v0, %v3850_v5  ;;  %v4409_v20 = vor.u32 %v4027_v6, %v3858_v7  ;;  %v178_v21 = vunpack.c.0.s8 %v4363_v30  ;;  %v92_v8 = vld [vmem:[#allocation2 + $0x18] sm:$0xff] }
  0x64   :  { %959 = vmatpush.bf16.msra.mxu1 %v696_v13  ;;  %v728_v22 = vpack.c.bf16 %v536_v16, %v534_v15  ;;  %897 = vmatmul.bf16.vlgmr.msrb.gmra.mxu0 %v4403_v12  ;;  %v180_v23 = vunpack.c.1.s8 %v4363_v30  ;;  %v210_v24 = vunpack.c.0.s8 %v4365_v41  ;;  %v212_v25 = vunpack.c.1.s8 %v4365_v41 }
  0x65   :  { %973 = vmatpush.bf16.msra.mxu2 %v712_v18  ;;  %911 = vmatmul.bf16.vlgmr.msrb.gmra.mxu1 %v4407_v19  ;;  %v434_v27 = vcvt.s32.f32 %v178_v21  ;;  %v242_v28 = vunpack.c.0.s8 %v4368_v46  ;;  %v244_v29 = vunpack.c.1.s8 %v4368_v46  ;;  %v274_v31 = vunpack.c.0.s8 %v4371_v51 }
  0x66   :  { %987 = vmatpush.bf16.msra.mxu3 %v728_v22  ;;  %925 = vmatmul.bf16.vlgmr.msrb.gmra.mxu2 %v4405_v17  ;;  %v436_v32 = vcvt.s32.f32 %v180_v23  ;;  %v466_v30 = vcvt.s32.f32 %v210_v24  ;;  %v468_v33 = vcvt.s32.f32 %v212_v25  ;;  %v276_v34 = vunpack.c.1.s8 %v4371_v51  ;;  %v100_v23 = vld [vmem:[#allocation2 + $0x58] sm:$0xff] }
  0x67   :  { %939 = vmatmul.bf16.vlgmr.msrb.gmra.mxu3 %v4409_v20  ;;  %v498_v36 = vcvt.s32.f32 %v242_v28  ;;  %v500_v37 = vcvt.s32.f32 %v244_v29  ;;  %v530_v40 = vcvt.s32.f32 %v274_v31  ;;  %v174_v41 = vunpack.c.2.s8 %v94_v26  ;;  %v108_v28 = vld [vmem:[#allocation2 + $0x98] sm:$0xff] }
  0x68   :  { %v678_v43 = vpack.c.bf16 %v436_v32, %v434_v27  ;;  %v694_v44 = vpack.c.bf16 %v468_v33, %v466_v30  ;;  %v532_v45 = vcvt.s32.f32 %v276_v34  ;;  %v176_v46 = vunpack.c.3.s8 %v94_v26  ;;  %v116_v33 = vld [vmem:[#allocation2 + $0xd8] sm:$0xff] }
  0x69   :  { %v710_v48 = vpack.c.bf16 %v500_v37, %v498_v36  ;;  %v430_v49 = vcvt.s32.f32 %v174_v41  ;;  %v206_v50 = vunpack.c.2.s8 %v102_v35  ;;  %v208_v52 = vunpack.c.3.s8 %v102_v35 }
  0x6a   :  { %946 = vmatpush.bf16.msra.mxu0 %v678_v43  ;;  %960 = vmatpush.bf16.msra.mxu1 %v694_v44  ;;  %v726_v51 = vpack.c.bf16 %v532_v45, %v530_v40  ;;  %v432_v53 = vcvt.s32.f32 %v176_v46  ;;  %v238_v54 = vunpack.c.2.s8 %v110_v42  ;;  %v240_v55 = vunpack.c.3.s8 %v110_v42 }
  0x6b   :  { %974 = vmatpush.bf16.msra.mxu2 %v710_v48  ;;  %v462_v56 = vcvt.s32.f32 %v206_v50  ;;  %v464_v57 = vcvt.s32.f32 %v208_v52  ;;  %v270_v58 = vunpack.c.2.s8 %v118_v47  ;;  %v272_v59 = vunpack.c.3.s8 %v118_v47 }
  0x6c   :  { %988 = vmatpush.bf16.msra.mxu3 %v726_v51  ;;  %v676_v60 = vpack.c.bf16 %v432_v53, %v430_v49  ;;  %v494_v61 = vcvt.s32.f32 %v238_v54  ;;  %v496_v62 = vcvt.s32.f32 %v240_v55  ;;  %v170_v63 = vunpack.c.0.s8 %v94_v26 }
  0x6d   :  { %v692_v0 = vpack.c.bf16 %v464_v57, %v462_v56  ;;  %v526_v1 = vcvt.s32.f32 %v270_v58  ;;  %v528_v2 = vcvt.s32.f32 %v272_v59  ;;  %v172_v3 = vunpack.c.1.s8 %v94_v26 }
  0x6e   :  { %947 = vmatpush.bf16.msra.mxu0 %v676_v60  ;;  %v708_v4 = vpack.c.bf16 %v496_v62, %v494_v61  ;;  %v426_v5 = vcvt.s32.f32 %v170_v63  ;;  %v202_v6 = vunpack.c.0.s8 %v102_v35  ;;  %v204_v7 = vunpack.c.1.s8 %v102_v35  ;;  %v90_v60 = vld [vmem:[#allocation2 + $0x8] sm:$0xff] }
  0x6f   :  { %961 = vmatpush.bf16.msra.mxu1 %v692_v0  ;;  %v724_v10 = vpack.c.bf16 %v528_v2, %v526_v1  ;;  %v428_v11 = vcvt.s32.f32 %v172_v3  ;;  %v234_v13 = vunpack.c.0.s8 %v110_v42  ;;  %v236_v15 = vunpack.c.1.s8 %v110_v42 }
  0x70   :  { %975 = vmatpush.bf16.msra.mxu2 %v708_v4  ;;  %v458_v16 = vcvt.s32.f32 %v202_v6  ;;  %v460_v18 = vcvt.s32.f32 %v204_v7  ;;  %v266_v21 = vunpack.c.0.s8 %v118_v47  ;;  %v268_v22 = vunpack.c.1.s8 %v118_v47 }
  0x71   :  { %989 = vmatpush.bf16.msra.mxu3 %v724_v10  ;;  %v674_v24 = vpack.c.bf16 %v428_v11, %v426_v5  ;;  %v490_v25 = vcvt.s32.f32 %v234_v13  ;;  %v492_v26 = vcvt.s32.f32 %v236_v15  ;;  %v166_v27 = vunpack.c.2.s8 %v92_v8  ;;  %v98_v5 = vld [vmem:[#allocation2 + $0x48] sm:$0xff] }
  0x72   :  { %v690_v29 = vpack.c.bf16 %v460_v18, %v458_v16  ;;  %v522_v31 = vcvt.s32.f32 %v266_v21  ;;  %v524_v32 = vcvt.s32.f32 %v268_v22  ;;  %v168_v30 = vunpack.c.3.s8 %v92_v8  ;;  %v106_v11 = vld [vmem:[#allocation2 + $0x88] sm:$0xff] }
  0x73   :  { %948 = vmatpush.bf16.msra.mxu0 %v674_v24  ;;  %v706_v34 = vpack.c.bf16 %v492_v26, %v490_v25  ;;  %v422_v35 = vcvt.s32.f32 %v166_v27  ;;  %v198_v36 = vunpack.c.2.s8 %v100_v23  ;;  %v200_v37 = vunpack.c.3.s8 %v100_v23  ;;  %v114_v21 = vld [vmem:[#allocation2 + $0xc8] sm:$0xff] }
  0x74   :  { %962 = vmatpush.bf16.msra.mxu1 %v690_v29  ;;  %v722_v40 = vpack.c.bf16 %v524_v32, %v522_v31  ;;  %v424_v41 = vcvt.s32.f32 %v168_v30  ;;  %v230_v42 = vunpack.c.2.s8 %v108_v28  ;;  %v232_v43 = vunpack.c.3.s8 %v108_v28 }
  0x75   :  { %976 = vmatpush.bf16.msra.mxu2 %v706_v34  ;;  %v454_v44 = vcvt.s32.f32 %v198_v36  ;;  %v456_v45 = vcvt.s32.f32 %v200_v37  ;;  %v262_v46 = vunpack.c.2.s8 %v116_v33  ;;  %v264_v47 = vunpack.c.3.s8 %v116_v33 }
  0x76   :  { %990 = vmatpush.bf16.msra.mxu3 %v722_v40  ;;  %v672_v48 = vpack.c.bf16 %v424_v41, %v422_v35  ;;  %v486_v49 = vcvt.s32.f32 %v230_v42  ;;  %v488_v50 = vcvt.s32.f32 %v232_v43  ;;  %v162_v52 = vunpack.c.0.s8 %v92_v8 }
  0x77   :  { %v688_v51 = vpack.c.bf16 %v456_v45, %v454_v44  ;;  %v518_v53 = vcvt.s32.f32 %v262_v46  ;;  %v520_v54 = vcvt.s32.f32 %v264_v47  ;;  %v164_v55 = vunpack.c.1.s8 %v92_v8 }
  0x78   :  { %949 = vmatpush.bf16.msra.mxu0 %v672_v48  ;;  %v704_v56 = vpack.c.bf16 %v488_v50, %v486_v49  ;;  %v418_v57 = vcvt.s32.f32 %v162_v52  ;;  %v194_v58 = vunpack.c.0.s8 %v100_v23  ;;  %v196_v59 = vunpack.c.1.s8 %v100_v23  ;;  %v128_v48 = vld [vmem:[#allocation2 + $0x138] sm:$0xff] }
  0x79   :  { %963 = vmatpush.bf16.msra.mxu1 %v688_v51  ;;  %v720_v61 = vpack.c.bf16 %v520_v54, %v518_v53  ;;  %v420_v62 = vcvt.s32.f32 %v164_v55  ;;  %v226_v63 = vunpack.c.0.s8 %v108_v28  ;;  %v228_v0 = vunpack.c.1.s8 %v108_v28 }
  0x7a   :  { %977 = vmatpush.bf16.msra.mxu2 %v704_v56  ;;  %v450_v1 = vcvt.s32.f32 %v194_v58  ;;  %v452_v2 = vcvt.s32.f32 %v196_v59  ;;  %v258_v3 = vunpack.c.0.s8 %v116_v33  ;;  %v260_v4 = vunpack.c.1.s8 %v116_v33 }
  0x7b   :  { %991 = vmatpush.bf16.msra.mxu3 %v720_v61  ;;  %v670_v6 = vpack.c.bf16 %v420_v62, %v418_v57  ;;  %v482_v7 = vcvt.s32.f32 %v226_v63  ;;  %v484_v8 = vcvt.s32.f32 %v228_v0  ;;  %v158_v10 = vunpack.c.2.s8 %v90_v60  ;;  %v136_v57 = vld [vmem:[#allocation2 + $0x178] sm:$0xff] }
  0x7c   :  { %v686_v13 = vpack.c.bf16 %v452_v2, %v450_v1  ;;  %v514_v15 = vcvt.s32.f32 %v258_v3  ;;  %v516_v16 = vcvt.s32.f32 %v260_v4  ;;  %v160_v18 = vunpack.c.3.s8 %v90_v60  ;;  %v144_v62 = vld [vmem:[#allocation2 + $0x1b8] sm:$0xff] }
  0x7d   :  { %950 = vmatpush.bf16.msra.mxu0 %v670_v6  ;;  %v702_v22 = vpack.c.bf16 %v484_v8, %v482_v7  ;;  %v414_v23 = vcvt.s32.f32 %v158_v10  ;;  %v190_v24 = vunpack.c.2.s8 %v98_v5  ;;  %v192_v25 = vunpack.c.3.s8 %v98_v5  ;;  %v152_v3 = vld [vmem:[#allocation2 + $0x1f8] sm:$0xff] }
  0x7e   :  { %964 = vmatpush.bf16.msra.mxu1 %v686_v13  ;;  %v718_v26 = vpack.c.bf16 %v516_v16, %v514_v15  ;;  %v416_v27 = vcvt.s32.f32 %v160_v18  ;;  %v222_v28 = vunpack.c.2.s8 %v106_v11  ;;  %v224_v29 = vunpack.c.3.s8 %v106_v11 }
  0x7f   :  { %978 = vmatpush.bf16.msra.mxu2 %v702_v22  ;;  %v446_v31 = vcvt.s32.f32 %v190_v24  ;;  %v448_v32 = vcvt.s32.f32 %v192_v25  ;;  %v254_v30 = vunpack.c.2.s8 %v114_v21  ;;  %v256_v33 = vunpack.c.3.s8 %v114_v21 }
  0x80   :  { %992 = vmatpush.bf16.msra.mxu3 %v718_v26  ;;  %v668_v34 = vpack.c.bf16 %v416_v27, %v414_v23  ;;  %v478_v35 = vcvt.s32.f32 %v222_v28  ;;  %v480_v36 = vcvt.s32.f32 %v224_v29  ;;  %v154_v37 = vunpack.c.0.s8 %v90_v60 }
  0x81   :  { %v684_v40 = vpack.c.bf16 %v448_v32, %v446_v31  ;;  %v510_v41 = vcvt.s32.f32 %v254_v30  ;;  %v512_v42 = vcvt.s32.f32 %v256_v33  ;;  %v156_v43 = vunpack.c.1.s8 %v90_v60 }
  0x82   :  { %951 = vmatpush.bf16.msra.mxu0 %v668_v34  ;;  %v700_v44 = vpack.c.bf16 %v480_v36, %v478_v35  ;;  %v410_v45 = vcvt.s32.f32 %v154_v37  ;;  %v186_v46 = vunpack.c.0.s8 %v98_v5  ;;  %v188_v47 = vunpack.c.1.s8 %v98_v5  ;;  %v126_v34 = vld [vmem:[#allocation2 + $0x128] sm:$0xff] }
  0x83   :  { %965 = vmatpush.bf16.msra.mxu1 %v684_v40  ;;  %v716_v49 = vpack.c.bf16 %v512_v42, %v510_v41  ;;  %v412_v50 = vcvt.s32.f32 %v156_v43  ;;  %v218_v52 = vunpack.c.0.s8 %v106_v11  ;;  %v220_v51 = vunpack.c.1.s8 %v106_v11  ;;  %v134_v43 = vld [vmem:[#allocation2 + $0x168] sm:$0xff] }
  0x84   :  { %979 = vmatpush.bf16.msra.mxu2 %v700_v44  ;;  %v442_v53 = vcvt.s32.f32 %v186_v46  ;;  %v444_v54 = vcvt.s32.f32 %v188_v47  ;;  %v250_v55 = vunpack.c.0.s8 %v114_v21  ;;  %v252_v56 = vunpack.c.1.s8 %v114_v21 }
  0x85   :  { %993 = vmatpush.bf16.msra.mxu3 %v716_v49  ;;  %v666_v58 = vpack.c.bf16 %v412_v50, %v410_v45  ;;  %v474_v59 = vcvt.s32.f32 %v218_v52  ;;  %v476_v60 = vcvt.s32.f32 %v220_v51  ;;  %v310_v61 = vunpack.c.2.s8 %v128_v48  ;;  %v150_v51 = vld [vmem:[#allocation2 + $0x1e8] sm:$0xff] }
  0x86   :  { %v682_v63 = vpack.c.bf16 %v444_v54, %v442_v53  ;;  %v506_v0 = vcvt.s32.f32 %v250_v55  ;;  %v508_v1 = vcvt.s32.f32 %v252_v56  ;;  %v312_v2 = vunpack.c.3.s8 %v128_v48 }
  0x87   :  { %952 = vmatpush.bf16.msra.mxu0 %v666_v58  ;;  %v698_v4 = vpack.c.bf16 %v476_v60, %v474_v59  ;;  %v566_v5 = vcvt.s32.f32 %v310_v61  ;;  %v342_v6 = vunpack.c.2.s8 %v136_v57  ;;  %v344_v7 = vunpack.c.3.s8 %v136_v57 }
  0x88   :  { %966 = vmatpush.bf16.msra.mxu1 %v682_v63  ;;  %v714_v8 = vpack.c.bf16 %v508_v1, %v506_v0  ;;  %v568_v10 = vcvt.s32.f32 %v312_v2  ;;  %v374_v11 = vunpack.c.2.s8 %v144_v62  ;;  %v376_v13 = vunpack.c.3.s8 %v144_v62 }
  0x89   :  { %980 = vmatpush.bf16.msra.mxu2 %v698_v4  ;;  %v598_v15 = vcvt.s32.f32 %v342_v6  ;;  %v600_v16 = vcvt.s32.f32 %v344_v7  ;;  %v406_v18 = vunpack.c.2.s8 %v152_v3  ;;  %v408_v21 = vunpack.c.3.s8 %v152_v3 }
  0x8a   :  { %994 = vmatpush.bf16.msra.mxu3 %v714_v8  ;;  %v744_v22 = vpack.c.bf16 %v568_v10, %v566_v5  ;;  %v630_v23 = vcvt.s32.f32 %v374_v11  ;;  %v632_v24 = vcvt.s32.f32 %v376_v13  ;;  %v306_v25 = vunpack.c.0.s8 %v128_v48  ;;  %953 = vmatmul.bf16.vlgmr.msra.gmra.mxu0 %v4329_v9 }
  0x8b   :  { %v760_v26 = vpack.c.bf16 %v600_v16, %v598_v15  ;;  %v662_v27 = vcvt.s32.f32 %v406_v18  ;;  %v664_v28 = vcvt.s32.f32 %v408_v21  ;;  %v308_v29 = vunpack.c.1.s8 %v128_v48  ;;  %967 = vmatmul.bf16.vlgmr.msra.gmra.mxu1 %v4353_v38  ;;  %v124_v15 = vld [vmem:[#allocation2 + $0x118] sm:$0xff] }
  0x8c   :  { %1001 = vmatpush.bf16.msrb.mxu0 %v744_v22  ;;  %v776_v31 = vpack.c.bf16 %v632_v24, %v630_v23  ;;  %v562_v32 = vcvt.s32.f32 %v306_v25  ;;  %v338_v30 = vunpack.c.0.s8 %v136_v57  ;;  %v340_v33 = vunpack.c.1.s8 %v136_v57  ;;  %981 = vmatmul.bf16.vlgmr.msra.gmra.mxu2 %v4331_v14  ;;  %v142_v14 = vld [vmem:[#allocation2 + $0x1a8] sm:$0xff] }
  0x8d   :  { %1015 = vmatpush.bf16.msrb.mxu1 %v760_v26  ;;  %v792_v35 = vpack.c.bf16 %v664_v28, %v662_v27  ;;  %v564_v36 = vcvt.s32.f32 %v308_v29  ;;  %v370_v37 = vunpack.c.0.s8 %v144_v62  ;;  %v372_v40 = vunpack.c.1.s8 %v144_v62  ;;  %995 = vmatmul.bf16.vlgmr.msra.gmra.mxu3 %v4355_v39  ;;  %v132_v27 = vld [vmem:[#allocation2 + $0x158] sm:$0xff] }
  0x8e   :  { %1029 = vmatpush.bf16.msrb.mxu2 %v776_v31  ;;  %v594_v9 = vcvt.s32.f32 %v338_v30  ;;  %v596_v41 = vcvt.s32.f32 %v340_v33  ;;  %v402_v42 = vunpack.c.0.s8 %v152_v3  ;;  %v404_v38 = vunpack.c.1.s8 %v152_v3  ;;  %v140_v30 = vld [vmem:[#allocation2 + $0x198] sm:$0xff] }
  0x8f   :  { %1043 = vmatpush.bf16.msrb.mxu3 %v792_v35  ;;  %v742_v44 = vpack.c.bf16 %v564_v36, %v562_v32  ;;  %v626_v45 = vcvt.s32.f32 %v370_v37  ;;  %v628_v46 = vcvt.s32.f32 %v372_v40  ;;  %v302_v47 = vunpack.c.2.s8 %v126_v34  ;;  %v148_v37 = vld [vmem:[#allocation2 + $0x1d8] sm:$0xff] }
  0x90   :  { %v758_v48 = vpack.c.bf16 %v596_v41, %v594_v9  ;;  %v658_v49 = vcvt.s32.f32 %v402_v42  ;;  %v660_v50 = vcvt.s32.f32 %v404_v38  ;;  %v304_v52 = vunpack.c.3.s8 %v126_v34 }
  0x91   :  { %1002 = vmatpush.bf16.msrb.mxu0 %v742_v44  ;;  %v774_v53 = vpack.c.bf16 %v628_v46, %v626_v45  ;;  %v558_v39 = vcvt.s32.f32 %v302_v47  ;;  %v334_v54 = vunpack.c.2.s8 %v134_v43  ;;  %v336_v55 = vunpack.c.3.s8 %v134_v43 }
  0x92   :  { %1016 = vmatpush.bf16.msrb.mxu1 %v758_v48  ;;  %v790_v56 = vpack.c.bf16 %v660_v50, %v658_v49  ;;  %v560_v57 = vcvt.s32.f32 %v304_v52  ;;  %v366_v58 = vunpack.c.2.s8 %v142_v14  ;;  %v368_v59 = vunpack.c.3.s8 %v142_v14 }
  0x93   :  { %1030 = vmatpush.bf16.msrb.mxu2 %v774_v53  ;;  %v590_v60 = vcvt.s32.f32 %v334_v54  ;;  %v592_v61 = vcvt.s32.f32 %v336_v55  ;;  %v398_v62 = vunpack.c.2.s8 %v150_v51  ;;  %v400_v63 = vunpack.c.3.s8 %v150_v51 }
  0x94   :  { %1044 = vmatpush.bf16.msrb.mxu3 %v790_v56  ;;  %v740_v0 = vpack.c.bf16 %v560_v57, %v558_v39  ;;  %v622_v1 = vcvt.s32.f32 %v366_v58  ;;  %v624_v2 = vcvt.s32.f32 %v368_v59  ;;  %v298_v3 = vunpack.c.0.s8 %v126_v34 }
  0x95   :  { %v756_v4 = vpack.c.bf16 %v592_v61, %v590_v60  ;;  %v654_v5 = vcvt.s32.f32 %v398_v62  ;;  %v656_v6 = vcvt.s32.f32 %v400_v63  ;;  %v300_v7 = vunpack.c.1.s8 %v126_v34  ;;  %v122_v60 = vld [vmem:[#allocation2 + $0x108] sm:$0xff] }
  0x96   :  { %1003 = vmatpush.bf16.msrb.mxu0 %v740_v0  ;;  %v772_v8 = vpack.c.bf16 %v624_v2, %v622_v1  ;;  %v554_v10 = vcvt.s32.f32 %v298_v3  ;;  %v330_v11 = vunpack.c.0.s8 %v134_v43  ;;  %v332_v13 = vunpack.c.1.s8 %v134_v43 }
  0x97   :  { %1017 = vmatpush.bf16.msrb.mxu1 %v756_v4  ;;  %v788_v16 = vpack.c.bf16 %v656_v6, %v654_v5  ;;  %v556_v18 = vcvt.s32.f32 %v300_v7  ;;  %v362_v21 = vunpack.c.0.s8 %v142_v14  ;;  %v364_v22 = vunpack.c.1.s8 %v142_v14  ;;  %v130_v5 = vld [vmem:[#allocation2 + $0x148] sm:$0xff] }
  0x98   :  { %1031 = vmatpush.bf16.msrb.mxu2 %v772_v8  ;;  %v586_v23 = vcvt.s32.f32 %v330_v11  ;;  %v588_v24 = vcvt.s32.f32 %v332_v13  ;;  %v394_v25 = vunpack.c.0.s8 %v150_v51  ;;  %v396_v26 = vunpack.c.1.s8 %v150_v51  ;;  %v138_v11 = vld [vmem:[#allocation2 + $0x188] sm:$0xff] }
  0x99   :  { %1045 = vmatpush.bf16.msrb.mxu3 %v788_v16  ;;  %v738_v28 = vpack.c.bf16 %v556_v18, %v554_v10  ;;  %v618_v29 = vcvt.s32.f32 %v362_v21  ;;  %v620_v31 = vcvt.s32.f32 %v364_v22  ;;  %v294_v32 = vunpack.c.2.s8 %v124_v15  ;;  %v146_v21 = vld [vmem:[#allocation2 + $0x1c8] sm:$0xff] }
  0x9a   :  { %v754_v33 = vpack.c.bf16 %v588_v24, %v586_v23  ;;  %v650_v34 = vcvt.s32.f32 %v394_v25  ;;  %v652_v35 = vcvt.s32.f32 %v396_v26  ;;  %v296_v36 = vunpack.c.3.s8 %v124_v15 }
  0x9b   :  { %1004 = vmatpush.bf16.msrb.mxu0 %v738_v28  ;;  %v770_v40 = vpack.c.bf16 %v620_v31, %v618_v29  ;;  %v550_v9 = vcvt.s32.f32 %v294_v32  ;;  %v326_v41 = vunpack.c.2.s8 %v132_v27  ;;  %v328_v42 = vunpack.c.3.s8 %v132_v27 }
  0x9c   :  { %1018 = vmatpush.bf16.msrb.mxu1 %v754_v33  ;;  %v786_v38 = vpack.c.bf16 %v652_v35, %v650_v34  ;;  %v552_v43 = vcvt.s32.f32 %v296_v36  ;;  %v358_v44 = vunpack.c.2.s8 %v140_v30  ;;  %v360_v45 = vunpack.c.3.s8 %v140_v30 }
  0x9d   :  { %1032 = vmatpush.bf16.msrb.mxu2 %v770_v40  ;;  %v582_v46 = vcvt.s32.f32 %v326_v41  ;;  %v584_v47 = vcvt.s32.f32 %v328_v42  ;;  %v390_v14 = vunpack.c.2.s8 %v148_v37  ;;  %v392_v48 = vunpack.c.3.s8 %v148_v37 }
  0x9e   :  { %1046 = vmatpush.bf16.msrb.mxu3 %v786_v38  ;;  %v736_v49 = vpack.c.bf16 %v552_v43, %v550_v9  ;;  %v614_v50 = vcvt.s32.f32 %v358_v44  ;;  %v616_v52 = vcvt.s32.f32 %v360_v45  ;;  %v290_v51 = vunpack.c.0.s8 %v124_v15 }
  0x9f   :  { %v752_v53 = vpack.c.bf16 %v584_v47, %v582_v46  ;;  %v646_v39 = vcvt.s32.f32 %v390_v14  ;;  %v648_v54 = vcvt.s32.f32 %v392_v48  ;;  %v292_v55 = vunpack.c.1.s8 %v124_v15 }
  0xa0   :  { %1005 = vmatpush.bf16.msrb.mxu0 %v736_v49  ;;  %v768_v56 = vpack.c.bf16 %v616_v52, %v614_v50  ;;  %v546_v57 = vcvt.s32.f32 %v290_v51  ;;  %v322_v58 = vunpack.c.0.s8 %v132_v27  ;;  %v324_v59 = vunpack.c.1.s8 %v132_v27 }
  0xa1   :  { %1019 = vmatpush.bf16.msrb.mxu1 %v752_v53  ;;  %v784_v61 = vpack.c.bf16 %v648_v54, %v646_v39  ;;  %v548_v62 = vcvt.s32.f32 %v292_v55  ;;  %v354_v63 = vunpack.c.0.s8 %v140_v30  ;;  %v356_v0 = vunpack.c.1.s8 %v140_v30 }
  0xa2   :  { %1033 = vmatpush.bf16.msrb.mxu2 %v768_v56  ;;  %v578_v1 = vcvt.s32.f32 %v322_v58  ;;  %v580_v2 = vcvt.s32.f32 %v324_v59  ;;  %v386_v3 = vunpack.c.0.s8 %v148_v37  ;;  %v388_v4 = vunpack.c.1.s8 %v148_v37 }
  0xa3   :  { %1047 = vmatpush.bf16.msrb.mxu3 %v784_v61  ;;  %v734_v6 = vpack.c.bf16 %v548_v62, %v546_v57  ;;  %v610_v7 = vcvt.s32.f32 %v354_v63  ;;  %v612_v8 = vcvt.s32.f32 %v356_v0  ;;  %v286_v10 = vunpack.c.2.s8 %v122_v60  ;;  %v4055_v61 = vld [vmem:[%s5378_s7 + $0x38] sm:$0xff]  ;;  %v4036_v0 = vld [vmem:[%s5376_s5 + $0x20] sm:$0xff] }
  0xa4   :  { %v750_v13 = vpack.c.bf16 %v580_v2, %v578_v1  ;;  %v642_v15 = vcvt.s32.f32 %v386_v3  ;;  %v644_v16 = vcvt.s32.f32 %v388_v4  ;;  %v288_v18 = vunpack.c.3.s8 %v122_v60  ;;  %v4052_v1 = vld [vmem:[%s5378_s7 + $0x20] sm:$0xff]  ;;  %v4035_v2 = vld [vmem:[%s5376_s5 + $0x18] sm:$0xff] }
  0xa5   :  { %1006 = vmatpush.bf16.msrb.mxu0 %v734_v6  ;;  %v766_v22 = vpack.c.bf16 %v612_v8, %v610_v7  ;;  %v542_v23 = vcvt.s32.f32 %v286_v10  ;;  %v318_v24 = vunpack.c.2.s8 %v130_v5  ;;  %v320_v25 = vunpack.c.3.s8 %v130_v5  ;;  %v4051_v3 = vld [vmem:[%s5378_s7 + $0x18] sm:$0xff] }
  0xa6   :  { %1020 = vmatpush.bf16.msrb.mxu1 %v750_v13  ;;  %v782_v26 = vpack.c.bf16 %v644_v16, %v642_v15  ;;  %v544_v27 = vcvt.s32.f32 %v288_v18  ;;  %v350_v28 = vunpack.c.2.s8 %v138_v11  ;;  %v352_v29 = vunpack.c.3.s8 %v138_v11  ;;  %v4050_v13 = vld [vmem:[%s5378_s7 + $0x10] sm:$0xff]  ;;  %v4033_v16 = vld [vmem:[%s5376_s5 + $0x8] sm:$0xff] }
  0xa7   :  { %1034 = vmatpush.bf16.msrb.mxu2 %v766_v22  ;;  %v574_v31 = vcvt.s32.f32 %v318_v24  ;;  %v576_v32 = vcvt.s32.f32 %v320_v25  ;;  %v382_v30 = vunpack.c.2.s8 %v146_v21  ;;  %v384_v33 = vunpack.c.3.s8 %v146_v21  ;;  %v4049_v18 = vld [vmem:[%s5378_s7 + $0x8] sm:$0xff] }
  0xa8   :  { %1048 = vmatpush.bf16.msrb.mxu3 %v782_v26  ;;  %v732_v34 = vpack.c.bf16 %v544_v27, %v542_v23  ;;  %v606_v35 = vcvt.s32.f32 %v350_v28  ;;  %v608_v36 = vcvt.s32.f32 %v352_v29  ;;  %v282_v37 = vunpack.c.0.s8 %v122_v60  ;;  %v4032_v26 = vld [vmem:[%s5376_s5] sm:$0xff] }
  0xa9   :  { %v748_v40 = vpack.c.bf16 %v576_v32, %v574_v31  ;;  %v638_v9 = vcvt.s32.f32 %v382_v30  ;;  %v640_v41 = vcvt.s32.f32 %v384_v33  ;;  %v284_v42 = vunpack.c.1.s8 %v122_v60  ;;  %v4039_v60 = vld [vmem:[%s5376_s5 + $0x38] sm:$0xff]  ;;  %v4048_v27 = vld [vmem:[%s5378_s7] sm:$0xff] }
  0xaa   :  { %1007 = vmatpush.bf16.msrb.mxu0 %v732_v34  ;;  %v764_v38 = vpack.c.bf16 %v608_v36, %v606_v35  ;;  %v538_v43 = vcvt.s32.f32 %v282_v37  ;;  %v314_v44 = vunpack.c.0.s8 %v130_v5  ;;  %v316_v45 = vunpack.c.1.s8 %v130_v5  ;;  %v4482_v36 = vld [vmem:[%s5374_s3] sm:$0x3] }
  0xab   :  { %1021 = vmatpush.bf16.msrb.mxu1 %v748_v40  ;;  %v780_v46 = vpack.c.bf16 %v640_v41, %v638_v9  ;;  %v540_v47 = vcvt.s32.f32 %v284_v42  ;;  %v346_v14 = vunpack.c.0.s8 %v138_v11  ;;  %v348_v48 = vunpack.c.1.s8 %v138_v11  ;;  %v4034_v11 = vld [vmem:[%s5376_s5 + $0x10] sm:$0xff]  ;;  %v4488_v42 = vld [vmem:[%s5375_s4] sm:$0x3] }
  0xac   :  { %1035 = vmatpush.bf16.msrb.mxu2 %v764_v38  ;;  %v570_v49 = vcvt.s32.f32 %v314_v44  ;;  %v572_v50 = vcvt.s32.f32 %v316_v45  ;;  %v378_v52 = vunpack.c.0.s8 %v146_v21  ;;  %v380_v51 = vunpack.c.1.s8 %v146_v21 }
  0xad   :  { %1049 = vmatpush.bf16.msrb.mxu3 %v780_v46  ;;  %v730_v53 = vpack.c.bf16 %v540_v47, %v538_v43  ;;  %v602_v39 = vcvt.s32.f32 %v346_v14  ;;  %v604_v54 = vcvt.s32.f32 %v348_v48  ;;  %v1059_v41 = vperm.slane %v4482_v36, 0 }
  0xae   :  { %v746_v55 = vpack.c.bf16 %v572_v50, %v570_v49  ;;  %v634_v56 = vcvt.s32.f32 %v378_v52  ;;  %v636_v57 = vcvt.s32.f32 %v380_v51  ;;  %v1069_v45 = vperm.slane %v4488_v42, 0 }
  0xaf   :  { %1008 = vmatpush.bf16.msrb.mxu0 %v730_v53  ;;  %v762_v58 = vpack.c.bf16 %v604_v54, %v602_v39  ;;  %v4047_v53 = vld [vmem:[%s5376_s5 + $0x78] sm:$0xff] }
  0xb0   :  { %1022 = vmatpush.bf16.msrb.mxu1 %v746_v55  ;;  %v778_v59 = vpack.c.bf16 %v636_v57, %v634_v56  ;;  %v4063_v39 = vld [vmem:[%s5378_s7 + $0x78] sm:$0xff]  ;;  %v4046_v55 = vld [vmem:[%s5376_s5 + $0x70] sm:$0xff]  ;;  %v4045_v57 = vld [vmem:[%s5376_s5 + $0x68] sm:$0xff] }
  0xb1   :  { %1036 = vmatpush.bf16.msrb.mxu2 %v762_v58  ;;  %v4062_v56 = vld [vmem:[%s5378_s7 + $0x70] sm:$0xff]  ;;  %v4061_v58 = vld [vmem:[%s5378_s7 + $0x68] sm:$0xff] }
  0xb2   :  { %1050 = vmatpush.bf16.msrb.mxu3 %v778_v59  ;;  %1009 = vmatmul.bf16.vlgmr.msrb.gmra.mxu0 %v4403_v12  ;;  %v4038_v12 = vld [vmem:[%s5376_s5 + $0x30] sm:$0xff]  ;;  %v4044_v59 = vld [vmem:[%s5376_s5 + $0x60] sm:$0xff] }
  0xb3   :  { %1023 = vmatmul.bf16.vlgmr.msrb.gmra.mxu1 %v4407_v19  ;;  %1215 = vmatpush.bf16.msra.mxu0 %v4039_v60  ;;  %v4037_v19 = vld [vmem:[%s5376_s5 + $0x28] sm:$0xff]  ;;  %v4060_v60 = vld [vmem:[%s5378_s7 + $0x60] sm:$0xff] }
  0xb4   :  { %1037 = vmatmul.bf16.vlgmr.msrb.gmra.mxu2 %v4405_v17  ;;  %v4054_v17 = vld [vmem:[%s5378_s7 + $0x30] sm:$0xff]  ;;  %1229 = vmatpush.bf16.msra.mxu1 %v4047_v53  ;;  %v4077_v53 = vld [vmem:[%s5377_s6] ss:$0 sm:$0xff] }
  0xb5   :  { %1051 = vmatmul.bf16.vlgmr.msrb.gmra.mxu3 %v4409_v20  ;;  %1375 = vmatpush.bf16.msra.mxu2 %v4055_v61  ;;  %v4053_v20 = vld [vmem:[%s5378_s7 + $0x28] sm:$0xff]  ;;  %v4043_v61 = vld [vmem:[%s5376_s5 + $0x58] sm:$0xff] }
  0xb6   :  { %1389 = vmatpush.bf16.msra.mxu3 %v4063_v39  ;;  %v3992_v39 = vld [vmem:[%s5380_s9] sm:$0xf] }
  0xb7   :  { %1216 = vmatpush.bf16.msra.mxu0 %v4038_v12  ;;  %v4059_v12 = vld [vmem:[%s5378_s7 + $0x58] sm:$0xff] }
  0xb8   :  { %1230 = vmatpush.bf16.msra.mxu1 %v4046_v55  ;;  %v4064_v55 = vld [vmem:[%s5380_s9 + $0x4] sm:$0xf] }
  0xb9   :  { %1376 = vmatpush.bf16.msra.mxu2 %v4054_v17 }
  0xba   :  { %1390 = vmatpush.bf16.msra.mxu3 %v4062_v56  ;;  %v4078_v56 = vld [vmem:[%s5379_s8] ss:$0 sm:$0xff] }
  0xbb   :  { %1217 = vmatpush.bf16.msra.mxu0 %v4037_v19  ;;  %v4042_v19 = vld [vmem:[%s5376_s5 + $0x50] sm:$0xff] }
  0xbc   :  { %1231 = vmatpush.bf16.msra.mxu1 %v4045_v57 }
  0xbd   :  { %1377 = vmatpush.bf16.msra.mxu2 %v4053_v20  ;;  %v4058_v20 = vld [vmem:[%s5378_s7 + $0x50] sm:$0xff] }
  0xbe   :  { %1391 = vmatpush.bf16.msra.mxu3 %v4061_v58  ;;  %v3994_v58 = vld [vmem:[%s5380_s9 + $0x8] sm:$0xf0] }
  0xbf   :  { %1218 = vmatpush.bf16.msra.mxu0 %v4036_v0  ;;  %v4057_v0 = vld [vmem:[%s5378_s7 + $0x48] sm:$0xff] }
  0xc0   :  { %1232 = vmatpush.bf16.msra.mxu1 %v4044_v59 }
  0xc1   :  { %1378 = vmatpush.bf16.msra.mxu2 %v4052_v1 }
  0xc2   :  { %1392 = vmatpush.bf16.msra.mxu3 %v4060_v60 }
  0xc3   :  { %1219 = vmatpush.bf16.msra.mxu0 %v4035_v2 }
  0xc4   :  { %1233 = vmatpush.bf16.msra.mxu1 %v4043_v61  ;;  %v3997_v61 = vor.u32 %v4064_v55, %v3994_v58  ;;  %v1577_v55 = vld [vmem:[#allocation5 + $0x308] sm:$0xff] }
  0xc5   :  { %1379 = vmatpush.bf16.msra.mxu2 %v4051_v3 }
  0xc6   :  { %1393 = vmatpush.bf16.msra.mxu3 %v4059_v12 }
  0xc7   :  { %v842_v62 = vpop.f32.mrf.mxu0  ;;  %1220 = vmatpush.bf16.msra.mxu0 %v4034_v11 }
  0xc8   :  { %1234 = vmatpush.bf16.msra.mxu1 %v4042_v19 }
  0xc9   :  { %1380 = vmatpush.bf16.msra.mxu2 %v4050_v13 }
  0xca   :  { %1394 = vmatpush.bf16.msra.mxu3 %v4058_v20 }
  0xcb   :  { %1221 = vmatpush.bf16.msra.mxu0 %v4033_v16 }
  0xcc   :  { %v856_v63 = vpop.f32.mrf.mxu1 }
  0xcd   :  { %v857_v5 = vadd.f32 %v856_v63, %v842_v62  ;;  %1381 = vmatpush.bf16.msra.mxu2 %v4049_v18  ;;  %v4041_v63 = vld [vmem:[%s5376_s5 + $0x48] sm:$0xff] }
  0xce   :  { %1235 = vmatpush.bf16.msra.mxu1 %v4041_v63  ;;  %1395 = vmatpush.bf16.msra.mxu3 %v4057_v0  ;;  %v1528_v63 = vld [vmem:[#allocation5 + $0x180] sm:$0xff] }
  0xcf   :  { %v870_v4 = vpop.f32.mrf.mxu2  ;;  %v844_v7 = vpop.f32.mrf.mxu0  ;;  %1222 = vmatpush.bf16.msra.mxu0 %v4032_v26  ;;  %v1592_v0 = vld [vmem:[#allocation5 + $0x380] sm:$0xff] }
  0xd0   :  { %v871_v10 = vadd.f32 %v870_v4, %v857_v5  ;;  %v4040_v5 = vld [vmem:[%s5376_s5 + $0x40] sm:$0xff] }
  0xd1   :  { %1382 = vmatpush.bf16.msra.mxu2 %v4048_v27 }
  0xd2   :  { %1236 = vmatpush.bf16.msra.mxu1 %v4040_v5  ;;  %v2088_v5 = vunpack.c.2.s8 %v1592_v0 }
  0xd4   :  { %v884_v6 = vpop.f32.mrf.mxu3  ;;  %v858_v8 = vpop.f32.mrf.mxu1 }
  0xd5   :  { %v885_v15 = vadd.f32 %v884_v6, %v871_v10  ;;  %v859_v24 = vadd.f32 %v858_v8, %v844_v7  ;;  %v4056_v6 = vld [vmem:[%s5378_s7 + $0x40] sm:$0xff] }
  0xd6   :  { %1396 = vmatpush.bf16.msra.mxu3 %v4056_v6  ;;  %v1593_v6 = vld [vmem:[#allocation5 + $0x388] sm:$0xff] }
  0xd7   :  { %v872_v21 = vpop.f32.mrf.mxu2 }
  0xd8   :  { %v873_v29 = vadd.f32 %v872_v21, %v859_v24 }
  0xdc   :  { %v886_v22 = vpop.f32.mrf.mxu3 }
  0xdd   :  { %v887_v33 = vadd.f32 %v886_v22, %v873_v29 }
  0xe1   :  { %v898_v23 = vpop.f32.mrf.mxu0 }
  0xe2   :  { %v899_v25 = vadd.f32 %v898_v23, %v885_v15  ;;  %v912_v28 = vpop.f32.mrf.mxu1 }
  0xe4   :  { %v913_v31 = vadd.f32 %v912_v28, %v899_v25 }
  0xe9   :  { %v926_v32 = vpop.f32.mrf.mxu2  ;;  %v900_v30 = vpop.f32.mrf.mxu0 }
  0xea   :  { %v927_v34 = vadd.f32 %v926_v32, %v913_v31  ;;  %v940_v35 = vpop.f32.mrf.mxu3  ;;  %v901_v37 = vadd.f32 %v900_v30, %v887_v33  ;;  %v914_v40 = vpop.f32.mrf.mxu1  ;;  %v1060_v32 = vperm.slane %v4482_v36, 1  ;;  %v4000_v36 = vld [vmem:[%s5380_s9 + $0x10] sm:$0xf] }
  0xec   :  { %v941_v9 = vadd.f32 %v940_v35, %v927_v34  ;;  %v915_v38 = vadd.f32 %v914_v40, %v901_v37  ;;  %v1070_v37 = vperm.slane %v4488_v42, 1  ;;  %v4067_v42 = vld [vmem:[%s5380_s9 + $0x14] sm:$0xf0] }
  0xee   :  { %v1063_v44 = vmul.f32 %v1059_v41, %v941_v9 }
  0xf0   :  { %v1073_v48 = vadd.f32 %v1069_v45, %v1063_v44 }
  0xf1   :  { %v928_v43 = vpop.f32.mrf.mxu2 }
  0xf2   :  { %v929_v46 = vadd.f32 %v928_v43, %v915_v38  ;;  %v942_v47 = vpop.f32.mrf.mxu3  ;;  %v1077_v52 = vmax.f32 %v1073_v48, 0.0 }
  0xf4   :  { %v943_v14 = vadd.f32 %v942_v47, %v929_v46 }
  0xf6   :  { %v1065_v49 = vmul.f32 %v1059_v41, %v943_v14 }
  0xf8   :  { %v1075_v50 = vadd.f32 %v1069_v45, %v1065_v49  ;;  %v4066_v49 = vld [vmem:[%s5380_s9 + $0x14] sm:$0xf] }
  0xfa   :  { %v1079_v51 = vmax.f32 %v1075_v50, 0.0  ;;  %v4001_v50 = vor.u32 %v4067_v42, %v4000_v36  ;;  %v1576_v36 = vld [vmem:[#allocation5 + $0x300] sm:$0xff] }
  0xfb   :  { %v2024_v58 = vunpack.c.2.s8 %v1576_v36 }
  0xfc   :  { %v1081_v54 = vpack.c.bf16 %v1079_v51, %v1077_v52  ;;  %v4002_v52 = vld [vmem:[%s5380_s9 + $0x18] sm:$0xf0]  ;;  %1454 = vmatpush.bf16.msrb.mxu0 %v4001_v50 }
  0xfd   :  { %v4005_v51 = vor.u32 %v4066_v49, %v4002_v52  ;;  %v2073_v52 = vunpack.c.1.s8 %v1593_v6 }
  0xfe   :  { %1223 = vmatmul.bf16.vlgmr.msra.gmra.mxu0 %v1081_v54  ;;  %1383 = vmatmul.bf16.vlgmr.msra.gmra.mxu2 %v1081_v54  ;;  %v4065_v54 = vld [vmem:[%s5380_s9 + $0x4] sm:$0xf0] }
  0xff   :  { %1468 = vmatpush.bf16.msrb.mxu1 %v4005_v51  ;;  %v3993_v57 = vor.u32 %v4065_v54, %v3992_v39  ;;  %v1513_v51 = vld [vmem:[#allocation5 + $0x108] sm:$0xff] }
 0x101   :  { %1455 = vmatpush.bf16.msrb.mxu0 %v3993_v57  ;;  %v2585_v57 = vcvt.s32.f32 %v2073_v52 }
 0x103   :  { %1469 = vmatpush.bf16.msrb.mxu1 %v3997_v61 }
 0x107   :  { %v954_v17 = vpop.f32.mrf.mxu0 }
 0x108   :  { %v968_v62 = vpop.f32.mrf.mxu1 }
 0x109   :  { %v969_v4 = vadd.f32 %v968_v62, %v954_v17 }
 0x10f   :  { %v982_v1 = vpop.f32.mrf.mxu2  ;;  %v956_v3 = vpop.f32.mrf.mxu0 }
 0x110   :  { %v996_v2 = vpop.f32.mrf.mxu3  ;;  %v970_v7 = vpop.f32.mrf.mxu1  ;;  %v983_v8 = vadd.f32 %v982_v1, %v969_v4  ;;  %v1529_v1 = vld [vmem:[#allocation5 + $0x188] sm:$0xff]  ;;  %v1848_v4 = vunpack.c.3.s8 %v1528_v63 }
 0x111   :  { %v971_v15 = vadd.f32 %v970_v7, %v956_v3  ;;  %v1832_v3 = vunpack.c.2.s8 %v1528_v63  ;;  %v2104_v7 = vunpack.c.3.s8 %v1592_v0 }
 0x112   :  { %v997_v13 = vadd.f32 %v996_v2, %v983_v8  ;;  %v1833_v8 = vunpack.c.2.s8 %v1529_v1 }
 0x117   :  { %v984_v10 = vpop.f32.mrf.mxu2 }
 0x118   :  { %v998_v16 = vpop.f32.mrf.mxu3  ;;  %v985_v22 = vadd.f32 %v984_v10, %v971_v15  ;;  %v1849_v10 = vunpack.c.3.s8 %v1529_v1  ;;  %v2360_v15 = vcvt.s32.f32 %v1848_v4 }
 0x11a   :  { %v999_v26 = vadd.f32 %v998_v16, %v985_v22  ;;  %v2600_v16 = vcvt.s32.f32 %v2088_v5  ;;  %v2345_v22 = vcvt.s32.f32 %v1833_v8 }
 0x12f   :  { %v1010_v11 = vpop.f32.mrf.mxu0 }
 0x130   :  { %v1011_v18 = vadd.f32 %v1010_v11, %v997_v13  ;;  %v1024_v21 = vpop.f32.mrf.mxu1  ;;  %v2089_v11 = vunpack.c.2.s8 %v1593_v6  ;;  %v2344_v13 = vcvt.s32.f32 %v1832_v3  ;;  %v1407_v3 = vld [vmem:[%s5372_s1] sm:$0xff] }
 0x132   :  { %v1025_v23 = vadd.f32 %v1024_v21, %v1011_v18  ;;  %v2105_v18 = vunpack.c.3.s8 %v1593_v6  ;;  %v2616_v21 = vcvt.s32.f32 %v2104_v7 }
 0x137   :  { %v1038_v24 = vpop.f32.mrf.mxu2  ;;  %v1012_v25 = vpop.f32.mrf.mxu0 }
 0x138   :  { %v1039_v27 = vadd.f32 %v1038_v24, %v1025_v23  ;;  %v1052_v28 = vpop.f32.mrf.mxu3  ;;  %v1013_v29 = vadd.f32 %v1012_v25, %v999_v26  ;;  %v1026_v30 = vpop.f32.mrf.mxu1  ;;  %v2361_v23 = vcvt.s32.f32 %v1849_v10  ;;  %v2601_v24 = vcvt.s32.f32 %v2089_v11 }
 0x139   :  { %v2744_v25 = vpack.c.bf16 %v2360_v15, %v2344_v13  ;;  %v2617_v26 = vcvt.s32.f32 %v2105_v18  ;;  %v2041_v10 = vunpack.c.3.s8 %v1577_v55 }
 0x13a   :  { %v1053_v31 = vadd.f32 %v1052_v28, %v1039_v27  ;;  %v1027_v33 = vadd.f32 %v1026_v30, %v1013_v29  ;;  %v1800_v27 = vunpack.c.0.s8 %v1528_v63  ;;  %v1816_v28 = vunpack.c.1.s8 %v1528_v63 }
 0x13b   :  { %v2056_v30 = vunpack.c.0.s8 %v1592_v0  ;;  %2890 = vmatpush.bf16.msrb.mxu2 %v2744_v25  ;;  %v2536_v63 = vcvt.s32.f32 %v2024_v58 }
 0x13c   :  { %v1064_v35 = vmul.f32 %v1060_v32, %v1053_v31  ;;  %v2872_v31 = vpack.c.bf16 %v2616_v21, %v2600_v16 }
 0x13e   :  { %v1074_v38 = vadd.f32 %v1070_v37, %v1064_v35  ;;  %v2873_v35 = vpack.c.bf16 %v2617_v26, %v2601_v24  ;;  %2904 = vmatpush.bf16.msrb.mxu3 %v2872_v31  ;;  %v2553_v24 = vcvt.s32.f32 %v2041_v10  ;;  %v2008_v26 = vunpack.c.1.s8 %v1576_v36 }
 0x13f   :  { %v1040_v34 = vpop.f32.mrf.mxu2 }
 0x140   :  { %v1041_v40 = vadd.f32 %v1040_v34, %v1027_v33  ;;  %v1054_v9 = vpop.f32.mrf.mxu3  ;;  %v1078_v45 = vmax.f32 %v1074_v38, 0.0  ;;  %v2072_v33 = vunpack.c.1.s8 %v1592_v0 }
 0x142   :  { %v1055_v41 = vadd.f32 %v1054_v9, %v1041_v40  ;;  %v2328_v40 = vcvt.s32.f32 %v1816_v28  ;;  %v2584_v38 = vcvt.s32.f32 %v2072_v33  ;;  %v1737_v28 = vunpack.c.0.s8 %v1513_v51 }
 0x143   :  { %v1753_v33 = vunpack.c.1.s8 %v1513_v51 }
 0x144   :  { %v1066_v43 = vmul.f32 %v1060_v32, %v1055_v41  ;;  %v2745_v32 = vpack.c.bf16 %v2361_v23, %v2345_v22  ;;  %v2568_v41 = vcvt.s32.f32 %v2056_v30  ;;  %v1992_v22 = vunpack.c.0.s8 %v1576_v36 }
 0x145   :  { %v2520_v30 = vcvt.s32.f32 %v2008_v26  ;;  %v1481_v26 = vld [vmem:[#allocation5 + $0x8] sm:$0xff] }
 0x146   :  { %v1076_v44 = vadd.f32 %v1070_v37, %v1066_v43  ;;  %v2312_v37 = vcvt.s32.f32 %v1800_v27  ;;  %2918 = vmatpush.bf16.msra.mxu0 %v2745_v32  ;;  %v1801_v43 = vunpack.c.0.s8 %v1529_v1  ;;  %v2856_v42 = vpack.c.bf16 %v2584_v38, %v2568_v41  ;;  %v4582_v41 = vld [vmem:[#allocation5 + $0x88] sm:$0xff] }
 0x147   :  { %v2504_v27 = vcvt.s32.f32 %v1992_v22 }
 0x148   :  { %v1080_v46 = vmax.f32 %v1076_v44, 0.0  ;;  %v1817_v44 = vunpack.c.1.s8 %v1529_v1  ;;  %v2313_v49 = vcvt.s32.f32 %v1801_v43  ;;  %2905 = vmatpush.bf16.msrb.mxu3 %v2856_v42  ;;  %v2025_v1 = vunpack.c.2.s8 %v1577_v55  ;;  %v1561_v42 = vld [vmem:[#allocation5 + $0x288] sm:$0xff] }
 0x149   :  { %v2824_v38 = vpack.c.bf16 %v2520_v30, %v2504_v27  ;;  %v2265_v43 = vcvt.s32.f32 %v1753_v33 }
 0x14a   :  { %v1082_v47 = vpack.c.bf16 %v1080_v46, %v1078_v45  ;;  %v1512_v45 = vld [vmem:[#allocation5 + $0x100] sm:$0xff]  ;;  %v2329_v50 = vcvt.s32.f32 %v1817_v44  ;;  %v2537_v11 = vcvt.s32.f32 %v2025_v1 }
 0x14b   :  { %v1768_v39 = vunpack.c.2.s8 %v1512_v45  ;;  %v1784_v54 = vunpack.c.3.s8 %v1512_v45  ;;  %v1736_v13 = vunpack.c.0.s8 %v1512_v45  ;;  %v1752_v21 = vunpack.c.1.s8 %v1512_v45 }
 0x14c   :  { %1237 = vmatmul.bf16.vlgmr.msra.gmra.mxu1 %v1082_v47  ;;  %1397 = vmatmul.bf16.vlgmr.msra.gmra.mxu3 %v1082_v47  ;;  %v2841_v32 = vpack.c.bf16 %v2553_v24, %v2537_v11  ;;  %v1945_v24 = vunpack.c.1.s8 %v1561_v42 }
 0x14d   :  { %2932 = vmatpush.bf16.msra.mxu1 %v2873_v35  ;;  %v2296_v61 = vcvt.s32.f32 %v1784_v54  ;;  %v2248_v25 = vcvt.s32.f32 %v1736_v13  ;;  %v1673_v13 = vunpack.c.0.s8 %v4582_v41 }
 0x17b   :  { %v1224_v14 = vpop.f32.mrf.mxu0 }
 0x17c   :  { %v1225_v12 = vadd.f32 %v4077_v53, %v1224_v14  ;;  %v2728_v14 = vpack.c.bf16 %v2328_v40, %v2312_v37  ;;  %v2249_v37 = vcvt.s32.f32 %v1737_v28  ;;  %v1993_v40 = vunpack.c.0.s8 %v1577_v55 }
 0x17e   :  { %2891 = vmatpush.bf16.msrb.mxu2 %v2728_v14 }
 0x181   :  { %v1384_v48 = vpop.f32.mrf.mxu2 }
 0x182   :  { %v1385_v17 = vadd.f32 %v4078_v56, %v1384_v48  ;;  %v2057_v48 = vunpack.c.0.s8 %v1593_v6 }
 0x183   :  { %v1226_v59 = vpop.f32.mrf.mxu0 }
 0x184   :  { %v1227_v19 = vadd.f32 %v4077_v53, %v1226_v59  ;;  %v2569_v53 = vcvt.s32.f32 %v2057_v48  ;;  %v2040_v59 = vunpack.c.3.s8 %v1576_v36 }
 0x186   :  { %v2552_v0 = vcvt.s32.f32 %v2040_v59 }
 0x188   :  { %v2840_v8 = vpack.c.bf16 %v2552_v0, %v2536_v63 }
 0x189   :  { %v1386_v60 = vpop.f32.mrf.mxu2 }
 0x18a   :  { %v4571_v20 = vadd.f32 %v4078_v56, %v1386_v60  ;;  %v2729_v56 = vpack.c.bf16 %v2329_v50, %v2313_v49  ;;  %v2280_v60 = vcvt.s32.f32 %v1768_v39  ;;  %2906 = vmatpush.bf16.msrb.mxu3 %v2840_v8  ;;  %v2697_v49 = vpack.c.bf16 %v2265_v43, %v2249_v37 }
 0x18c   :  { %2919 = vmatpush.bf16.msra.mxu0 %v2729_v56  ;;  %v2712_v5 = vpack.c.bf16 %v2296_v61, %v2280_v60  ;;  %v1721_v56 = vunpack.c.3.s8 %v4582_v41  ;;  %v1961_v60 = vunpack.c.2.s8 %v1561_v42 }
 0x18e   :  { %2892 = vmatpush.bf16.msrb.mxu2 %v2712_v5  ;;  %2907 = vmatpush.bf16.msrb.mxu3 %v2824_v38  ;;  %v2473_v63 = vcvt.s32.f32 %v1961_v60 }
 0x1c9   :  { %v1238_v62 = vpop.f32.mrf.mxu1 }
 0x1ca   :  { %v4573_v2 = vadd.f32 %v1238_v62, %v1225_v12  ;;  %v1769_v12 = vunpack.c.2.s8 %v1513_v51  ;;  %v2857_v62 = vpack.c.bf16 %v2585_v57, %v2569_v53 }
 0x1cc   :  { %v2281_v6 = vcvt.s32.f32 %v1769_v12  ;;  %2933 = vmatpush.bf16.msra.mxu1 %v2857_v62  ;;  %v2233_v12 = vcvt.s32.f32 %v1721_v56  ;;  %v1625_v56 = vunpack.c.1.s8 %v1481_v26 }
 0x1cf   :  { %v1398_v29 = vpop.f32.mrf.mxu3 }
 0x1d0   :  { %v1399_v34 = vadd.f32 %v1398_v29, %v1385_v17  ;;  %v1785_v17 = vunpack.c.3.s8 %v1513_v51  ;;  %v1496_v29 = vld [vmem:[#allocation5 + $0x80] sm:$0xff]  ;;  %2934 = vmatpush.bf16.msra.mxu1 %v2841_v32  ;;  %v1705_v51 = vunpack.c.2.s8 %v4582_v41  ;;  %v2457_v32 = vcvt.s32.f32 %v1945_v24 }
 0x1d1   :  { %v1240_v9 = vpop.f32.mrf.mxu1  ;;  %v1704_v44 = vunpack.c.2.s8 %v1496_v29  ;;  %v1720_v45 = vunpack.c.3.s8 %v1496_v29  ;;  %v1688_v0 = vunpack.c.1.s8 %v1496_v29 }
 0x1d2   :  { %v1403_v46 = vmul.f32 1.442695, %v1399_v34  ;;  %v4575_v47 = vadd.f32 %v1240_v9, %v1227_v19  ;;  %v2297_v7 = vcvt.s32.f32 %v1785_v17  ;;  %v1560_v34 = vld [vmem:[#allocation5 + $0x280] sm:$0xff]  ;;  %v2009_v9 = vunpack.c.1.s8 %v1577_v55 }
 0x1d3   :  { %v1960_v48 = vunpack.c.2.s8 %v1560_v34  ;;  %v1976_v36 = vunpack.c.3.s8 %v1560_v34  ;;  %v2216_v50 = vcvt.s32.f32 %v1704_v44  ;;  %v2232_v52 = vcvt.s32.f32 %v1720_v45 }
 0x1d4   :  { %4079 = vpow2.f32 %v1403_v46  ;;  %v2713_v18 = vpack.c.bf16 %v2297_v7, %v2281_v6  ;;  %v2505_v46 = vcvt.s32.f32 %v1993_v40  ;;  %v2521_v14 = vcvt.s32.f32 %v2009_v9  ;;  %v1480_v7 = vld [vmem:[#allocation5] sm:$0xff] }
 0x1d5   :  { %v2472_v54 = vcvt.s32.f32 %v1960_v48  ;;  %v2488_v55 = vcvt.s32.f32 %v1976_v36  ;;  %v2680_v58 = vpack.c.bf16 %v2232_v52, %v2216_v50  ;;  %v2217_v59 = vcvt.s32.f32 %v1705_v51 }
 0x1d6   :  { %2920 = vmatpush.bf16.msra.mxu0 %v2713_v18  ;;  %v2825_v39 = vpack.c.bf16 %v2521_v14, %v2505_v46  ;;  %v1977_v17 = vunpack.c.3.s8 %v1561_v42  ;;  %v1928_v1 = vunpack.c.0.s8 %v1560_v34  ;;  %v1944_v6 = vunpack.c.1.s8 %v1560_v34 }
 0x1d7   :  { %v1400_v19 = vpop.f32.mrf.mxu3  ;;  %v2808_v61 = vpack.c.bf16 %v2488_v55, %v2472_v54  ;;  %v2200_v10 = vcvt.s32.f32 %v1688_v0  ;;  %v1929_v18 = vunpack.c.0.s8 %v1561_v42  ;;  %v1641_v40 = vunpack.c.2.s8 %v1481_v26  ;;  %v1531_v0 = vld [vmem:[#allocation5 + $0x198] sm:$0xff] }
 0x1d8   :  { %v1401_v4 = vadd.f32 %v1400_v19, %v4571_v20  ;;  %v2264_v20 = vcvt.s32.f32 %v1752_v21  ;;  %2935 = vmatpush.bf16.msra.mxu1 %v2825_v39  ;;  %v1672_v19 = vunpack.c.0.s8 %v1496_v29  ;;  %v2440_v11 = vcvt.s32.f32 %v1928_v1  ;;  %v1544_v21 = vld [vmem:[#allocation5 + $0x200] sm:$0xff] }
 0x1d9   :  { %2908 = vmatpush.bf16.msrb.mxu3 %v2808_v61  ;;  %v2441_v28 = vcvt.s32.f32 %v1929_v18  ;;  %v1656_v29 = vunpack.c.3.s8 %v1480_v7  ;;  %v1896_v33 = vunpack.c.2.s8 %v1544_v21  ;;  %v1912_v34 = vunpack.c.3.s8 %v1544_v21 }
 0x1da   :  { %v4080_v15 = vpop.eup %4079  ;;  %v1405_v16 = vmul.f32 1.442695, %v1401_v4  ;;  %v2696_v35 = vpack.c.bf16 %v2264_v20, %v2248_v25  ;;  %2921 = vmatpush.bf16.msra.mxu0 %v2697_v49  ;;  %v2489_v4 = vcvt.s32.f32 %v1977_v17  ;;  %v2184_v5 = vcvt.s32.f32 %v1672_v19 }
 0x1db   :  { %v1409_v23 = vmul.f32 %v4080_v15, %v1407_v3  ;;  %v2681_v3 = vpack.c.bf16 %v2233_v12, %v2217_v59  ;;  %v1640_v25 = vunpack.c.2.s8 %v1480_v7  ;;  %v2168_v37 = vcvt.s32.f32 %v1656_v29  ;;  %v1594_v12 = vld [vmem:[#allocation5 + $0x390] sm:$0xff] }
 0x1dc   :  { %4081 = vpow2.f32 %v1405_v16  ;;  %2893 = vmatpush.bf16.msrb.mxu2 %v2696_v35  ;;  %v2809_v15 = vpack.c.bf16 %v2489_v4, %v2473_v63  ;;  %v2456_v16 = vcvt.s32.f32 %v1944_v6  ;;  %v2664_v22 = vpack.c.bf16 %v2200_v10, %v2184_v5  ;;  %v1595_v6 = vld [vmem:[#allocation5 + $0x398] sm:$0xff] }
 0x1dd   :  { %v1411_v31 = vadd.f32 %v1409_v23, %v4573_v2  ;;  %v1408_v2 = vld [vmem:[%s5372_s1 + $0x8] sm:$0xff]  ;;  %v2185_v23 = vcvt.s32.f32 %v1673_v13  ;;  %v2152_v30 = vcvt.s32.f32 %v1640_v25  ;;  %v1657_v9 = vunpack.c.3.s8 %v1481_v26 }
 0x1de   :  { %2922 = vmatpush.bf16.msra.mxu0 %v2681_v3  ;;  %2936 = vmatpush.bf16.msra.mxu1 %v2809_v15  ;;  %v2792_v20 = vpack.c.bf16 %v2456_v16, %v2440_v11  ;;  %v2408_v38 = vcvt.s32.f32 %v1896_v33  ;;  %v2424_v43 = vcvt.s32.f32 %v1912_v34  ;;  %v1608_v42 = vunpack.c.0.s8 %v1480_v7 }
 0x1df   :  { %v2648_v45 = vpack.c.bf16 %v2168_v37, %v2152_v30  ;;  %v2169_v46 = vcvt.s32.f32 %v1657_v9  ;;  %v1624_v49 = vunpack.c.1.s8 %v1480_v7  ;;  %v1864_v51 = vunpack.c.0.s8 %v1544_v21 }
 0x1e0   :  { %2894 = vmatpush.bf16.msrb.mxu2 %v2680_v58  ;;  %2909 = vmatpush.bf16.msrb.mxu3 %v2792_v20  ;;  %v2776_v48 = vpack.c.bf16 %v2424_v43, %v2408_v38  ;;  %v2120_v39 = vcvt.s32.f32 %v1608_v42  ;;  %v1609_v55 = vunpack.c.0.s8 %v1481_v26  ;;  %v2090_v10 = vunpack.c.2.s8 %v1594_v12  ;;  %v1515_v42 = vld [vmem:[#allocation5 + $0x118] sm:$0xff] }
 0x1e1   :  { %v2136_v54 = vcvt.s32.f32 %v1624_v49  ;;  %v2376_v59 = vcvt.s32.f32 %v1864_v51  ;;  %v2106_v11 = vunpack.c.3.s8 %v1594_v12  ;;  %v1835_v16 = vunpack.c.2.s8 %v1531_v0 }
 0x1e2   :  { %v4082_v53 = vpop.eup %4081  ;;  %v2121_v19 = vcvt.s32.f32 %v1609_v55  ;;  %v2107_v20 = vunpack.c.3.s8 %v1595_v6  ;;  %v2058_v33 = vunpack.c.0.s8 %v1594_v12  ;;  %v2074_v34 = vunpack.c.1.s8 %v1594_v12 }
 0x1e3   :  { %v1410_v57 = vmul.f32 %v4082_v53, %v1408_v2  ;;  %v2153_v2 = vcvt.s32.f32 %v1641_v40  ;;  %v1880_v53 = vunpack.c.1.s8 %v1544_v21  ;;  %v2632_v17 = vpack.c.bf16 %v2136_v54, %v2120_v39 }
 0x1e4   :  { %2895 = vmatpush.bf16.msrb.mxu2 %v2664_v22  ;;  %2910 = vmatpush.bf16.msrb.mxu3 %v2776_v48  ;;  %v2602_v21 = vcvt.s32.f32 %v2090_v10  ;;  %v2618_v22 = vcvt.s32.f32 %v2106_v11  ;;  %v2347_v25 = vcvt.s32.f32 %v1835_v16  ;;  %v2619_v30 = vcvt.s32.f32 %v2107_v20 }
 0x1e5   :  { %v1412_v62 = vadd.f32 %v1410_v57, %v4575_v47  ;;  %v1689_v47 = vunpack.c.1.s8 %v4582_v41  ;;  %v2793_v41 = vpack.c.bf16 %v2457_v32, %v2441_v28  ;;  %v2649_v50 = vpack.c.bf16 %v2169_v46, %v2153_v2  ;;  %v1530_v57 = vld [vmem:[#allocation5 + $0x190] sm:$0xff] }
 0x1e6   :  { %v2392_v60 = vcvt.s32.f32 %v1880_v53  ;;  %v1834_v4 = vunpack.c.2.s8 %v1530_v57  ;;  %v1850_v5 = vunpack.c.3.s8 %v1530_v57  ;;  %v1802_v29 = vunpack.c.0.s8 %v1530_v57  ;;  %v1578_v2 = vld [vmem:[#allocation5 + $0x310] sm:$0xff]  ;;  %v1579_v53 = vld [vmem:[#allocation5 + $0x318] sm:$0xff] }
 0x1e7   :  { %v1413_v8 = vpack.c.bf16 %v1412_v62, %v1411_v31  ;;  %v2201_v27 = vcvt.s32.f32 %v1689_v47  ;;  %v1545_v31 = vld [vmem:[#allocation5 + $0x208] sm:$0xff]  ;;  %2937 = vmatpush.bf16.msra.mxu1 %v2793_v41  ;;  %v2137_v62 = vcvt.s32.f32 %v1625_v56  ;;  %v1851_v47 = vunpack.c.3.s8 %v1531_v0  ;;  %v1514_v41 = vld [vmem:[#allocation5 + $0x110] sm:$0xff] }
 0x1e8   :  { %v1897_v44 = vunpack.c.2.s8 %v1545_v31  ;;  %v1913_v14 = vunpack.c.3.s8 %v1545_v31  ;;  %2896 = vmatpush.bf16.msrb.mxu2 %v2648_v45  ;;  %v1865_v61 = vunpack.c.0.s8 %v1545_v31  ;;  %v1881_v63 = vunpack.c.1.s8 %v1545_v31 }
 0x1e9   :  { %4006 = vmatmul.msk.bf16.vlgmr.msrb.gmra.mxu0 %vm1444_vm0, %v1413_v8  ;;  %4007 = vmatmul.msk.bf16.vlgmr.msrb.gmra.mxu1 %vm1444_vm0, %v1413_v8  ;;  %v2665_v35 = vpack.c.bf16 %v2201_v27, %v2185_v23  ;;  %v2760_v1 = vpack.c.bf16 %v2392_v60, %v2376_v59  ;;  %v2633_v7 = vpack.c.bf16 %v2137_v62, %v2121_v19  ;;  %v2346_v13 = vcvt.s32.f32 %v1834_v4 }
 0x1ea   :  { %v2409_v36 = vcvt.s32.f32 %v1897_v44  ;;  %v2425_v52 = vcvt.s32.f32 %v1913_v14  ;;  %v2377_v3 = vcvt.s32.f32 %v1865_v61  ;;  %v2393_v8 = vcvt.s32.f32 %v1881_v63 }
 0x1eb   :  { %2923 = vmatpush.bf16.msra.mxu0 %v2665_v35  ;;  %2911 = vmatpush.bf16.msrb.mxu3 %v2760_v1  ;;  %v2362_v15 = vcvt.s32.f32 %v1850_v5  ;;  %v2091_v23 = vunpack.c.2.s8 %v1595_v6  ;;  %v2363_v26 = vcvt.s32.f32 %v1851_v47  ;;  %v2874_v27 = vpack.c.bf16 %v2618_v22, %v2602_v21 }
 0x1ec   :  { %v2777_v58 = vpack.c.bf16 %v2425_v52, %v2409_v36  ;;  %2897 = vmatpush.bf16.msrb.mxu2 %v2632_v17  ;;  %v2761_v18 = vpack.c.bf16 %v2393_v8, %v2377_v3  ;;  %v1818_v31 = vunpack.c.1.s8 %v1530_v57  ;;  %v2314_v35 = vcvt.s32.f32 %v1802_v29 }
 0x1ed   :  { %v2746_v24 = vpack.c.bf16 %v2362_v15, %v2346_v13  ;;  %v2603_v28 = vcvt.s32.f32 %v2091_v23  ;;  %v2747_v32 = vpack.c.bf16 %v2363_v26, %v2347_v25  ;;  %v1803_v40 = vunpack.c.0.s8 %v1531_v0 }
 0x1ee   :  { %2938 = vmatpush.bf16.msra.mxu1 %v2777_v58  ;;  %v2330_v37 = vcvt.s32.f32 %v1818_v31  ;;  %v1819_v9 = vunpack.c.1.s8 %v1531_v0  ;;  %v2570_v43 = vcvt.s32.f32 %v2058_v33  ;;  %v2586_v44 = vcvt.s32.f32 %v2074_v34  ;;  %v1498_v34 = vld [vmem:[#allocation5 + $0x90] sm:$0xff] }
 0x1ef   :  { %2924 = vmatpush.bf16.msra.mxu0 %v2649_v50  ;;  %2960 = vmatpush.bf16.msra.mxu3 %v2874_v27  ;;  %v2875_v38 = vpack.c.bf16 %v2619_v30, %v2603_v28  ;;  %v2059_v45 = vunpack.c.0.s8 %v1595_v6  ;;  %v2315_v14 = vcvt.s32.f32 %v1803_v40  ;;  %v2075_v36 = vunpack.c.1.s8 %v1595_v6  ;;  %v4597_v30 = vld [vmem:[%s5381_s10] sm:$0x3] }
 0x1f0   :  { %2946 = vmatpush.bf16.msra.mxu2 %v2746_v24  ;;  %v2730_v46 = vpack.c.bf16 %v2330_v37, %v2314_v35  ;;  %v2331_v48 = vcvt.s32.f32 %v1819_v9  ;;  %v2858_v49 = vpack.c.bf16 %v2586_v44, %v2570_v43  ;;  %v1770_v52 = vunpack.c.2.s8 %v1514_v41  ;;  %v1562_v35 = vld [vmem:[#allocation5 + $0x290] sm:$0xff]  ;;  %v1499_v37 = vld [vmem:[#allocation5 + $0x98] sm:$0xff] }
 0x1f1   :  { %v2571_v50 = vcvt.s32.f32 %v2059_v45  ;;  %v1786_v51 = vunpack.c.3.s8 %v1514_v41  ;;  %v2587_v54 = vcvt.s32.f32 %v2075_v36  ;;  %v2026_v55 = vunpack.c.2.s8 %v1578_v2  ;;  %v1563_v43 = vld [vmem:[#allocation5 + $0x298] sm:$0xff] }
 0x1f2   :  { %2939 = vmatpush.bf16.msra.mxu1 %v2761_v18  ;;  %v2731_v39 = vpack.c.bf16 %v2331_v48, %v2315_v14  ;;  %v2042_v56 = vunpack.c.3.s8 %v1578_v2  ;;  %v2282_v57 = vcvt.s32.f32 %v1770_v52  ;;  %v1771_v59 = vunpack.c.2.s8 %v1515_v42 }
 0x1f3   :  { %2925 = vmatpush.bf16.msra.mxu0 %v2633_v7  ;;  %2961 = vmatpush.bf16.msra.mxu3 %v2858_v49  ;;  %v2298_v58 = vcvt.s32.f32 %v1786_v51  ;;  %v1787_v60 = vunpack.c.3.s8 %v1515_v42  ;;  %v2859_v61 = vpack.c.bf16 %v2587_v54, %v2571_v50  ;;  %v2538_v12 = vcvt.s32.f32 %v2026_v55 }
 0x1f4   :  { %2947 = vmatpush.bf16.msra.mxu2 %v2730_v46  ;;  %v2554_v17 = vcvt.s32.f32 %v2042_v56  ;;  %v2027_v19 = vunpack.c.2.s8 %v1579_v53  ;;  %v2283_v63 = vcvt.s32.f32 %v1771_v59  ;;  %v2043_v1 = vunpack.c.3.s8 %v1579_v53 }
 0x1f5   :  { %v2714_v62 = vpack.c.bf16 %v2298_v58, %v2282_v57  ;;  %v2299_v0 = vcvt.s32.f32 %v1787_v60  ;;  %v1738_v5 = vunpack.c.0.s8 %v1514_v41  ;;  %v1754_v6 = vunpack.c.1.s8 %v1514_v41 }
 0x1f6   :  { %2988 = vmatpush.bf16.msrb.mxu1 %v2875_v38  ;;  %v2842_v3 = vpack.c.bf16 %v2554_v17, %v2538_v12  ;;  %v2539_v4 = vcvt.s32.f32 %v2027_v19  ;;  %v2555_v8 = vcvt.s32.f32 %v2043_v1  ;;  %v1994_v10 = vunpack.c.0.s8 %v1578_v2  ;;  %v1482_v1 = vld [vmem:[#allocation5 + $0x10] sm:$0xff] }
 0x1f7   :  { %2974 = vmatpush.bf16.msrb.mxu0 %v2747_v32  ;;  %v2715_v7 = vpack.c.bf16 %v2299_v0, %v2283_v63  ;;  %v2010_v11 = vunpack.c.1.s8 %v1578_v2  ;;  %v2250_v13 = vcvt.s32.f32 %v1738_v5  ;;  %v2266_v15 = vcvt.s32.f32 %v1754_v6 }
 0x1f8   :  { %2948 = vmatpush.bf16.msra.mxu2 %v2714_v62  ;;  %2962 = vmatpush.bf16.msra.mxu3 %v2842_v3  ;;  %v1739_v16 = vunpack.c.0.s8 %v1515_v42  ;;  %v1755_v47 = vunpack.c.1.s8 %v1515_v42  ;;  %v2843_v18 = vpack.c.bf16 %v2555_v8, %v2539_v4  ;;  %v2506_v21 = vcvt.s32.f32 %v1994_v10  ;;  %v1546_v3 = vld [vmem:[#allocation5 + $0x210] sm:$0xff]  ;;  %v1483_v8 = vld [vmem:[#allocation5 + $0x18] sm:$0xff] }
 0x1f9   :  { %v2522_v22 = vcvt.s32.f32 %v2010_v11  ;;  %v1995_v23 = vunpack.c.0.s8 %v1579_v53  ;;  %v2698_v24 = vpack.c.bf16 %v2266_v15, %v2250_v13  ;;  %v2011_v20 = vunpack.c.1.s8 %v1579_v53 }
 0x1fa   :  { %2989 = vmatpush.bf16.msrb.mxu1 %v2859_v61  ;;  %v2251_v25 = vcvt.s32.f32 %v1739_v16  ;;  %v2267_v26 = vcvt.s32.f32 %v1755_v47  ;;  %v1420_v33 = vperm.slane %v4597_v30, 0  ;;  %v1706_v40 = vunpack.c.2.s8 %v1498_v34  ;;  %v1547_v16 = vld [vmem:[#allocation5 + $0x218] sm:$0xff] }
 0x1fb   :  { %2975 = vmatpush.bf16.msrb.mxu0 %v2731_v39  ;;  %v2826_v27 = vpack.c.bf16 %v2522_v22, %v2506_v21  ;;  %v2507_v28 = vcvt.s32.f32 %v1995_v23  ;;  %v2523_v31 = vcvt.s32.f32 %v2011_v20  ;;  %v1722_v9 = vunpack.c.3.s8 %v1498_v34 }
 0x1fc   :  { %2949 = vmatpush.bf16.msra.mxu2 %v2698_v24  ;;  %v2699_v29 = vpack.c.bf16 %v2267_v26, %v2251_v25  ;;  %v1962_v41 = vunpack.c.2.s8 %v1562_v35  ;;  %v1978_v38 = vunpack.c.3.s8 %v1562_v35  ;;  %v1707_v44 = vunpack.c.2.s8 %v1499_v37 }
 0x1fd   :  { %2963 = vmatpush.bf16.msra.mxu3 %v2826_v27  ;;  %v2827_v32 = vpack.c.bf16 %v2523_v31, %v2507_v28  ;;  %v1723_v45 = vunpack.c.3.s8 %v1499_v37  ;;  %v1963_v2 = vunpack.c.2.s8 %v1563_v43  ;;  %v1979_v46 = vunpack.c.3.s8 %v1563_v43 }
 0x1fe   :  { %2990 = vmatpush.bf16.msrb.mxu1 %v2843_v18  ;;  %v2218_v14 = vcvt.s32.f32 %v1706_v40  ;;  %v2234_v48 = vcvt.s32.f32 %v1722_v9  ;;  %v2474_v36 = vcvt.s32.f32 %v1962_v41  ;;  %v2490_v42 = vcvt.s32.f32 %v1978_v38 }
 0x1ff   :  { %2976 = vmatpush.bf16.msrb.mxu0 %v2715_v7  ;;  %v1421_v49 = vperm.slane %v4597_v30, 1  ;;  %v2219_v50 = vcvt.s32.f32 %v1707_v44  ;;  %v2235_v52 = vcvt.s32.f32 %v1723_v45  ;;  %v2475_v51 = vcvt.s32.f32 %v1963_v2  ;;  %v1532_v2 = vld [vmem:[#allocation5 + $0x1a0] sm:$0xff] }
 0x200   :  { %v2682_v53 = vpack.c.bf16 %v2234_v48, %v2218_v14  ;;  %v2810_v39 = vpack.c.bf16 %v2490_v42, %v2474_v36  ;;  %v2491_v54 = vcvt.s32.f32 %v1979_v46  ;;  %v1674_v55 = vunpack.c.0.s8 %v1498_v34 }
 0x201   :  { %v2683_v56 = vpack.c.bf16 %v2235_v52, %v2219_v50  ;;  %v1690_v57 = vunpack.c.1.s8 %v1498_v34  ;;  %v1930_v58 = vunpack.c.0.s8 %v1562_v35  ;;  %v1946_v59 = vunpack.c.1.s8 %v1562_v35 }
 0x202   :  { %2991 = vmatpush.bf16.msrb.mxu1 %v2827_v32  ;;  %2950 = vmatpush.bf16.msra.mxu2 %v2682_v53  ;;  %v2811_v60 = vpack.c.bf16 %v2491_v54, %v2475_v51  ;;  %v2186_v61 = vcvt.s32.f32 %v1674_v55  ;;  %v1675_v12 = vunpack.c.0.s8 %v1499_v37  ;;  %v1691_v17 = vunpack.c.1.s8 %v1499_v37  ;;  %v1596_v53 = vld [vmem:[#allocation5 + $0x3a0] sm:$0xff] }
 0x203   :  { %2977 = vmatpush.bf16.msrb.mxu0 %v2699_v29  ;;  %2964 = vmatpush.bf16.msra.mxu3 %v2810_v39  ;;  %v2202_v19 = vcvt.s32.f32 %v1690_v57  ;;  %v2442_v62 = vcvt.s32.f32 %v1930_v58  ;;  %v2458_v63 = vcvt.s32.f32 %v1946_v59  ;;  %v1931_v0 = vunpack.c.0.s8 %v1563_v43  ;;  %v1533_v57 = vld [vmem:[#allocation5 + $0x1a8] sm:$0xff] }
 0x204   :  { %v2187_v4 = vcvt.s32.f32 %v1675_v12  ;;  %v2203_v5 = vcvt.s32.f32 %v1691_v17  ;;  %v1947_v6 = vunpack.c.1.s8 %v1563_v43  ;;  %v1642_v7 = vunpack.c.2.s8 %v1482_v1  ;;  %v1597_v12 = vld [vmem:[#allocation5 + $0x3a8] sm:$0xff] }
 0x205   :  { %v2666_v10 = vpack.c.bf16 %v2202_v19, %v2186_v61  ;;  %v2794_v11 = vpack.c.bf16 %v2458_v63, %v2442_v62  ;;  %v2443_v13 = vcvt.s32.f32 %v1931_v0  ;;  %v1658_v15 = vunpack.c.3.s8 %v1482_v1 }
 0x206   :  { %2992 = vmatpush.bf16.msrb.mxu1 %v2811_v60  ;;  %v2667_v47 = vpack.c.bf16 %v2203_v5, %v2187_v4  ;;  %v2459_v18 = vcvt.s32.f32 %v1947_v6  ;;  %v2154_v21 = vcvt.s32.f32 %v1642_v7  ;;  %v1898_v22 = vunpack.c.2.s8 %v1546_v3 }
 0x207   :  { %2978 = vmatpush.bf16.msrb.mxu0 %v2683_v56  ;;  %2951 = vmatpush.bf16.msra.mxu2 %v2666_v10  ;;  %v2170_v23 = vcvt.s32.f32 %v1658_v15  ;;  %v1914_v24 = vunpack.c.3.s8 %v1546_v3  ;;  %v1643_v25 = vunpack.c.2.s8 %v1483_v8  ;;  %v1659_v26 = vunpack.c.3.s8 %v1483_v8 }
 0x208   :  { %2965 = vmatpush.bf16.msra.mxu3 %v2794_v11  ;;  %v2795_v20 = vpack.c.bf16 %v2459_v18, %v2443_v13  ;;  %v2410_v27 = vcvt.s32.f32 %v1898_v22  ;;  %v1899_v28 = vunpack.c.2.s8 %v1547_v16  ;;  %v1915_v29 = vunpack.c.3.s8 %v1547_v16 }
 0x209   :  { %v2650_v31 = vpack.c.bf16 %v2170_v23, %v2154_v21  ;;  %v2426_v32 = vcvt.s32.f32 %v1914_v24  ;;  %v2155_v34 = vcvt.s32.f32 %v1643_v25  ;;  %v2171_v35 = vcvt.s32.f32 %v1659_v26 }
 0x20a   :  { %2993 = vmatpush.bf16.msrb.mxu1 %v2795_v20  ;;  %v2411_v37 = vcvt.s32.f32 %v1899_v28  ;;  %v2427_v40 = vcvt.s32.f32 %v1915_v29  ;;  %v1610_v9 = vunpack.c.0.s8 %v1482_v1  ;;  %v1626_v41 = vunpack.c.1.s8 %v1482_v1  ;;  %v1516_v29 = vld [vmem:[#allocation5 + $0x120] sm:$0xff] }
 0x20b   :  { %2979 = vmatpush.bf16.msrb.mxu0 %v2667_v47  ;;  %2952 = vmatpush.bf16.msra.mxu2 %v2650_v31  ;;  %v2778_v38 = vpack.c.bf16 %v2426_v32, %v2410_v27  ;;  %v2651_v43 = vpack.c.bf16 %v2171_v35, %v2155_v34  ;;  %v1866_v44 = vunpack.c.0.s8 %v1546_v3  ;;  %v1882_v45 = vunpack.c.1.s8 %v1546_v3 }
 0x20c   :  { %v2779_v46 = vpack.c.bf16 %v2427_v40, %v2411_v37  ;;  %v2122_v14 = vcvt.s32.f32 %v1610_v9  ;;  %v2138_v48 = vcvt.s32.f32 %v1626_v41  ;;  %v1611_v36 = vunpack.c.0.s8 %v1483_v8  ;;  %v1580_v37 = vld [vmem:[#allocation5 + $0x320] sm:$0xff] }
 0x20d   :  { %2966 = vmatpush.bf16.msra.mxu3 %v2778_v38  ;;  %v2378_v42 = vcvt.s32.f32 %v1866_v44  ;;  %v2394_v50 = vcvt.s32.f32 %v1882_v45  ;;  %v1627_v52 = vunpack.c.1.s8 %v1483_v8  ;;  %v1867_v51 = vunpack.c.0.s8 %v1547_v16 }
 0x20e   :  { %2994 = vmatpush.bf16.msrb.mxu1 %v2779_v46  ;;  %v2634_v39 = vpack.c.bf16 %v2138_v48, %v2122_v14  ;;  %v2123_v54 = vcvt.s32.f32 %v1611_v36  ;;  %v1883_v55 = vunpack.c.1.s8 %v1547_v16  ;;  %v1836_v56 = vunpack.c.2.s8 %v1532_v2  ;;  %v1581_v14 = vld [vmem:[#allocation5 + $0x328] sm:$0xff] }
 0x20f   :  { %2980 = vmatpush.bf16.msrb.mxu0 %v2651_v43  ;;  %v2762_v58 = vpack.c.bf16 %v2394_v50, %v2378_v42  ;;  %v2139_v59 = vcvt.s32.f32 %v1627_v52  ;;  %v2379_v60 = vcvt.s32.f32 %v1867_v51  ;;  %v1852_v61 = vunpack.c.3.s8 %v1532_v2  ;;  %v1517_v43 = vld [vmem:[#allocation5 + $0x128] sm:$0xff] }
 0x210   :  { %2953 = vmatpush.bf16.msra.mxu2 %v2634_v39  ;;  %v2395_v17 = vcvt.s32.f32 %v1883_v55  ;;  %v4601_v19 = vcvt.s32.f32 %v1836_v56  ;;  %v2092_v62 = vunpack.c.2.s8 %v1596_v53  ;;  %v2108_v63 = vunpack.c.3.s8 %v1596_v53 }
 0x211   :  { %2967 = vmatpush.bf16.msra.mxu3 %v2762_v58  ;;  %v2635_v0 = vpack.c.bf16 %v2139_v59, %v2123_v54  ;;  %v4603_v1 = vcvt.s32.f32 %v1852_v61  ;;  %v1837_v3 = vunpack.c.2.s8 %v1533_v57  ;;  %v1853_v4 = vunpack.c.3.s8 %v1533_v57 }
 0x212   :  { %v2763_v5 = vpack.c.bf16 %v2395_v17, %v2379_v60  ;;  %v4605_v6 = vcvt.s32.f32 %v2092_v62  ;;  %v4607_v7 = vcvt.s32.f32 %v2108_v63  ;;  %v2093_v8 = vunpack.c.2.s8 %v1597_v12 }
 0x213   :  { %2981 = vmatpush.bf16.msrb.mxu0 %v2635_v0  ;;  %v2748_v10 = vpack.c.bf16 %v4603_v1, %v4601_v19  ;;  %v4611_v11 = vcvt.s32.f32 %v1837_v3  ;;  %v4613_v13 = vcvt.s32.f32 %v1853_v4  ;;  %v2109_v15 = vunpack.c.3.s8 %v1597_v12 }
 0x214   :  { %2995 = vmatpush.bf16.msrb.mxu1 %v2763_v5  ;;  %v2876_v16 = vpack.c.bf16 %v4607_v7, %v4605_v6  ;;  %v4617_v47 = vcvt.s32.f32 %v2093_v8  ;;  %v1804_v18 = vunpack.c.0.s8 %v1532_v2  ;;  %v1820_v21 = vunpack.c.1.s8 %v1532_v2 }
 0x215   :  { %v2749_v22 = vpack.c.bf16 %v4613_v13, %v4611_v11  ;;  %v4621_v23 = vcvt.s32.f32 %v2109_v15  ;;  %v2060_v24 = vunpack.c.0.s8 %v1596_v53  ;;  %v2076_v25 = vunpack.c.1.s8 %v1596_v53 }
 0x216   :  { %v4623_v26 = vcvt.s32.f32 %v1804_v18  ;;  %v4625_v20 = vcvt.s32.f32 %v1820_v21  ;;  %v1805_v27 = vunpack.c.0.s8 %v1533_v57  ;;  %v1821_v28 = vunpack.c.1.s8 %v1533_v57 }
 0x217   :  { %v4629_v32 = vcvt.s32.f32 %v2060_v24  ;;  %v4631_v34 = vcvt.s32.f32 %v2076_v25  ;;  %v2061_v35 = vunpack.c.0.s8 %v1597_v12  ;;  %v2077_v38 = vunpack.c.1.s8 %v1597_v12 }
 0x218   :  { %v4635_v9 = vcvt.s32.f32 %v1805_v27  ;;  %v4637_v41 = vcvt.s32.f32 %v1821_v28  ;;  %v1772_v2 = vunpack.c.2.s8 %v1516_v29  ;;  %v1788_v46 = vunpack.c.3.s8 %v1516_v29 }
 0x219   :  { %v4641_v45 = vcvt.s32.f32 %v2061_v35  ;;  %v4645_v36 = vcvt.s32.f32 %v2077_v38  ;;  %v2028_v42 = vunpack.c.2.s8 %v1580_v37  ;;  %v2044_v50 = vunpack.c.3.s8 %v1580_v37  ;;  %v1500_v38 = vld [vmem:[#allocation5 + $0xa0] sm:$0xff] }
 0x21a   :  { %v4647_v52 = vcvt.s32.f32 %v1772_v2  ;;  %v4649_v51 = vcvt.s32.f32 %v1788_v46  ;;  %v1773_v53 = vunpack.c.2.s8 %v1517_v43  ;;  %v1789_v39 = vunpack.c.3.s8 %v1517_v43 }
 0x21b   :  { %v4653_v55 = vcvt.s32.f32 %v2028_v42  ;;  %v4655_v56 = vcvt.s32.f32 %v2044_v50  ;;  %v2029_v57 = vunpack.c.2.s8 %v1581_v14  ;;  %v2045_v61 = vunpack.c.3.s8 %v1581_v14 }
 0x21c   :  { %v4659_v59 = vcvt.s32.f32 %v1773_v53  ;;  %v4661_v60 = vcvt.s32.f32 %v1789_v39  ;;  %v1740_v62 = vunpack.c.0.s8 %v1516_v29  ;;  %v1756_v63 = vunpack.c.1.s8 %v1516_v29  ;;  %v1501_v53 = vld [vmem:[#allocation5 + $0xa8] sm:$0xff] }
 0x21d   :  { %v4665_v17 = vcvt.s32.f32 %v2029_v57  ;;  %v4669_v5 = vcvt.s32.f32 %v2045_v61  ;;  %v1996_v8 = vunpack.c.0.s8 %v1580_v37  ;;  %v2012_v15 = vunpack.c.1.s8 %v1580_v37  ;;  %v1564_v37 = vld [vmem:[#allocation5 + $0x2a0] sm:$0xff] }
 0x21e   :  { %v4675_v24 = vcvt.s32.f32 %v1740_v62  ;;  %v4677_v25 = vcvt.s32.f32 %v1756_v63  ;;  %v1741_v35 = vunpack.c.0.s8 %v1517_v43  ;;  %v1757_v50 = vunpack.c.1.s8 %v1517_v43  ;;  %v1565_v43 = vld [vmem:[#allocation5 + $0x2a8] sm:$0xff] }
 0x21f   :  { %v4681_v28 = vcvt.s32.f32 %v1996_v8  ;;  %v4683_v29 = vcvt.s32.f32 %v2012_v15  ;;  %v1997_v61 = vunpack.c.0.s8 %v1581_v14  ;;  %v2013_v62 = vunpack.c.1.s8 %v1581_v14 }
 0x220   :  { %v4689_v57 = vcvt.s32.f32 %v1741_v35  ;;  %v4691_v63 = vcvt.s32.f32 %v1757_v50  ;;  %v1964_v8 = vunpack.c.2.s8 %v1564_v37  ;;  %v1709_v42 = vunpack.c.2.s8 %v1501_v53 }
 0x221   :  { %v4693_v15 = vcvt.s32.f32 %v1997_v61  ;;  %v1676_v61 = vunpack.c.0.s8 %v1500_v38  ;;  %v1692_v31 = vunpack.c.1.s8 %v1500_v38  ;;  %v1693_v30 = vunpack.c.1.s8 %v1501_v53 }
 0x222   :  { %v4703_v14 = vcvt.s32.f32 %v1964_v8  ;;  %v4709_v58 = vcvt.s32.f32 %v1709_v42  ;;  %v1965_v8 = vunpack.c.2.s8 %v1565_v43  ;;  %v5386_v19 = vpack.c.bf16 %v4621_v23, %v4617_v47 }
 0x223   :  { %v5390_v13 = vpack.c.bf16 %v4645_v36, %v4641_v45 }
 0x224   :  { %v4721_v40 = vcvt.s32.f32 %v1965_v8  ;;  %v1677_v8 = vunpack.c.0.s8 %v1501_v53 }
 0x266   :  { %v1457_v0 = vpop.f32.mrf.mxu0  ;;  %v1471_v3 = vpop.f32.mrf.mxu1 }
 0x267   :  { %v1458_v18 = vadd.f32 %v1457_v0, %v1420_v33  ;;  %v1472_v21 = vadd.f32 %v1471_v3, %v1421_v49  ;;  %v1708_v0 = vunpack.c.2.s8 %v1500_v38  ;;  %v1724_v3 = vunpack.c.3.s8 %v1500_v38 }
 0x269   :  { %v1476_v2 = vmax.f32 %v1458_v18, 0.0  ;;  %v1477_v46 = vmax.f32 %v1472_v21, 0.0  ;;  %v4695_v18 = vcvt.s32.f32 %v2013_v62  ;;  %v1980_v21 = vunpack.c.3.s8 %v1564_v37 }
 0x26a   :  { %v4699_v39 = vcvt.s32.f32 %v1708_v0  ;;  %v4701_v35 = vcvt.s32.f32 %v1724_v3  ;;  %v1725_v62 = vunpack.c.3.s8 %v1501_v53  ;;  %v1948_v3 = vunpack.c.1.s8 %v1564_v37 }
 0x26b   :  { %v4707_v12 = vcvt.s32.f32 %v1980_v21  ;;  %v1981_v21 = vunpack.c.3.s8 %v1565_v43 }
 0x26c   :  { %v4719_v48 = vcvt.s32.f32 %v1725_v62  ;;  %v4733_v62 = vcvt.s32.f32 %v1692_v31  ;;  %v1933_v31 = vunpack.c.0.s8 %v1565_v43 }
 0x26e   :  { %v1459_v50 = vpop.f32.mrf.mxu0  ;;  %v1473_v4 = vpop.f32.mrf.mxu1 }
 0x26f   :  { %v1460_v54 = vadd.f32 %v1459_v50, %v1420_v33  ;;  %v1474_v0 = vadd.f32 %v1473_v4, %v1421_v49  ;;  %v4725_v33 = vcvt.s32.f32 %v1981_v21  ;;  %v4727_v49 = vcvt.s32.f32 %v1676_v61  ;;  %v1548_v21 = vld [vmem:[#allocation5 + $0x220] sm:$0xff] }
 0x270   :  { %v1932_v4 = vunpack.c.0.s8 %v1564_v37  ;;  %v1949_v37 = vunpack.c.1.s8 %v1565_v43  ;;  %v4749_v61 = vcvt.s32.f32 %v1693_v30  ;;  %v1900_v30 = vunpack.c.2.s8 %v1548_v21 }
 0x271   :  { %v1478_v44 = vmax.f32 %v1460_v54, 0.0  ;;  %v1479_v42 = vmax.f32 %v1474_v0, 0.0  ;;  %v1484_v54 = vld [vmem:[#allocation5 + $0x20] sm:$0xff]  ;;  %v2813_v0 = vpack.c.bf16 %v4725_v33, %v4721_v40 }
 0x272   :  { %v4737_v38 = vcvt.s32.f32 %v1932_v4  ;;  %v1644_v53 = vunpack.c.2.s8 %v1484_v54  ;;  %v1485_v4 = vld [vmem:[#allocation5 + $0x28] sm:$0xff]  ;;  %v1628_v1 = vunpack.c.1.s8 %v1484_v54 }
 0x273   :  { %v4729_v50 = vpack.c.bf16 %v1478_v44, %v1476_v2  ;;  %v4731_v27 = vpack.c.bf16 %v1479_v42, %v1477_v46  ;;  %v4743_v2 = vcvt.s32.f32 %v1948_v3  ;;  %v4747_v46 = vcvt.s32.f32 %v1677_v8  ;;  %v1549_v44 = vld [vmem:[#allocation5 + $0x228] sm:$0xff] }
 0x274   :  { %v1660_v42 = vunpack.c.3.s8 %v1484_v54  ;;  %v4759_v3 = vcvt.s32.f32 %v1933_v31  ;;  %v4761_v8 = vcvt.s32.f32 %v1949_v37  ;;  %v4771_v6 = vcvt.s32.f32 %v1644_v53 }
 0x275   :  { %2898 = vmatmul.bf16.vlgmr.msrb.gmra.mxu2 %v4729_v50  ;;  %2912 = vmatmul.bf16.vlgmr.msrb.gmra.mxu3 %v4731_v27  ;;  %v2796_v43 = vpack.c.bf16 %v4743_v2, %v4737_v38  ;;  %v4777_v31 = vcvt.s32.f32 %v1900_v30  ;;  %v1645_v37 = vunpack.c.2.s8 %v1485_v4  ;;  %v1661_v11 = vunpack.c.3.s8 %v1485_v4 }
 0x276   :  { %2926 = vmatmul.bf16.vlgmr.msra.gmra.mxu0 %v4729_v50  ;;  %2940 = vmatmul.bf16.vlgmr.msra.gmra.mxu1 %v4731_v27  ;;  %v4773_v7 = vcvt.s32.f32 %v1660_v42  ;;  %v1917_v23 = vunpack.c.3.s8 %v1549_v44  ;;  %v5387_v53 = vpack.c.bf16 %v4625_v20, %v4623_v26  ;;  %v5388_v42 = vpack.c.bf16 %v4631_v34, %v4629_v32 }
 0x277   :  { %3002 = vmatpush.bf16.msrb.mxu2 %v2748_v10  ;;  %3016 = vmatpush.bf16.msrb.mxu3 %v2876_v16  ;;  %v1916_v10 = vunpack.c.3.s8 %v1548_v21  ;;  %v4791_v30 = vcvt.s32.f32 %v1661_v11  ;;  %v1612_v16 = vunpack.c.0.s8 %v1484_v54  ;;  %v1868_v34 = vunpack.c.0.s8 %v1548_v21 }
 0x278   :  { %3030 = vmatpush.bf16.msra.mxu0 %v2749_v22  ;;  %3044 = vmatpush.bf16.msra.mxu1 %v5386_v19  ;;  %v1901_v22 = vunpack.c.2.s8 %v1549_v44  ;;  %v4789_v19 = vcvt.s32.f32 %v1645_v37  ;;  %v4803_v32 = vcvt.s32.f32 %v1917_v23  ;;  %v4809_v11 = vcvt.s32.f32 %v1628_v1 }
 0x279   :  { %v4781_v47 = vcvt.s32.f32 %v1916_v10  ;;  %v5389_v10 = vpack.c.bf16 %v4637_v41, %v4635_v9  ;;  %v4807_v54 = vcvt.s32.f32 %v1612_v16  ;;  %v1884_v9 = vunpack.c.1.s8 %v1548_v21  ;;  %v1534_v41 = vld [vmem:[#allocation5 + $0x1b0] sm:$0xff] }
 0x27a   :  { %v4801_v20 = vcvt.s32.f32 %v1901_v22  ;;  %v2653_v37 = vpack.c.bf16 %v4791_v30, %v4789_v19  ;;  %v4813_v36 = vcvt.s32.f32 %v1868_v34  ;;  %v1629_v22 = vunpack.c.1.s8 %v1485_v4  ;;  %v1502_v30 = vld [vmem:[#allocation5 + $0xb0] sm:$0xff] }
 0x27b   :  { %3003 = vmatpush.bf16.msrb.mxu2 %v5387_v53  ;;  %3017 = vmatpush.bf16.msrb.mxu3 %v5388_v42  ;;  %v2780_v26 = vpack.c.bf16 %v4781_v47, %v4777_v31  ;;  %v1598_v53 = vld [vmem:[#allocation5 + $0x3b0] sm:$0xff]  ;;  %v5391_v23 = vpack.c.bf16 %v4649_v51, %v4647_v52  ;;  %v5392_v16 = vpack.c.bf16 %v4655_v56, %v4653_v55  ;;  %v4823_v1 = vcvt.s32.f32 %v1884_v9 }
 0x27c   :  { %3031 = vmatpush.bf16.msra.mxu0 %v5389_v10  ;;  %3045 = vmatpush.bf16.msra.mxu1 %v5390_v13  ;;  %v2781_v45 = vpack.c.bf16 %v4803_v32, %v4801_v20  ;;  %v1613_v13 = vunpack.c.0.s8 %v1485_v4  ;;  %v2636_v21 = vpack.c.bf16 %v4809_v11, %v4807_v54  ;;  %v1869_v42 = vunpack.c.0.s8 %v1549_v44 }
 0x27d   :  { %v1885_v10 = vunpack.c.1.s8 %v1549_v44  ;;  %v5393_v34 = vpack.c.bf16 %v4661_v60, %v4659_v59  ;;  %v5394_v4 = vpack.c.bf16 %v4669_v5, %v4665_v17  ;;  %v4833_v51 = vcvt.s32.f32 %v1629_v22  ;;  %v1599_v60 = vld [vmem:[#allocation5 + $0x3b8] sm:$0xff] }
 0x27e   :  { %v4831_v52 = vcvt.s32.f32 %v1613_v13  ;;  %v1838_v55 = vunpack.c.2.s8 %v1534_v41  ;;  %v1854_v56 = vunpack.c.3.s8 %v1534_v41  ;;  %v2094_v59 = vunpack.c.2.s8 %v1598_v53 }
 0x27f   :  { %3004 = vmatpush.bf16.msrb.mxu2 %v5391_v23  ;;  %3018 = vmatpush.bf16.msrb.mxu3 %v5392_v16  ;;  %v1535_v23 = vld [vmem:[#allocation5 + $0x1b8] sm:$0xff]  ;;  %v4837_v16 = vcvt.s32.f32 %v1869_v42  ;;  %v4839_v44 = vcvt.s32.f32 %v1885_v10  ;;  %v2110_v22 = vunpack.c.3.s8 %v1598_v53  ;;  %v5396_v42 = vpack.c.bf16 %v4683_v29, %v4681_v28 }
 0x280   :  { %3032 = vmatpush.bf16.msra.mxu0 %v5393_v34  ;;  %3046 = vmatpush.bf16.msra.mxu1 %v5394_v4  ;;  %v4843_v5 = vcvt.s32.f32 %v1838_v55  ;;  %v4845_v13 = vcvt.s32.f32 %v1854_v56  ;;  %v5395_v34 = vpack.c.bf16 %v4677_v25, %v4675_v24  ;;  %v4855_v4 = vcvt.s32.f32 %v2094_v59 }
 0x281   :  { %v2765_v10 = vpack.c.bf16 %v4839_v44, %v4837_v16  ;;  %v1839_v9 = vunpack.c.2.s8 %v1535_v23  ;;  %v1855_v17 = vunpack.c.3.s8 %v1535_v23  ;;  %v5397_v55 = vpack.c.bf16 %v4691_v63, %v4689_v57 }
 0x282   :  { %v5398_v56 = vpack.c.bf16 %v4695_v18, %v4693_v15  ;;  %v2750_v24 = vpack.c.bf16 %v4845_v13, %v4843_v5  ;;  %v4865_v25 = vcvt.s32.f32 %v2110_v22  ;;  %v2095_v28 = vunpack.c.2.s8 %v1599_v60  ;;  %v1518_v15 = vld [vmem:[#allocation5 + $0x130] sm:$0xff] }
 0x283   :  { %3005 = vmatpush.bf16.msrb.mxu2 %v5395_v34  ;;  %3019 = vmatpush.bf16.msrb.mxu3 %v5396_v42  ;;  %v2111_v29 = vunpack.c.3.s8 %v1599_v60  ;;  %v4869_v59 = vcvt.s32.f32 %v1839_v9  ;;  %v4871_v34 = vcvt.s32.f32 %v1855_v17  ;;  %v1806_v57 = vunpack.c.0.s8 %v1534_v41 }
 0x284   :  { %3033 = vmatpush.bf16.msra.mxu0 %v5397_v55  ;;  %3047 = vmatpush.bf16.msra.mxu1 %v5398_v56  ;;  %v1822_v63 = vunpack.c.1.s8 %v1534_v41  ;;  %v4877_v18 = vcvt.s32.f32 %v2095_v28  ;;  %v2062_v42 = vunpack.c.0.s8 %v1598_v53  ;;  %v5399_v9 = vpack.c.bf16 %v4701_v35, %v4699_v39 }
 0x285   :  { %2954 = vmatmul.bf16.vlgmr.msra.gmra.mxu2 %v4729_v50  ;;  %2968 = vmatmul.bf16.vlgmr.msra.gmra.mxu3 %v4731_v27  ;;  %v4879_v22 = vcvt.s32.f32 %v2111_v29  ;;  %v5400_v17 = vpack.c.bf16 %v4707_v12, %v4703_v14  ;;  %v2751_v41 = vpack.c.bf16 %v4871_v34, %v4869_v59  ;;  %v4889_v55 = vcvt.s32.f32 %v1806_v57  ;;  %v1582_v57 = vld [vmem:[#allocation5 + $0x330] sm:$0xff] }
 0x286   :  { %2982 = vmatmul.bf16.vlgmr.msrb.gmra.mxu0 %v4729_v50  ;;  %2996 = vmatmul.bf16.vlgmr.msrb.gmra.mxu1 %v4731_v27  ;;  %v4891_v56 = vcvt.s32.f32 %v1822_v63  ;;  %v2078_v28 = vunpack.c.1.s8 %v1598_v53  ;;  %v5401_v29 = vpack.c.bf16 %v4719_v48, %v4709_v58  ;;  %v4901_v39 = vcvt.s32.f32 %v2062_v42 }
 0x287   :  { %3006 = vmatpush.bf16.msrb.mxu2 %v5399_v9  ;;  %3020 = vmatpush.bf16.msrb.mxu3 %v5400_v17  ;;  %v2879_v12 = vpack.c.bf16 %v4879_v22, %v4877_v18  ;;  %v1807_v35 = vunpack.c.0.s8 %v1535_v23  ;;  %v1823_v14 = vunpack.c.1.s8 %v1535_v23  ;;  %v2063_v9 = vunpack.c.0.s8 %v1599_v60 }
 0x288   :  { %3034 = vmatpush.bf16.msra.mxu0 %v5401_v29  ;;  %3048 = vmatpush.bf16.msra.mxu1 %v2813_v0  ;;  %v2734_v53 = vpack.c.bf16 %v4891_v56, %v4889_v55  ;;  %v4905_v63 = vcvt.s32.f32 %v2078_v28  ;;  %v2079_v48 = vunpack.c.1.s8 %v1599_v60  ;;  %v1774_v40 = vunpack.c.2.s8 %v1518_v15  ;;  %v1519_v0 = vld [vmem:[#allocation5 + $0x138] sm:$0xff] }
 0x289   :  { %v4907_v58 = vcvt.s32.f32 %v1807_v35  ;;  %v4909_v17 = vcvt.s32.f32 %v1823_v14  ;;  %v1790_v33 = vunpack.c.3.s8 %v1518_v15  ;;  %v5402_v42 = vpack.c.bf16 %v4733_v62, %v4727_v49  ;;  %v1583_v35 = vld [vmem:[#allocation5 + $0x338] sm:$0xff] }
 0x28a   :  { %v2862_v23 = vpack.c.bf16 %v4905_v63, %v4901_v39  ;;  %v4919_v28 = vcvt.s32.f32 %v2063_v9  ;;  %v4921_v60 = vcvt.s32.f32 %v2079_v48  ;;  %v2030_v29 = vunpack.c.2.s8 %v1582_v57 }
 0x28b   :  { %3007 = vmatpush.bf16.msrb.mxu2 %v5402_v42  ;;  %3021 = vmatpush.bf16.msrb.mxu3 %v2796_v43  ;;  %v5403_v14 = vpack.c.bf16 %v4749_v61, %v4747_v46  ;;  %v5404_v49 = vpack.c.bf16 %v4761_v8, %v4759_v3  ;;  %v2735_v62 = vpack.c.bf16 %v4909_v17, %v4907_v58  ;;  %v4931_v38 = vcvt.s32.f32 %v1774_v40  ;;  %v1486_v17 = vld [vmem:[#allocation5 + $0x30] sm:$0xff] }
 0x28c   :  { %v4933_v2 = vcvt.s32.f32 %v1790_v33  ;;  %v2046_v43 = vunpack.c.3.s8 %v1582_v57  ;;  %v4937_v48 = vcvt.s32.f32 %v2030_v29  ;;  %v1775_v42 = vunpack.c.2.s8 %v1519_v0 }
 0x28d   :  { %3035 = vmatpush.bf16.msra.mxu0 %v5403_v14  ;;  %3049 = vmatpush.bf16.msra.mxu1 %v5404_v49  ;;  %v1791_v46 = vunpack.c.3.s8 %v1519_v0  ;;  %v2031_v8 = vunpack.c.2.s8 %v1583_v35  ;;  %v2047_v14 = vunpack.c.3.s8 %v1583_v35  ;;  %v5405_v40 = vpack.c.bf16 %v4773_v7, %v4771_v6 }
 0x28e   :  { %v2718_v61 = vpack.c.bf16 %v4933_v2, %v4931_v38  ;;  %v4941_v3 = vcvt.s32.f32 %v2046_v43  ;;  %v4949_v33 = vcvt.s32.f32 %v1775_v42  ;;  %v1742_v49 = vunpack.c.0.s8 %v1518_v15  ;;  %v4975_v42 = vld [vmem:[#allocation5 + $0x2b0] sm:$0xff] }
 0x28f   :  { %3008 = vmatpush.bf16.msrb.mxu2 %v5405_v40  ;;  %3022 = vmatpush.bf16.msrb.mxu3 %v2780_v26  ;;  %v4951_v29 = vcvt.s32.f32 %v1791_v46  ;;  %v1758_v9 = vunpack.c.1.s8 %v1518_v15  ;;  %v4961_v7 = vcvt.s32.f32 %v2031_v8  ;;  %v4963_v31 = vcvt.s32.f32 %v2047_v14 }
 0x290   :  { %v2846_v6 = vpack.c.bf16 %v4941_v3, %v4937_v48  ;;  %v1998_v47 = vunpack.c.0.s8 %v1582_v57  ;;  %v4967_v15 = vcvt.s32.f32 %v1742_v49  ;;  %v2014_v19 = vunpack.c.1.s8 %v1582_v57  ;;  %v1487_v3 = vld [vmem:[#allocation5 + $0x38] sm:$0xff] }
 0x291   :  { %3036 = vmatpush.bf16.msra.mxu0 %v2653_v37  ;;  %3050 = vmatpush.bf16.msra.mxu1 %v2781_v45  ;;  %v2719_v26 = vpack.c.bf16 %v4951_v29, %v4949_v33  ;;  %v4969_v43 = vcvt.s32.f32 %v1758_v9  ;;  %v2847_v20 = vpack.c.bf16 %v4963_v31, %v4961_v7  ;;  %v1743_v37 = vunpack.c.0.s8 %v1519_v0 }
 0x292   :  { %v4973_v32 = vcvt.s32.f32 %v1998_v47  ;;  %v1759_v45 = vunpack.c.1.s8 %v1519_v0  ;;  %v5406_v46 = vpack.c.bf16 %v4823_v1, %v4813_v36  ;;  %v4985_v9 = vcvt.s32.f32 %v2014_v19  ;;  %v1503_v1 = vld [vmem:[#allocation5 + $0xb8] sm:$0xff] }
 0x293   :  { %3009 = vmatpush.bf16.msrb.mxu2 %v2636_v21  ;;  %v2702_v57 = vpack.c.bf16 %v4969_v43, %v4967_v15  ;;  %v1999_v8 = vunpack.c.0.s8 %v1583_v35  ;;  %v2015_v14 = vunpack.c.1.s8 %v1583_v35  ;;  %v5407_v0 = vpack.c.bf16 %v4833_v51, %v4831_v52 }
 0x294   :  { %3023 = vmatpush.bf16.msrb.mxu3 %v5406_v46  ;;  %v4993_v54 = vcvt.s32.f32 %v1743_v37  ;;  %v4995_v11 = vcvt.s32.f32 %v1759_v45  ;;  %v1710_v36 = vunpack.c.2.s8 %v1502_v30  ;;  %v1726_v21 = vunpack.c.3.s8 %v1502_v30 }
 0x295   :  { %3037 = vmatpush.bf16.msra.mxu0 %v5407_v0  ;;  %3051 = vmatpush.bf16.msra.mxu1 %v2765_v10  ;;  %v5408_v35 = vpack.c.bf16 %v4865_v25, %v4855_v4  ;;  %v2830_v52 = vpack.c.bf16 %v4985_v9, %v4973_v32  ;;  %v5005_v51 = vcvt.s32.f32 %v1999_v8  ;;  %v5007_v16 = vcvt.s32.f32 %v2015_v14  ;;  %v1567_v10 = vld [vmem:[#allocation5 + $0x2b8] sm:$0xff]  ;;  %v1550_v8 = vld [vmem:[#allocation5 + $0x230] sm:$0xff] }
 0x296   :  { %v1966_v44 = vunpack.c.2.s8 %v4975_v42  ;;  %v2703_v5 = vpack.c.bf16 %v4995_v11, %v4993_v54  ;;  %v5018_v13 = vcvt.s32.f32 %v1710_v36  ;;  %v5020_v4 = vcvt.s32.f32 %v1726_v21  ;;  %3010 = vmatmul.bf16.vlgmr.msrb.gmra.mxu2 %v4729_v50 }
 0x297   :  { %3058 = vmatpush.bf16.msra.mxu2 %v2750_v24  ;;  %v1982_v24 = vunpack.c.3.s8 %v4975_v42  ;;  %3024 = vmatmul.bf16.vlgmr.msrb.gmra.mxu3 %v4731_v27  ;;  %v2831_v25 = vpack.c.bf16 %v5007_v16, %v5005_v51  ;;  %v1711_v34 = vunpack.c.2.s8 %v1503_v1  ;;  %v1727_v18 = vunpack.c.3.s8 %v1503_v1  ;;  %v1551_v51 = vld [vmem:[#allocation5 + $0x238] sm:$0xff] }
 0x298   :  { %3072 = vmatpush.bf16.msra.mxu3 %v5408_v35  ;;  %v5027_v59 = vcvt.s32.f32 %v1966_v44  ;;  %3038 = vmatmul.bf16.vlgmr.msra.gmra.mxu0 %v4729_v50  ;;  %v2686_v22 = vpack.c.bf16 %v5020_v4, %v5018_v13  ;;  %v1983_v40 = vunpack.c.3.s8 %v1567_v10  ;;  %v1678_v19 = vunpack.c.0.s8 %v1502_v30 }
 0x299   :  { %3086 = vmatpush.bf16.msrb.mxu0 %v2751_v41  ;;  %3100 = vmatpush.bf16.msrb.mxu1 %v2879_v12  ;;  %v5033_v41 = vcvt.s32.f32 %v1982_v24  ;;  %v1967_v12 = vunpack.c.2.s8 %v1567_v10  ;;  %v5041_v49 = vcvt.s32.f32 %v1711_v34  ;;  %v5043_v47 = vcvt.s32.f32 %v1727_v18 }
 0x29a   :  { %3052 = vmatmul.bf16.vlgmr.msra.gmra.mxu1 %v4731_v27  ;;  %v1694_v37 = vunpack.c.1.s8 %v1502_v30  ;;  %v5409_v45 = vpack.c.bf16 %v4921_v60, %v4919_v28  ;;  %v2495_v39 = vcvt.s32.f32 %v1983_v40  ;;  %v1950_v58 = vunpack.c.1.s8 %v4975_v42 }
 0x29b   :  { %3059 = vmatpush.bf16.msra.mxu2 %v2734_v53  ;;  %v2814_v55 = vpack.c.bf16 %v5033_v41, %v5027_v59  ;;  %v5053_v56 = vcvt.s32.f32 %v1967_v12  ;;  %v1934_v53 = vunpack.c.0.s8 %v4975_v42  ;;  %v2687_v63 = vpack.c.bf16 %v5043_v47, %v5041_v49  ;;  %v1536_v12 = vld [vmem:[#allocation5 + $0x1c0] sm:$0xff] }
 0x29c   :  { %3073 = vmatpush.bf16.msra.mxu3 %v2862_v23  ;;  %v5058_v23 = vcvt.s32.f32 %v1678_v19  ;;  %v5060_v30 = vcvt.s32.f32 %v1694_v37  ;;  %v1695_v46 = vunpack.c.1.s8 %v1503_v1  ;;  %v5074_v42 = vcvt.s32.f32 %v1950_v58  ;;  %v1600_v37 = vld [vmem:[#allocation5 + $0x3c0] sm:$0xff] }
 0x29d   :  { %3087 = vmatpush.bf16.msrb.mxu0 %v2735_v62  ;;  %3101 = vmatpush.bf16.msrb.mxu1 %v5409_v45  ;;  %v2815_v28 = vpack.c.bf16 %v2495_v39, %v5053_v56  ;;  %v5064_v60 = vcvt.s32.f32 %v1934_v53  ;;  %v1679_v62 = vunpack.c.0.s8 %v1503_v1  ;;  %v1935_v0 = vunpack.c.0.s8 %v1567_v10 }
 0x29e   :  { %v2670_v14 = vpack.c.bf16 %v5060_v30, %v5058_v23  ;;  %v1951_v36 = vunpack.c.1.s8 %v1567_v10  ;;  %v5084_v2 = vcvt.s32.f32 %v1695_v46  ;;  %v1646_v48 = vunpack.c.2.s8 %v1486_v17  ;;  %v1537_v23 = vld [vmem:[#allocation5 + $0x1c8] sm:$0xff] }
 0x29f   :  { %3060 = vmatpush.bf16.msra.mxu2 %v2718_v61  ;;  %v5082_v38 = vcvt.s32.f32 %v1679_v62  ;;  %v1662_v61 = vunpack.c.3.s8 %v1486_v17  ;;  %v2447_v21 = vcvt.s32.f32 %v1935_v0  ;;  %v1902_v35 = vunpack.c.2.s8 %v1550_v8 }
 0x2a0   :  { %3074 = vmatpush.bf16.msra.mxu3 %v2846_v6  ;;  %v2798_v6 = vpack.c.bf16 %v5074_v42, %v5064_v60  ;;  %v2463_v1 = vcvt.s32.f32 %v1951_v36  ;;  %v5090_v29 = vcvt.s32.f32 %v1646_v48  ;;  %v1918_v31 = vunpack.c.3.s8 %v1550_v8 }
 0x2a1   :  { %3088 = vmatpush.bf16.msrb.mxu0 %v2719_v26  ;;  %3102 = vmatpush.bf16.msrb.mxu1 %v2847_v20  ;;  %v2671_v33 = vpack.c.bf16 %v5084_v2, %v5082_v38  ;;  %v5092_v7 = vcvt.s32.f32 %v1662_v61  ;;  %v2414_v20 = vcvt.s32.f32 %v1902_v35  ;;  %v1647_v16 = vunpack.c.2.s8 %v1487_v3 }
 0x2a2   :  { %v2799_v26 = vpack.c.bf16 %v2463_v1, %v2447_v21  ;;  %v1663_v44 = vunpack.c.3.s8 %v1487_v3  ;;  %v2430_v24 = vcvt.s32.f32 %v1918_v31  ;;  %v1903_v59 = vunpack.c.2.s8 %v1551_v51 }
 0x2a3   :  { %3061 = vmatpush.bf16.msra.mxu2 %v2702_v57  ;;  %v2654_v10 = vpack.c.bf16 %v5092_v7, %v5090_v29  ;;  %v1919_v15 = vunpack.c.3.s8 %v1551_v51  ;;  %v2159_v43 = vcvt.s32.f32 %v1647_v16  ;;  %v1614_v34 = vunpack.c.0.s8 %v1486_v17  ;;  %v1520_v16 = vld [vmem:[#allocation5 + $0x140] sm:$0xff] }
 0x2a4   :  { %3075 = vmatpush.bf16.msra.mxu3 %v2830_v52  ;;  %v2175_v57 = vcvt.s32.f32 %v1663_v44  ;;  %v1630_v32 = vunpack.c.1.s8 %v1486_v17  ;;  %v2782_v9 = vpack.c.bf16 %v2430_v24, %v2414_v20  ;;  %v2415_v52 = vcvt.s32.f32 %v1903_v59 }
 0x2a5   :  { %3089 = vmatpush.bf16.msrb.mxu0 %v2703_v5  ;;  %3103 = vmatpush.bf16.msrb.mxu1 %v2831_v25  ;;  %v2431_v18 = vcvt.s32.f32 %v1919_v15  ;;  %v1870_v41 = vunpack.c.0.s8 %v1550_v8  ;;  %v5108_v11 = vcvt.s32.f32 %v1614_v34  ;;  %v1886_v25 = vunpack.c.1.s8 %v1550_v8  ;;  %v5111_v15 = vld [vmem:[#allocation5 + $0x340] sm:$0xff] }
 0x2a6   :  { %v2655_v54 = vpack.c.bf16 %v2175_v57, %v2159_v43  ;;  %v2142_v5 = vcvt.s32.f32 %v1630_v32  ;;  %v1615_v47 = vunpack.c.0.s8 %v1487_v3  ;;  %v1631_v19 = vunpack.c.1.s8 %v1487_v3 }
 0x2a7   :  { %3062 = vmatpush.bf16.msra.mxu2 %v2686_v22  ;;  %v2783_v40 = vpack.c.bf16 %v2431_v18, %v2415_v52  ;;  %v2382_v49 = vcvt.s32.f32 %v1870_v41  ;;  %v2398_v56 = vcvt.s32.f32 %v1886_v25  ;;  %v1871_v39 = vunpack.c.0.s8 %v1551_v51 }
 0x2a8   :  { %3076 = vmatpush.bf16.msra.mxu3 %v2814_v55  ;;  %v2638_v45 = vpack.c.bf16 %v2142_v5, %v5108_v11  ;;  %v1887_v13 = vunpack.c.1.s8 %v1551_v51  ;;  %v2127_v4 = vcvt.s32.f32 %v1615_v47  ;;  %v2143_v22 = vcvt.s32.f32 %v1631_v19 }
 0x2a9   :  { %3090 = vmatpush.bf16.msrb.mxu0 %v2687_v63  ;;  %3104 = vmatpush.bf16.msrb.mxu1 %v2815_v28  ;;  %v1840_v55 = vunpack.c.2.s8 %v1536_v12  ;;  %v1856_v53 = vunpack.c.3.s8 %v1536_v12  ;;  %v2766_v30 = vpack.c.bf16 %v2398_v56, %v2382_v49  ;;  %v2383_v63 = vcvt.s32.f32 %v1871_v39  ;;  %v1601_v28 = vld [vmem:[#allocation5 + $0x3c8] sm:$0xff] }
 0x2aa   :  { %v2399_v58 = vcvt.s32.f32 %v1887_v13  ;;  %v2096_v17 = vunpack.c.2.s8 %v1600_v37  ;;  %v2639_v60 = vpack.c.bf16 %v2143_v22, %v2127_v4  ;;  %v2112_v8 = vunpack.c.3.s8 %v1600_v37 }
 0x2ab   :  { %3063 = vmatpush.bf16.msra.mxu2 %v2670_v14  ;;  %v2352_v62 = vcvt.s32.f32 %v1840_v55  ;;  %v2368_v46 = vcvt.s32.f32 %v1856_v53  ;;  %v1841_v36 = vunpack.c.2.s8 %v1537_v23  ;;  %v1857_v38 = vunpack.c.3.s8 %v1537_v23 }
 0x2ac   :  { %3077 = vmatpush.bf16.msra.mxu3 %v2798_v6  ;;  %v2767_v42 = vpack.c.bf16 %v2399_v58, %v2383_v63  ;;  %v2608_v0 = vcvt.s32.f32 %v2096_v17  ;;  %v2624_v48 = vcvt.s32.f32 %v2112_v8  ;;  %v2097_v61 = vunpack.c.2.s8 %v1601_v28 }
 0x2ad   :  { %3091 = vmatpush.bf16.msrb.mxu0 %v2671_v33  ;;  %3105 = vmatpush.bf16.msrb.mxu1 %v2799_v26  ;;  %v2752_v2 = vpack.c.bf16 %v2368_v46, %v2352_v62  ;;  %v2113_v14 = vunpack.c.3.s8 %v1601_v28  ;;  %v2353_v3 = vcvt.s32.f32 %v1841_v36  ;;  %v2369_v6 = vcvt.s32.f32 %v1857_v38  ;;  %v1504_v36 = vld [vmem:[#allocation5 + $0xc0] sm:$0xff] }
 0x2ae   :  { %v1808_v21 = vunpack.c.0.s8 %v1536_v12  ;;  %v1824_v1 = vunpack.c.1.s8 %v1536_v12  ;;  %v2880_v35 = vpack.c.bf16 %v2624_v48, %v2608_v0  ;;  %v2609_v51 = vcvt.s32.f32 %v2097_v61 }
 0x2af   :  { %3064 = vmatpush.bf16.msra.mxu2 %v2654_v10  ;;  %v2625_v33 = vcvt.s32.f32 %v2113_v14  ;;  %v2064_v29 = vunpack.c.0.s8 %v1600_v37  ;;  %v2753_v7 = vpack.c.bf16 %v2369_v6, %v2353_v3  ;;  %v2080_v20 = vunpack.c.1.s8 %v1600_v37  ;;  %v1568_v14 = vld [vmem:[#allocation5 + $0x2c0] sm:$0xff] }
 0x2b0   :  { %3078 = vmatpush.bf16.msra.mxu3 %v2782_v9  ;;  %v2320_v31 = vcvt.s32.f32 %v1808_v21  ;;  %v2336_v26 = vcvt.s32.f32 %v1824_v1  ;;  %v1809_v59 = vunpack.c.0.s8 %v1537_v23  ;;  %v1825_v10 = vunpack.c.1.s8 %v1537_v23 }
 0x2b1   :  { %3092 = vmatpush.bf16.msrb.mxu0 %v2655_v54  ;;  %3106 = vmatpush.bf16.msrb.mxu1 %v2783_v40  ;;  %v2881_v44 = vpack.c.bf16 %v2625_v33, %v2609_v51  ;;  %v2576_v24 = vcvt.s32.f32 %v2064_v29  ;;  %v2592_v57 = vcvt.s32.f32 %v2080_v20  ;;  %v2065_v34 = vunpack.c.0.s8 %v1601_v28  ;;  %v1521_v54 = vld [vmem:[#allocation5 + $0x148] sm:$0xff] }
 0x2b2   :  { %v2736_v43 = vpack.c.bf16 %v2336_v26, %v2320_v31  ;;  %v2081_v32 = vunpack.c.1.s8 %v1601_v28  ;;  %v2321_v9 = vcvt.s32.f32 %v1809_v59  ;;  %v2337_v52 = vcvt.s32.f32 %v1825_v10  ;;  %v1585_v40 = vld [vmem:[#allocation5 + $0x348] sm:$0xff] }
 0x2b3   :  { %3065 = vmatpush.bf16.msra.mxu2 %v2638_v45  ;;  %v1776_v18 = vunpack.c.2.s8 %v1520_v16  ;;  %v1792_v41 = vunpack.c.3.s8 %v1520_v16  ;;  %v2864_v11 = vpack.c.bf16 %v2592_v57, %v2576_v24  ;;  %v2577_v5 = vcvt.s32.f32 %v2065_v34 }
 0x2b4   :  { %3079 = vmatpush.bf16.msra.mxu3 %v2766_v30  ;;  %v2593_v25 = vcvt.s32.f32 %v2081_v32  ;;  %v2032_v12 = vunpack.c.2.s8 %v5111_v15  ;;  %v2737_v49 = vpack.c.bf16 %v2337_v52, %v2321_v9  ;;  %v2048_v37 = vunpack.c.3.s8 %v5111_v15 }
 0x2b5   :  { %3093 = vmatpush.bf16.msrb.mxu0 %v2639_v60  ;;  %3107 = vmatpush.bf16.msrb.mxu1 %v2767_v42  ;;  %v2288_v47 = vcvt.s32.f32 %v1776_v18  ;;  %v2304_v19 = vcvt.s32.f32 %v1792_v41  ;;  %v1777_v39 = vunpack.c.2.s8 %v1521_v54  ;;  %v1793_v13 = vunpack.c.3.s8 %v1521_v54 }
 0x2b6   :  { %3066 = vmatmul.bf16.vlgmr.msra.gmra.mxu2 %v4729_v50  ;;  %v2865_v45 = vpack.c.bf16 %v2593_v25, %v2577_v5  ;;  %v2544_v56 = vcvt.s32.f32 %v2032_v12  ;;  %v2560_v22 = vcvt.s32.f32 %v2048_v37  ;;  %v2033_v55 = vunpack.c.2.s8 %v1585_v40 }
 0x2b7   :  { %3114 = vmatpush.bf16.msrb.mxu2 %v2752_v2  ;;  %3080 = vmatmul.bf16.vlgmr.msra.gmra.mxu3 %v4731_v27  ;;  %v2720_v4 = vpack.c.bf16 %v2304_v19, %v2288_v47  ;;  %v2049_v53 = vunpack.c.3.s8 %v1585_v40  ;;  %v2289_v23 = vcvt.s32.f32 %v1777_v39  ;;  %v2305_v30 = vcvt.s32.f32 %v1793_v13  ;;  %v1488_v39 = vld [vmem:[#allocation5 + $0x40] sm:$0xff] }
 0x2b8   :  { %3128 = vmatpush.bf16.msrb.mxu3 %v2880_v35  ;;  %3094 = vmatmul.bf16.vlgmr.msrb.gmra.mxu0 %v4729_v50  ;;  %v1744_v63 = vunpack.c.0.s8 %v1520_v16  ;;  %v1760_v58 = vunpack.c.1.s8 %v1520_v16  ;;  %v2848_v17 = vpack.c.bf16 %v2560_v22, %v2544_v56  ;;  %v2545_v28 = vcvt.s32.f32 %v2033_v55 }
 0x2b9   :  { %3142 = vmatpush.bf16.msra.mxu0 %v2753_v7  ;;  %3156 = vmatpush.bf16.msra.mxu1 %v2881_v44  ;;  %v2561_v60 = vcvt.s32.f32 %v2049_v53  ;;  %v2000_v62 = vunpack.c.0.s8 %v5111_v15  ;;  %v2721_v46 = vpack.c.bf16 %v2305_v30, %v2289_v23  ;;  %v2016_v0 = vunpack.c.1.s8 %v5111_v15  ;;  %v1505_v7 = vld [vmem:[#allocation5 + $0xc8] sm:$0xff]  ;;  %v1552_v53 = vld [vmem:[#allocation5 + $0x240] sm:$0xff] }
 0x2ba   :  { %3108 = vmatmul.bf16.vlgmr.msrb.gmra.mxu1 %v4731_v27  ;;  %v2256_v8 = vcvt.s32.f32 %v1744_v63  ;;  %v2272_v42 = vcvt.s32.f32 %v1760_v58  ;;  %v1745_v48 = vunpack.c.0.s8 %v1521_v54  ;;  %v1761_v61 = vunpack.c.1.s8 %v1521_v54  ;;  %v1569_v44 = vld [vmem:[#allocation5 + $0x2c8] sm:$0xff] }
 0x2bb   :  { %3115 = vmatpush.bf16.msrb.mxu2 %v2736_v43  ;;  %v2849_v38 = vpack.c.bf16 %v2561_v60, %v2545_v28  ;;  %v2512_v2 = vcvt.s32.f32 %v2000_v62  ;;  %v2528_v6 = vcvt.s32.f32 %v2016_v0  ;;  %v2001_v21 = vunpack.c.0.s8 %v1585_v40 }
 0x2bc   :  { %3129 = vmatpush.bf16.msrb.mxu3 %v2864_v11  ;;  %v2704_v3 = vpack.c.bf16 %v2272_v42, %v2256_v8  ;;  %v2017_v1 = vunpack.c.1.s8 %v1585_v40  ;;  %v2257_v35 = vcvt.s32.f32 %v1745_v48  ;;  %v2273_v51 = vcvt.s32.f32 %v1761_v61 }
 0x2bd   :  { %3143 = vmatpush.bf16.msra.mxu0 %v2737_v49  ;;  %3157 = vmatpush.bf16.msra.mxu1 %v2865_v45  ;;  %v1712_v33 = vunpack.c.2.s8 %v1504_v36  ;;  %v1728_v29 = vunpack.c.3.s8 %v1504_v36  ;;  %v2832_v31 = vpack.c.bf16 %v2528_v6, %v2512_v2  ;;  %v2513_v26 = vcvt.s32.f32 %v2001_v21 }
 0x2be   :  { %v2529_v20 = vcvt.s32.f32 %v2017_v1  ;;  %v1968_v16 = vunpack.c.2.s8 %v1568_v14  ;;  %v2705_v24 = vpack.c.bf16 %v2273_v51, %v2257_v35  ;;  %v1984_v15 = vunpack.c.3.s8 %v1568_v14 }
 0x2bf   :  { %3116 = vmatpush.bf16.msrb.mxu2 %v2720_v4  ;;  %v2224_v59 = vcvt.s32.f32 %v1712_v33  ;;  %v2240_v10 = vcvt.s32.f32 %v1728_v29  ;;  %v1713_v34 = vunpack.c.2.s8 %v1505_v7  ;;  %v1729_v32 = vunpack.c.3.s8 %v1505_v7 }
 0x2c0   :  { %3130 = vmatpush.bf16.msrb.mxu3 %v2848_v17  ;;  %v2833_v43 = vpack.c.bf16 %v2529_v20, %v2513_v26  ;;  %v2480_v57 = vcvt.s32.f32 %v1968_v16  ;;  %v2496_v52 = vcvt.s32.f32 %v1984_v15  ;;  %v1969_v18 = vunpack.c.2.s8 %v1569_v44 }
 0x2c1   :  { %3144 = vmatpush.bf16.msra.mxu0 %v2721_v46  ;;  %3158 = vmatpush.bf16.msra.mxu1 %v2849_v38  ;;  %v2688_v9 = vpack.c.bf16 %v2240_v10, %v2224_v59  ;;  %v1985_v41 = vunpack.c.3.s8 %v1569_v44  ;;  %v2225_v54 = vcvt.s32.f32 %v1713_v34  ;;  %v2241_v11 = vcvt.s32.f32 %v1729_v32  ;;  %v1489_v46 = vld [vmem:[#allocation5 + $0x48] sm:$0xff]  ;;  %v1538_v34 = vld [vmem:[#allocation5 + $0x1d0] sm:$0xff] }
 0x2c2   :  { %v1680_v5 = vunpack.c.0.s8 %v1504_v36  ;;  %v1696_v25 = vunpack.c.1.s8 %v1504_v36  ;;  %v2816_v12 = vpack.c.bf16 %v2496_v52, %v2480_v57  ;;  %v2481_v40 = vcvt.s32.f32 %v1969_v18  ;;  %v1553_v38 = vld [vmem:[#allocation5 + $0x248] sm:$0xff] }
 0x2c3   :  { %3117 = vmatpush.bf16.msrb.mxu2 %v2704_v3  ;;  %v2497_v49 = vcvt.s32.f32 %v1985_v41  ;;  %v1936_v47 = vunpack.c.0.s8 %v1568_v14  ;;  %v2689_v19 = vpack.c.bf16 %v2241_v11, %v2225_v54  ;;  %v1952_v56 = vunpack.c.1.s8 %v1568_v14  ;;  %v1602_v41 = vld [vmem:[#allocation5 + $0x3d0] sm:$0xff] }
 0x2c4   :  { %3131 = vmatpush.bf16.msrb.mxu3 %v2832_v31  ;;  %v2192_v37 = vcvt.s32.f32 %v1680_v5  ;;  %v2208_v45 = vcvt.s32.f32 %v1696_v25  ;;  %v1681_v22 = vunpack.c.0.s8 %v1505_v7  ;;  %v1697_v55 = vunpack.c.1.s8 %v1505_v7 }
 0x2c5   :  { %3145 = vmatpush.bf16.msra.mxu0 %v2705_v24  ;;  %3159 = vmatpush.bf16.msra.mxu1 %v2833_v43  ;;  %v2817_v13 = vpack.c.bf16 %v2497_v49, %v2481_v40  ;;  %v2448_v4 = vcvt.s32.f32 %v1936_v47  ;;  %v2464_v30 = vcvt.s32.f32 %v1952_v56  ;;  %v1937_v63 = vunpack.c.0.s8 %v1569_v44 }
 0x2c6   :  { %v2672_v23 = vpack.c.bf16 %v2208_v45, %v2192_v37  ;;  %v1953_v58 = vunpack.c.1.s8 %v1569_v44  ;;  %v2193_v17 = vcvt.s32.f32 %v1681_v22  ;;  %v2209_v28 = vcvt.s32.f32 %v1697_v55 }
 0x2c7   :  { %3118 = vmatpush.bf16.msrb.mxu2 %v2688_v9  ;;  %v1648_v60 = vunpack.c.2.s8 %v1488_v39  ;;  %v1664_v62 = vunpack.c.3.s8 %v1488_v39  ;;  %v2800_v8 = vpack.c.bf16 %v2464_v30, %v2448_v4  ;;  %v2449_v42 = vcvt.s32.f32 %v1937_v63 }
 0x2c8   :  { %3132 = vmatpush.bf16.msrb.mxu3 %v2816_v12  ;;  %v2465_v0 = vcvt.s32.f32 %v1953_v58  ;;  %v1904_v36 = vunpack.c.2.s8 %v1552_v53  ;;  %v2673_v2 = vpack.c.bf16 %v2209_v28, %v2193_v17  ;;  %v1920_v14 = vunpack.c.3.s8 %v1552_v53 }
 0x2c9   :  { %3146 = vmatpush.bf16.msra.mxu0 %v2689_v19  ;;  %3160 = vmatpush.bf16.msra.mxu1 %v2817_v13  ;;  %v2160_v48 = vcvt.s32.f32 %v1648_v60  ;;  %v2176_v61 = vcvt.s32.f32 %v1664_v62  ;;  %v1649_v21 = vunpack.c.2.s8 %v1489_v46  ;;  %v1665_v1 = vunpack.c.3.s8 %v1489_v46  ;;  %v1539_v19 = vld [vmem:[#allocation5 + $0x1d8] sm:$0xff] }
 0x2ca   :  { %v2801_v3 = vpack.c.bf16 %v2465_v0, %v2449_v42  ;;  %v2416_v6 = vcvt.s32.f32 %v1904_v36  ;;  %v2432_v51 = vcvt.s32.f32 %v1920_v14  ;;  %v1905_v33 = vunpack.c.2.s8 %v1553_v38  ;;  %v1603_v13 = vld [vmem:[#allocation5 + $0x3d8] sm:$0xff] }
 0x2cb   :  { %3119 = vmatpush.bf16.msrb.mxu2 %v2672_v23  ;;  %v2656_v35 = vpack.c.bf16 %v2176_v61, %v2160_v48  ;;  %v1921_v29 = vunpack.c.3.s8 %v1553_v38  ;;  %v2161_v7 = vcvt.s32.f32 %v1649_v21  ;;  %v2177_v31 = vcvt.s32.f32 %v1665_v1  ;;  %v1522_v21 = vld [vmem:[#allocation5 + $0x150] sm:$0xff] }
 0x2cc   :  { %3133 = vmatpush.bf16.msrb.mxu3 %v2800_v8  ;;  %v1616_v26 = vunpack.c.0.s8 %v1488_v39  ;;  %v1632_v20 = vunpack.c.1.s8 %v1488_v39  ;;  %v2784_v16 = vpack.c.bf16 %v2432_v51, %v2416_v6  ;;  %v2417_v44 = vcvt.s32.f32 %v1905_v33 }
 0x2cd   :  { %3147 = vmatpush.bf16.msra.mxu0 %v2673_v2  ;;  %3161 = vmatpush.bf16.msra.mxu1 %v2801_v3  ;;  %v2433_v24 = vcvt.s32.f32 %v1921_v29  ;;  %v1872_v59 = vunpack.c.0.s8 %v1552_v53  ;;  %v2657_v10 = vpack.c.bf16 %v2177_v31, %v2161_v7  ;;  %v1888_v57 = vunpack.c.1.s8 %v1552_v53  ;;  %v1586_v29 = vld [vmem:[#allocation5 + $0x350] sm:$0xff] }
 0x2ce   :  { %v2128_v15 = vcvt.s32.f32 %v1616_v26  ;;  %v2144_v43 = vcvt.s32.f32 %v1632_v20  ;;  %v1617_v52 = vunpack.c.0.s8 %v1489_v46  ;;  %v1633_v18 = vunpack.c.1.s8 %v1489_v46 }
 0x2cf   :  { %3120 = vmatpush.bf16.msrb.mxu2 %v2656_v35  ;;  %v2785_v32 = vpack.c.bf16 %v2433_v24, %v2417_v44  ;;  %v2384_v9 = vcvt.s32.f32 %v1872_v59  ;;  %v2400_v11 = vcvt.s32.f32 %v1888_v57  ;;  %v1873_v5 = vunpack.c.0.s8 %v1553_v38 }
 0x2d0   :  { %3134 = vmatpush.bf16.msrb.mxu3 %v2784_v16  ;;  %v2640_v54 = vpack.c.bf16 %v2144_v43, %v2128_v15  ;;  %v1889_v25 = vunpack.c.1.s8 %v1553_v38  ;;  %v2129_v12 = vcvt.s32.f32 %v1617_v52  ;;  %v2145_v40 = vcvt.s32.f32 %v1633_v18 }
 0x2d1   :  { %3148 = vmatpush.bf16.msra.mxu0 %v2657_v10  ;;  %3162 = vmatpush.bf16.msra.mxu1 %v2785_v32  ;;  %v1842_v49 = vunpack.c.2.s8 %v1538_v34  ;;  %v1858_v47 = vunpack.c.3.s8 %v1538_v34  ;;  %v2768_v37 = vpack.c.bf16 %v2400_v11, %v2384_v9  ;;  %v2385_v45 = vcvt.s32.f32 %v1873_v5  ;;  %v1523_v10 = vld [vmem:[#allocation5 + $0x158] sm:$0xff] }
 0x2d2   :  { %v2401_v56 = vcvt.s32.f32 %v1889_v25  ;;  %v2098_v39 = vunpack.c.2.s8 %v1602_v41  ;;  %v2641_v4 = vpack.c.bf16 %v2145_v40, %v2129_v12  ;;  %v2114_v53 = vunpack.c.3.s8 %v1602_v41  ;;  %v1587_v32 = vld [vmem:[#allocation5 + $0x358] sm:$0xff] }
 0x2d3   :  { %3121 = vmatpush.bf16.msrb.mxu2 %v2640_v54  ;;  %v2354_v22 = vcvt.s32.f32 %v1842_v49  ;;  %v2370_v55 = vcvt.s32.f32 %v1858_v47  ;;  %v1843_v63 = vunpack.c.2.s8 %v1539_v19  ;;  %v1859_v58 = vunpack.c.3.s8 %v1539_v19 }
 0x2d4   :  { %3135 = vmatpush.bf16.msrb.mxu3 %v2768_v37  ;;  %v2769_v23 = vpack.c.bf16 %v2401_v56, %v2385_v45  ;;  %v2610_v30 = vcvt.s32.f32 %v2098_v39  ;;  %v2626_v28 = vcvt.s32.f32 %v2114_v53  ;;  %v2099_v60 = vunpack.c.2.s8 %v1603_v13 }
 0x2d5   :  { %3149 = vmatpush.bf16.msra.mxu0 %v2641_v4  ;;  %v2754_v17 = vpack.c.bf16 %v2370_v55, %v2354_v22  ;;  %v2115_v62 = vunpack.c.3.s8 %v1603_v13  ;;  %v2355_v46 = vcvt.s32.f32 %v1843_v63  ;;  %v2371_v8 = vcvt.s32.f32 %v1859_v58  ;;  %v1506_v63 = vld [vmem:[#allocation5 + $0xd0] sm:$0xff] }
 0x2d6   :  { %3122 = vmatmul.bf16.vlgmr.msrb.gmra.mxu2 %v4729_v50  ;;  %3163 = vmatpush.bf16.msra.mxu1 %v2769_v23  ;;  %v1810_v42 = vunpack.c.0.s8 %v1538_v34  ;;  %v1826_v0 = vunpack.c.1.s8 %v1538_v34  ;;  %v2882_v36 = vpack.c.bf16 %v2626_v28, %v2610_v30  ;;  %v2611_v38 = vcvt.s32.f32 %v2099_v60 }
 0x2d7   :  { %3170 = vmatpush.bf16.msra.mxu2 %v2754_v17  ;;  %v2627_v2 = vcvt.s32.f32 %v2115_v62  ;;  %3136 = vmatmul.bf16.vlgmr.msrb.gmra.mxu3 %v4731_v27  ;;  %v2066_v48 = vunpack.c.0.s8 %v1602_v41  ;;  %v2755_v61 = vpack.c.bf16 %v2371_v8, %v2355_v46  ;;  %v2082_v6 = vunpack.c.1.s8 %v1602_v41  ;;  %v1570_v62 = vld [vmem:[#allocation5 + $0x2d0] sm:$0xff] }
 0x2d8   :  { %3150 = vmatmul.bf16.vlgmr.msra.gmra.mxu0 %v4729_v50  ;;  %v2322_v14 = vcvt.s32.f32 %v1810_v42  ;;  %v2338_v3 = vcvt.s32.f32 %v1826_v0  ;;  %3184 = vmatpush.bf16.msra.mxu3 %v2882_v36  ;;  %v1811_v51 = vunpack.c.0.s8 %v1539_v19  ;;  %v1827_v33 = vunpack.c.1.s8 %v1539_v19 }
 0x2d9   :  { %v2883_v1 = vpack.c.bf16 %v2627_v2, %v2611_v38  ;;  %3164 = vmatmul.bf16.vlgmr.msra.gmra.mxu1 %v4731_v27  ;;  %v2578_v35 = vcvt.s32.f32 %v2066_v48  ;;  %3198 = vmatpush.bf16.msrb.mxu0 %v2755_v61  ;;  %v2594_v31 = vcvt.s32.f32 %v2082_v6  ;;  %v2067_v26 = vunpack.c.0.s8 %v1603_v13  ;;  %v1507_v61 = vld [vmem:[#allocation5 + $0xd8] sm:$0xff] }
 0x2da   :  { %v2738_v7 = vpack.c.bf16 %v2338_v3, %v2322_v14  ;;  %v2083_v20 = vunpack.c.1.s8 %v1603_v13  ;;  %v2323_v16 = vcvt.s32.f32 %v1811_v51  ;;  %v2339_v44 = vcvt.s32.f32 %v1827_v33 }
 0x2db   :  { %3212 = vmatpush.bf16.msrb.mxu1 %v2883_v1  ;;  %v1778_v24 = vunpack.c.2.s8 %v1522_v21  ;;  %v1794_v59 = vunpack.c.3.s8 %v1522_v21  ;;  %v2866_v15 = vpack.c.bf16 %v2594_v31, %v2578_v35  ;;  %v2579_v43 = vcvt.s32.f32 %v2067_v26  ;;  %v1571_v1 = vld [vmem:[#allocation5 + $0x2d8] sm:$0xff] }
 0x2dc   :  { %3171 = vmatpush.bf16.msra.mxu2 %v2738_v7  ;;  %v2595_v57 = vcvt.s32.f32 %v2083_v20  ;;  %v2034_v34 = vunpack.c.2.s8 %v1586_v29  ;;  %v2739_v9 = vpack.c.bf16 %v2339_v44, %v2323_v16  ;;  %v2050_v41 = vunpack.c.3.s8 %v1586_v29 }
 0x2dd   :  { %v2290_v52 = vcvt.s32.f32 %v1778_v24  ;;  %v2306_v18 = vcvt.s32.f32 %v1794_v59  ;;  %3185 = vmatpush.bf16.msra.mxu3 %v2866_v15  ;;  %v1779_v5 = vunpack.c.2.s8 %v1523_v10  ;;  %v1795_v25 = vunpack.c.3.s8 %v1523_v10 }
 0x2de   :  { %v2867_v54 = vpack.c.bf16 %v2595_v57, %v2579_v43  ;;  %v2546_v11 = vcvt.s32.f32 %v2034_v34  ;;  %3199 = vmatpush.bf16.msrb.mxu0 %v2739_v9  ;;  %v2562_v40 = vcvt.s32.f32 %v2050_v41  ;;  %v2035_v49 = vunpack.c.2.s8 %v1587_v32 }
 0x2df   :  { %v2722_v12 = vpack.c.bf16 %v2306_v18, %v2290_v52  ;;  %v2051_v47 = vunpack.c.3.s8 %v1587_v32  ;;  %v2291_v19 = vcvt.s32.f32 %v1779_v5  ;;  %v2307_v37 = vcvt.s32.f32 %v1795_v25  ;;  %v1490_v5 = vld [vmem:[#allocation5 + $0x50] sm:$0xff] }
 0x2e0   :  { %3213 = vmatpush.bf16.msrb.mxu1 %v2867_v54  ;;  %v1746_v45 = vunpack.c.0.s8 %v1522_v21  ;;  %v1762_v56 = vunpack.c.1.s8 %v1522_v21  ;;  %v2850_v39 = vpack.c.bf16 %v2562_v40, %v2546_v11  ;;  %v2547_v13 = vcvt.s32.f32 %v2035_v49 }
 0x2e1   :  { %3172 = vmatpush.bf16.msra.mxu2 %v2722_v12  ;;  %v2563_v4 = vcvt.s32.f32 %v2051_v47  ;;  %v2002_v22 = vunpack.c.0.s8 %v1586_v29  ;;  %v2723_v55 = vpack.c.bf16 %v2307_v37, %v2291_v19  ;;  %v2018_v30 = vunpack.c.1.s8 %v1586_v29  ;;  %v1554_v47 = vld [vmem:[#allocation5 + $0x250] sm:$0xff] }
 0x2e2   :  { %v2258_v53 = vcvt.s32.f32 %v1746_v45  ;;  %v2274_v23 = vcvt.s32.f32 %v1762_v56  ;;  %3186 = vmatpush.bf16.msra.mxu3 %v2850_v39  ;;  %v1747_v28 = vunpack.c.0.s8 %v1523_v10  ;;  %v1763_v60 = vunpack.c.1.s8 %v1523_v10 }
 0x2e3   :  { %v2851_v58 = vpack.c.bf16 %v2563_v4, %v2547_v13  ;;  %v2514_v17 = vcvt.s32.f32 %v2002_v22  ;;  %3200 = vmatpush.bf16.msrb.mxu0 %v2723_v55  ;;  %v2530_v8 = vcvt.s32.f32 %v2018_v30  ;;  %v2003_v42 = vunpack.c.0.s8 %v1587_v32  ;;  %v1491_v55 = vld [vmem:[#allocation5 + $0x58] sm:$0xff] }
 0x2e4   :  { %v2706_v46 = vpack.c.bf16 %v2274_v23, %v2258_v53  ;;  %v2019_v0 = vunpack.c.1.s8 %v1587_v32  ;;  %v2259_v36 = vcvt.s32.f32 %v1747_v28  ;;  %v2275_v38 = vcvt.s32.f32 %v1763_v60 }
 0x2e5   :  { %3214 = vmatpush.bf16.msrb.mxu1 %v2851_v58  ;;  %v1714_v2 = vunpack.c.2.s8 %v1506_v63  ;;  %v1730_v48 = vunpack.c.3.s8 %v1506_v63  ;;  %v2834_v14 = vpack.c.bf16 %v2530_v8, %v2514_v17  ;;  %v2515_v3 = vcvt.s32.f32 %v2003_v42  ;;  %v1555_v58 = vld [vmem:[#allocation5 + $0x258] sm:$0xff] }
 0x2e6   :  { %3173 = vmatpush.bf16.msra.mxu2 %v2706_v46  ;;  %v2531_v6 = vcvt.s32.f32 %v2019_v0  ;;  %v1970_v21 = vunpack.c.2.s8 %v1570_v62  ;;  %v2707_v35 = vpack.c.bf16 %v2275_v38, %v2259_v36  ;;  %v1986_v29 = vunpack.c.3.s8 %v1570_v62 }
 0x2e7   :  { %v2226_v51 = vcvt.s32.f32 %v1714_v2  ;;  %v2242_v33 = vcvt.s32.f32 %v1730_v48  ;;  %3187 = vmatpush.bf16.msra.mxu3 %v2834_v14  ;;  %v1715_v26 = vunpack.c.2.s8 %v1507_v61  ;;  %v1731_v20 = vunpack.c.3.s8 %v1507_v61 }
 0x2e8   :  { %v2835_v7 = vpack.c.bf16 %v2531_v6, %v2515_v3  ;;  %v2482_v31 = vcvt.s32.f32 %v1970_v21  ;;  %3201 = vmatpush.bf16.msrb.mxu0 %v2707_v35  ;;  %v2498_v44 = vcvt.s32.f32 %v1986_v29  ;;  %v1971_v24 = vunpack.c.2.s8 %v1571_v1 }
 0x2e9   :  { %v2690_v16 = vpack.c.bf16 %v2242_v33, %v2226_v51  ;;  %v1987_v59 = vunpack.c.3.s8 %v1571_v1  ;;  %v2227_v10 = vcvt.s32.f32 %v1715_v26  ;;  %v2243_v15 = vcvt.s32.f32 %v1731_v20  ;;  %v1540_v26 = vld [vmem:[#allocation5 + $0x1e0] sm:$0xff] }
 0x2ea   :  { %3215 = vmatpush.bf16.msrb.mxu1 %v2835_v7  ;;  %v1682_v43 = vunpack.c.0.s8 %v1506_v63  ;;  %v1698_v57 = vunpack.c.1.s8 %v1506_v63  ;;  %v2818_v34 = vpack.c.bf16 %v2498_v44, %v2482_v31  ;;  %v2483_v32 = vcvt.s32.f32 %v1971_v24 }
 0x2eb   :  { %3174 = vmatpush.bf16.msra.mxu2 %v2690_v16  ;;  %v2499_v9 = vcvt.s32.f32 %v1987_v59  ;;  %v1938_v52 = vunpack.c.0.s8 %v1570_v62  ;;  %v2691_v18 = vpack.c.bf16 %v2243_v15, %v2227_v10  ;;  %v1954_v11 = vunpack.c.1.s8 %v1570_v62  ;;  %v1604_v59 = vld [vmem:[#allocation5 + $0x3e0] sm:$0xff] }
 0x2ec   :  { %v2194_v41 = vcvt.s32.f32 %v1682_v43  ;;  %v2210_v54 = vcvt.s32.f32 %v1698_v57  ;;  %3188 = vmatpush.bf16.msra.mxu3 %v2818_v34  ;;  %v1683_v40 = vunpack.c.0.s8 %v1507_v61  ;;  %v1699_v49 = vunpack.c.1.s8 %v1507_v61 }
 0x2ed   :  { %v2819_v25 = vpack.c.bf16 %v2499_v9, %v2483_v32  ;;  %v2450_v12 = vcvt.s32.f32 %v1938_v52  ;;  %3202 = vmatpush.bf16.msrb.mxu0 %v2691_v18  ;;  %v2466_v37 = vcvt.s32.f32 %v1954_v11  ;;  %v1939_v45 = vunpack.c.0.s8 %v1571_v1  ;;  %v1541_v18 = vld [vmem:[#allocation5 + $0x1e8] sm:$0xff] }
 0x2ee   :  { %v2674_v19 = vpack.c.bf16 %v2210_v54, %v2194_v41  ;;  %v1955_v56 = vunpack.c.1.s8 %v1571_v1  ;;  %v2195_v39 = vcvt.s32.f32 %v1683_v40  ;;  %v2211_v13 = vcvt.s32.f32 %v1699_v49 }
 0x2ef   :  { %3216 = vmatpush.bf16.msrb.mxu1 %v2819_v25  ;;  %v1650_v4 = vunpack.c.2.s8 %v1490_v5  ;;  %v1666_v22 = vunpack.c.3.s8 %v1490_v5  ;;  %v2802_v53 = vpack.c.bf16 %v2466_v37, %v2450_v12  ;;  %v2451_v23 = vcvt.s32.f32 %v1939_v45  ;;  %v1605_v25 = vld [vmem:[#allocation5 + $0x3e8] sm:$0xff] }
 0x2f0   :  { %3175 = vmatpush.bf16.msra.mxu2 %v2674_v19  ;;  %v2467_v30 = vcvt.s32.f32 %v1955_v56  ;;  %v1906_v63 = vunpack.c.2.s8 %v1554_v47  ;;  %v2675_v17 = vpack.c.bf16 %v2211_v13, %v2195_v39  ;;  %v1922_v62 = vunpack.c.3.s8 %v1554_v47 }
 0x2f1   :  { %v2162_v28 = vcvt.s32.f32 %v1650_v4  ;;  %v2178_v60 = vcvt.s32.f32 %v1666_v22  ;;  %3189 = vmatpush.bf16.msra.mxu3 %v2802_v53  ;;  %v1651_v42 = vunpack.c.2.s8 %v1491_v55  ;;  %v1667_v0 = vunpack.c.3.s8 %v1491_v55 }
 0x2f2   :  { %v2803_v46 = vpack.c.bf16 %v2467_v30, %v2451_v23  ;;  %v2418_v8 = vcvt.s32.f32 %v1906_v63  ;;  %3203 = vmatpush.bf16.msrb.mxu0 %v2675_v17  ;;  %v2434_v38 = vcvt.s32.f32 %v1922_v62  ;;  %v1907_v2 = vunpack.c.2.s8 %v1555_v58 }
 0x2f3   :  { %v2658_v36 = vpack.c.bf16 %v2178_v60, %v2162_v28  ;;  %v1923_v48 = vunpack.c.3.s8 %v1555_v58  ;;  %v2163_v61 = vcvt.s32.f32 %v1651_v42  ;;  %v2179_v14 = vcvt.s32.f32 %v1667_v0  ;;  %v1524_v42 = vld [vmem:[#allocation5 + $0x160] sm:$0xff] }
 0x2f4   :  { %3217 = vmatpush.bf16.msrb.mxu1 %v2803_v46  ;;  %v1618_v3 = vunpack.c.0.s8 %v1490_v5  ;;  %v1634_v6 = vunpack.c.1.s8 %v1490_v5  ;;  %v2786_v21 = vpack.c.bf16 %v2434_v38, %v2418_v8  ;;  %v2419_v1 = vcvt.s32.f32 %v1907_v2 }
 0x2f5   :  { %3176 = vmatpush.bf16.msra.mxu2 %v2658_v36  ;;  %v2435_v35 = vcvt.s32.f32 %v1923_v48  ;;  %v1874_v51 = vunpack.c.0.s8 %v1554_v47  ;;  %v2659_v33 = vpack.c.bf16 %v2179_v14, %v2163_v61  ;;  %v1890_v31 = vunpack.c.1.s8 %v1554_v47  ;;  %v1588_v48 = vld [vmem:[#allocation5 + $0x360] sm:$0xff] }
 0x2f6   :  { %v2130_v29 = vcvt.s32.f32 %v1618_v3  ;;  %v2146_v7 = vcvt.s32.f32 %v1634_v6  ;;  %3190 = vmatpush.bf16.msra.mxu3 %v2786_v21  ;;  %v1619_v44 = vunpack.c.0.s8 %v1491_v55  ;;  %v1635_v24 = vunpack.c.1.s8 %v1491_v55 }
 0x2f7   :  { %v2787_v20 = vpack.c.bf16 %v2435_v35, %v2419_v1  ;;  %v2386_v16 = vcvt.s32.f32 %v1874_v51  ;;  %3204 = vmatpush.bf16.msrb.mxu0 %v2659_v33  ;;  %v2402_v15 = vcvt.s32.f32 %v1890_v31  ;;  %v1875_v43 = vunpack.c.0.s8 %v1555_v58  ;;  %v1525_v33 = vld [vmem:[#allocation5 + $0x168] sm:$0xff] }
 0x2f8   :  { %v2642_v10 = vpack.c.bf16 %v2146_v7, %v2130_v29  ;;  %v1891_v57 = vunpack.c.1.s8 %v1555_v58  ;;  %v2131_v34 = vcvt.s32.f32 %v1619_v44  ;;  %v2147_v32 = vcvt.s32.f32 %v1635_v24 }
 0x2f9   :  { %3218 = vmatpush.bf16.msrb.mxu1 %v2787_v20  ;;  %v1844_v9 = vunpack.c.2.s8 %v1540_v26  ;;  %v1860_v52 = vunpack.c.3.s8 %v1540_v26  ;;  %v2770_v41 = vpack.c.bf16 %v2402_v15, %v2386_v16  ;;  %v2387_v54 = vcvt.s32.f32 %v1875_v43  ;;  %v1589_v20 = vld [vmem:[#allocation5 + $0x368] sm:$0xff]  ;;  %v2941_v15 = vpop.f32.mrf.mxu1 }
 0x2fa   :  { %3177 = vmatpush.bf16.msra.mxu2 %v2642_v10  ;;  %v2403_v11 = vcvt.s32.f32 %v1891_v57  ;;  %v2100_v5 = vunpack.c.2.s8 %v1604_v59  ;;  %v2643_v12 = vpack.c.bf16 %v2147_v32, %v2131_v34  ;;  %v2116_v47 = vunpack.c.3.s8 %v1604_v59  ;;  %v2927_v10 = vpop.f32.mrf.mxu0 }
 0x2fb   :  { %v2356_v40 = vcvt.s32.f32 %v1844_v9  ;;  %v2372_v49 = vcvt.s32.f32 %v1860_v52  ;;  %3191 = vmatpush.bf16.msra.mxu3 %v2770_v41  ;;  %v1845_v45 = vunpack.c.2.s8 %v1541_v18  ;;  %v1861_v56 = vunpack.c.3.s8 %v1541_v18 }
 0x2fc   :  { %v2771_v19 = vpack.c.bf16 %v2403_v11, %v2387_v54  ;;  %v2612_v37 = vcvt.s32.f32 %v2100_v5  ;;  %3205 = vmatpush.bf16.msrb.mxu0 %v2643_v12  ;;  %v2628_v13 = vcvt.s32.f32 %v2116_v47  ;;  %v2101_v4 = vunpack.c.2.s8 %v1605_v25 }
 0x2fd   :  { %v2756_v39 = vpack.c.bf16 %v2372_v49, %v2356_v40  ;;  %v2117_v22 = vunpack.c.3.s8 %v1605_v25  ;;  %3178 = vmatmul.bf16.vlgmr.msra.gmra.mxu2 %v4729_v50  ;;  %v2357_v55 = vcvt.s32.f32 %v1845_v45  ;;  %v2373_v53 = vcvt.s32.f32 %v1861_v56 }
 0x2fe   :  { %3219 = vmatpush.bf16.msrb.mxu1 %v2771_v19  ;;  %v1812_v23 = vunpack.c.0.s8 %v1540_v26  ;;  %v1828_v30 = vunpack.c.1.s8 %v1540_v26  ;;  %v2884_v63 = vpack.c.bf16 %v2628_v13, %v2612_v37  ;;  %v2613_v58 = vcvt.s32.f32 %v2101_v4  ;;  %3192 = vmatmul.bf16.vlgmr.msra.gmra.mxu3 %v4731_v27  ;;  %v2899_v13 = vpop.f32.mrf.mxu2  ;;  %v2913_v4 = vpop.f32.mrf.mxu3 }
 0x2ff   :  { %3226 = vmatpush.bf16.msrb.mxu2 %v2756_v39  ;;  %v2629_v17 = vcvt.s32.f32 %v2117_v22  ;;  %v2068_v28 = vunpack.c.0.s8 %v1604_v59  ;;  %v2757_v60 = vpack.c.bf16 %v2373_v53, %v2357_v55  ;;  %3206 = vmatmul.bf16.vlgmr.msrb.gmra.mxu0 %v4729_v50  ;;  %v2084_v8 = vunpack.c.1.s8 %v1604_v59 }
 0x300   :  { %v2324_v62 = vcvt.s32.f32 %v1812_v23  ;;  %v2340_v46 = vcvt.s32.f32 %v1828_v30  ;;  %3240 = vmatpush.bf16.msrb.mxu3 %v2884_v63  ;;  %v1813_v38 = vunpack.c.0.s8 %v1541_v18  ;;  %v1829_v2 = vunpack.c.1.s8 %v1541_v18 }
 0x301   :  { %v2885_v0 = vpack.c.bf16 %v2629_v17, %v2613_v58  ;;  %3220 = vmatmul.bf16.vlgmr.msrb.gmra.mxu1 %v4731_v27  ;;  %v2580_v36 = vcvt.s32.f32 %v2068_v28  ;;  %3254 = vmatpush.bf16.msra.mxu0 %v2757_v60  ;;  %v2596_v14 = vcvt.s32.f32 %v2084_v8  ;;  %v2069_v3 = vunpack.c.0.s8 %v1605_v25  ;;  %v1508_v17 = vld [vmem:[#allocation5 + $0xe0] sm:$0xff] }
 0x302   :  { %v2740_v61 = vpack.c.bf16 %v2340_v46, %v2324_v62  ;;  %v2085_v6 = vunpack.c.1.s8 %v1605_v25  ;;  %v2325_v21 = vcvt.s32.f32 %v1813_v38  ;;  %v2341_v1 = vcvt.s32.f32 %v1829_v2  ;;  %v1572_v8 = vld [vmem:[#allocation5 + $0x2e0] sm:$0xff] }
 0x303   :  { %3268 = vmatpush.bf16.msra.mxu1 %v2885_v0  ;;  %v1780_v35 = vunpack.c.2.s8 %v1524_v42  ;;  %v1796_v51 = vunpack.c.3.s8 %v1524_v42  ;;  %v2868_v29 = vpack.c.bf16 %v2596_v14, %v2580_v36  ;;  %v2581_v7 = vcvt.s32.f32 %v2069_v3 }
 0x304   :  { %3227 = vmatpush.bf16.msrb.mxu2 %v2740_v61  ;;  %v2597_v31 = vcvt.s32.f32 %v2085_v6  ;;  %v2036_v26 = vunpack.c.2.s8 %v1588_v48  ;;  %v2741_v16 = vpack.c.bf16 %v2341_v1, %v2325_v21  ;;  %v2052_v59 = vunpack.c.3.s8 %v1588_v48  ;;  %v1573_v21 = vld [vmem:[#allocation5 + $0x2e8] sm:$0xff] }
 0x305   :  { %v2292_v44 = vcvt.s32.f32 %v1780_v35  ;;  %v2308_v24 = vcvt.s32.f32 %v1796_v51  ;;  %3241 = vmatpush.bf16.msrb.mxu3 %v2868_v29  ;;  %v1781_v34 = vunpack.c.2.s8 %v1525_v33  ;;  %v1797_v32 = vunpack.c.3.s8 %v1525_v33  ;;  %v2929_v29 = vpop.f32.mrf.mxu0 }
 0x306   :  { %v2869_v43 = vpack.c.bf16 %v2597_v31, %v2581_v7  ;;  %v2548_v57 = vcvt.s32.f32 %v2036_v26  ;;  %3255 = vmatpush.bf16.msra.mxu0 %v2741_v16  ;;  %v2564_v52 = vcvt.s32.f32 %v2052_v59  ;;  %v2037_v18 = vunpack.c.2.s8 %v1589_v20  ;;  %v2943_v7 = vpop.f32.mrf.mxu1 }
 0x307   :  { %v2724_v9 = vpack.c.bf16 %v2308_v24, %v2292_v44  ;;  %v2053_v41 = vunpack.c.3.s8 %v1589_v20  ;;  %v2293_v54 = vcvt.s32.f32 %v1781_v34  ;;  %v2309_v11 = vcvt.s32.f32 %v1797_v32 }
 0x308   :  { %3269 = vmatpush.bf16.msra.mxu1 %v2869_v43  ;;  %v5129_v5 = vadd.f32 %v2941_v15, %v2927_v10  ;;  %v2852_v25 = vpack.c.bf16 %v2564_v52, %v2548_v57  ;;  %v2549_v12 = vcvt.s32.f32 %v2037_v18  ;;  %v1748_v47 = vunpack.c.0.s8 %v1524_v42 }
 0x309   :  { %3228 = vmatpush.bf16.msrb.mxu2 %v2724_v9  ;;  %v2565_v40 = vcvt.s32.f32 %v2053_v41  ;;  %v2725_v49 = vpack.c.bf16 %v2309_v11, %v2293_v54  ;;  %v1764_v19 = vunpack.c.1.s8 %v1524_v42  ;;  %v2004_v45 = vunpack.c.0.s8 %v1588_v48  ;;  %v1509_v42 = vld [vmem:[#allocation5 + $0xe8] sm:$0xff]  ;;  %v2901_v11 = vpop.f32.mrf.mxu2 }
 0x30a   :  { %3242 = vmatpush.bf16.msrb.mxu3 %v2852_v25  ;;  %v2020_v56 = vunpack.c.1.s8 %v1588_v48  ;;  %v1749_v39 = vunpack.c.0.s8 %v1525_v33  ;;  %v2260_v22 = vcvt.s32.f32 %v1748_v47  ;;  %v1765_v53 = vunpack.c.1.s8 %v1525_v33  ;;  %v2915_v25 = vpop.f32.mrf.mxu3 }
 0x30b   :  { %v2853_v37 = vpack.c.bf16 %v2565_v40, %v2549_v12  ;;  %3256 = vmatpush.bf16.msra.mxu0 %v2725_v49  ;;  %v2276_v55 = vcvt.s32.f32 %v1764_v19  ;;  %v2516_v23 = vcvt.s32.f32 %v2004_v45  ;;  %v2005_v58 = vunpack.c.0.s8 %v1589_v20  ;;  %v1492_v19 = vld [vmem:[#allocation5 + $0x60] sm:$0xff] }
 0x30c   :  { %v2532_v30 = vcvt.s32.f32 %v2020_v56  ;;  %v2261_v63 = vcvt.s32.f32 %v1749_v39  ;;  %v2277_v60 = vcvt.s32.f32 %v1765_v53  ;;  %v2021_v62 = vunpack.c.1.s8 %v1589_v20  ;;  %v1556_v39 = vld [vmem:[#allocation5 + $0x260] sm:$0xff]  ;;  %v1493_v53 = vld [vmem:[#allocation5 + $0x68] sm:$0xff] }
 0x30d   :  { %3270 = vmatpush.bf16.msra.mxu1 %v2853_v37  ;;  %v2708_v28 = vpack.c.bf16 %v2276_v55, %v2260_v22  ;;  %v5131_v46 = vadd.f32 %v2913_v4, %v2899_v13  ;;  %v2517_v36 = vcvt.s32.f32 %v2005_v58  ;;  %v1716_v48 = vunpack.c.2.s8 %v1508_v17 }
 0x30e   :  { %v2836_v0 = vpack.c.bf16 %v2532_v30, %v2516_v23  ;;  %v2709_v38 = vpack.c.bf16 %v2277_v60, %v2261_v63  ;;  %v2533_v2 = vcvt.s32.f32 %v2021_v62  ;;  %v1732_v61 = vunpack.c.3.s8 %v1508_v17  ;;  %v1557_v62 = vld [vmem:[#allocation5 + $0x268] sm:$0xff] }
 0x30f   :  { %3229 = vmatpush.bf16.msrb.mxu2 %v2708_v28  ;;  %v1972_v14 = vunpack.c.2.s8 %v1572_v8  ;;  %v1988_v3 = vunpack.c.3.s8 %v1572_v8  ;;  %v1717_v6 = vunpack.c.2.s8 %v1509_v42  ;;  %v2228_v35 = vcvt.s32.f32 %v1716_v48 }
 0x310   :  { %3243 = vmatpush.bf16.msrb.mxu3 %v2836_v0  ;;  %3257 = vmatpush.bf16.msra.mxu0 %v2709_v38  ;;  %v2837_v1 = vpack.c.bf16 %v2533_v2, %v2517_v36  ;;  %v2244_v51 = vcvt.s32.f32 %v1732_v61  ;;  %v1733_v33 = vunpack.c.3.s8 %v1509_v42  ;;  %v1973_v24 = vunpack.c.2.s8 %v1573_v21  ;;  %v2983_v38 = vpop.f32.mrf.mxu0  ;;  %v2997_v2 = vpop.f32.mrf.mxu1 }
 0x311   :  { %v2484_v31 = vcvt.s32.f32 %v1972_v14  ;;  %v2500_v26 = vcvt.s32.f32 %v1988_v3  ;;  %v2229_v20 = vcvt.s32.f32 %v1717_v6  ;;  %v1989_v59 = vunpack.c.3.s8 %v1573_v21 }
 0x312   :  { %3271 = vmatpush.bf16.msra.mxu1 %v2837_v1  ;;  %v2692_v16 = vpack.c.bf16 %v2244_v51, %v2228_v35  ;;  %v2245_v44 = vcvt.s32.f32 %v1733_v33  ;;  %v5133_v15 = vadd.f32 %v2943_v7, %v2929_v29  ;;  %v1684_v43 = vunpack.c.0.s8 %v1508_v17 }
 0x313   :  { %v2820_v10 = vpack.c.bf16 %v2500_v26, %v2484_v31  ;;  %v1700_v57 = vunpack.c.1.s8 %v1508_v17  ;;  %v2485_v32 = vcvt.s32.f32 %v1973_v24  ;;  %v2501_v9 = vcvt.s32.f32 %v1989_v59 }
 0x314   :  { %3230 = vmatpush.bf16.msrb.mxu2 %v2692_v16  ;;  %v2693_v34 = vpack.c.bf16 %v2245_v44, %v2229_v20  ;;  %v1940_v52 = vunpack.c.0.s8 %v1572_v8  ;;  %v2196_v18 = vcvt.s32.f32 %v1684_v43  ;;  %v1956_v54 = vunpack.c.1.s8 %v1572_v8  ;;  %v5139_v43 = vld [vmem:[#allocation5 + $0x1f0] sm:$0xff] }
 0x315   :  { %3244 = vmatpush.bf16.msrb.mxu3 %v2820_v10  ;;  %v2212_v41 = vcvt.s32.f32 %v1700_v57  ;;  %v2821_v12 = vpack.c.bf16 %v2501_v9, %v2485_v32  ;;  %v1685_v49 = vunpack.c.0.s8 %v1509_v42  ;;  %v1701_v47 = vunpack.c.1.s8 %v1509_v42  ;;  %v5141_v9 = vld [vmem:[#allocation5 + $0x3f0] sm:$0xff] }
 0x316   :  { %3258 = vmatpush.bf16.msra.mxu0 %v2693_v34  ;;  %v2452_v40 = vcvt.s32.f32 %v1940_v52  ;;  %v2468_v45 = vcvt.s32.f32 %v1956_v54  ;;  %v1941_v56 = vunpack.c.0.s8 %v1573_v21  ;;  %v1957_v22 = vunpack.c.1.s8 %v1573_v21  ;;  %v2955_v52 = vpop.f32.mrf.mxu2 }
 0x317   :  { %v2676_v37 = vpack.c.bf16 %v2212_v41, %v2196_v18  ;;  %3272 = vmatpush.bf16.msra.mxu1 %v2821_v12  ;;  %v2197_v13 = vcvt.s32.f32 %v1685_v49  ;;  %v2213_v4 = vcvt.s32.f32 %v1701_v47  ;;  %v5135_v55 = vadd.f32 %v2915_v25, %v2901_v11  ;;  %v2969_v18 = vpop.f32.mrf.mxu3 }
 0x318   :  { %v2804_v23 = vpack.c.bf16 %v2468_v45, %v2452_v40  ;;  %v2453_v30 = vcvt.s32.f32 %v1941_v56  ;;  %v1652_v63 = vunpack.c.2.s8 %v1492_v19  ;;  %v1668_v58 = vunpack.c.3.s8 %v1492_v19 }
 0x319   :  { %3231 = vmatpush.bf16.msrb.mxu2 %v2676_v37  ;;  %v2677_v17 = vpack.c.bf16 %v2213_v4, %v2197_v13  ;;  %v2469_v28 = vcvt.s32.f32 %v1957_v22  ;;  %v1908_v60 = vunpack.c.2.s8 %v1556_v39  ;;  %v1924_v0 = vunpack.c.3.s8 %v1556_v39  ;;  %v5146_v13 = vld [vmem:[#allocation5 + $0x3f8] sm:$0xff] }
 0x31a   :  { %3245 = vmatpush.bf16.msrb.mxu3 %v2804_v23  ;;  %v2164_v8 = vcvt.s32.f32 %v1652_v63  ;;  %v2180_v42 = vcvt.s32.f32 %v1668_v58  ;;  %v1653_v36 = vunpack.c.2.s8 %v1493_v53  ;;  %v1669_v14 = vunpack.c.3.s8 %v1493_v53  ;;  %v2999_v63 = vpop.f32.mrf.mxu1 }
 0x31b   :  { %3259 = vmatpush.bf16.msra.mxu0 %v2677_v17  ;;  %v2805_v48 = vpack.c.bf16 %v2469_v28, %v2453_v30  ;;  %v2420_v61 = vcvt.s32.f32 %v1908_v60  ;;  %v2436_v6 = vcvt.s32.f32 %v1924_v0  ;;  %v1909_v1 = vunpack.c.2.s8 %v1557_v62  ;;  %v2985_v30 = vpop.f32.mrf.mxu0 }
 0x31c   :  { %v2660_v3 = vpack.c.bf16 %v2180_v42, %v2164_v8  ;;  %v2165_v21 = vcvt.s32.f32 %v1653_v36  ;;  %v2181_v35 = vcvt.s32.f32 %v1669_v14  ;;  %v1925_v51 = vunpack.c.3.s8 %v1557_v62 }
 0x31d   :  { %3273 = vmatpush.bf16.msra.mxu1 %v2805_v48  ;;  %v5137_v33 = vadd.f32 %v2997_v2, %v2983_v38  ;;  %v2788_v29 = vpack.c.bf16 %v2436_v6, %v2420_v61  ;;  %v2421_v7 = vcvt.s32.f32 %v1909_v1  ;;  %v1620_v31 = vunpack.c.0.s8 %v1492_v19 }
 0x31e   :  { %3232 = vmatpush.bf16.msrb.mxu2 %v2660_v3  ;;  %v2661_v26 = vpack.c.bf16 %v2181_v35, %v2165_v21  ;;  %v2437_v20 = vcvt.s32.f32 %v1925_v51  ;;  %v1636_v16 = vunpack.c.1.s8 %v1492_v19  ;;  %v1876_v24 = vunpack.c.0.s8 %v1556_v39  ;;  %v1543_v19 = vld [vmem:[#allocation5 + $0x1f8] sm:$0xff] }
 0x31f   :  { %3246 = vmatpush.bf16.msrb.mxu3 %v2788_v29  ;;  %v2132_v44 = vcvt.s32.f32 %v1620_v31  ;;  %v1892_v59 = vunpack.c.1.s8 %v1556_v39  ;;  %v1621_v10 = vunpack.c.0.s8 %v1493_v53  ;;  %v1637_v32 = vunpack.c.1.s8 %v1493_v53  ;;  %v2971_v31 = vpop.f32.mrf.mxu3 }
 0x320   :  { %3260 = vmatpush.bf16.msra.mxu0 %v2661_v26  ;;  %v2789_v57 = vpack.c.bf16 %v2437_v20, %v2421_v7  ;;  %v2148_v34 = vcvt.s32.f32 %v1636_v16  ;;  %v2388_v41 = vcvt.s32.f32 %v1876_v24  ;;  %v1877_v25 = vunpack.c.0.s8 %v1557_v62  ;;  %v2957_v7 = vpop.f32.mrf.mxu2 }
 0x321   :  { %v2404_v54 = vcvt.s32.f32 %v1892_v59  ;;  %v2133_v11 = vcvt.s32.f32 %v1621_v10  ;;  %v2149_v40 = vcvt.s32.f32 %v1637_v32  ;;  %v1893_v49 = vunpack.c.1.s8 %v1557_v62 }
 0x322   :  { %3274 = vmatpush.bf16.msra.mxu1 %v2789_v57  ;;  %v2644_v12 = vpack.c.bf16 %v2148_v34, %v2132_v44  ;;  %v1846_v47 = vunpack.c.2.s8 %v5139_v43  ;;  %v2389_v45 = vcvt.s32.f32 %v1877_v25  ;;  %v1862_v56 = vunpack.c.3.s8 %v5139_v43  ;;  %v1526_v44 = vld [vmem:[#allocation5 + $0x170] sm:$0xff] }
 0x323   :  { %v2772_v37 = vpack.c.bf16 %v2404_v54, %v2388_v41  ;;  %v2102_v39 = vunpack.c.2.s8 %v5141_v9  ;;  %v2645_v4 = vpack.c.bf16 %v2149_v40, %v2133_v11  ;;  %v2405_v22 = vcvt.s32.f32 %v1893_v49  ;;  %v1590_v57 = vld [vmem:[#allocation5 + $0x370] sm:$0xff]  ;;  %v1527_v11 = vld [vmem:[#allocation5 + $0x178] sm:$0xff]  ;;  %v3039_v25 = vpop.f32.mrf.mxu0 }
 0x324   :  { %3233 = vmatpush.bf16.msrb.mxu2 %v2644_v12  ;;  %v2358_v53 = vcvt.s32.f32 %v1846_v47  ;;  %v2118_v23 = vunpack.c.3.s8 %v5141_v9  ;;  %v2374_v58 = vcvt.s32.f32 %v1862_v56  ;;  %v1847_v28 = vunpack.c.2.s8 %v1543_v19  ;;  %v3053_v12 = vpop.f32.mrf.mxu1 }
 0x325   :  { %3247 = vmatpush.bf16.msrb.mxu3 %v2772_v37  ;;  %v2614_v17 = vcvt.s32.f32 %v2102_v39  ;;  %v1863_v60 = vunpack.c.3.s8 %v1543_v19  ;;  %3261 = vmatpush.bf16.msra.mxu0 %v2645_v4  ;;  %v2773_v62 = vpack.c.bf16 %v2405_v22, %v2389_v45  ;;  %v2103_v42 = vunpack.c.2.s8 %v5146_v13  ;;  %v1591_v37 = vld [vmem:[#allocation5 + $0x378] sm:$0xff] }
 0x326   :  { %v2630_v8 = vcvt.s32.f32 %v2118_v23  ;;  %v2119_v0 = vunpack.c.3.s8 %v5146_v13  ;;  %v2758_v36 = vpack.c.bf16 %v2374_v58, %v2358_v53  ;;  %v2359_v38 = vcvt.s32.f32 %v1847_v28 }
 0x327   :  { %v2375_v2 = vcvt.s32.f32 %v1863_v60  ;;  %v5151_v48 = vadd.f32 %v2969_v18, %v2955_v52  ;;  %3234 = vmatmul.bf16.vlgmr.msrb.gmra.mxu2 %v4729_v50  ;;  %3275 = vmatpush.bf16.msra.mxu1 %v2773_v62  ;;  %v2615_v14 = vcvt.s32.f32 %v2103_v42  ;;  %v5156_v21 = vadd.f32 %v2999_v63, %v2985_v30 }
 0x328   :  { %v2886_v61 = vpack.c.bf16 %v2630_v8, %v2614_v17  ;;  %v2631_v3 = vcvt.s32.f32 %v2119_v0  ;;  %3248 = vmatmul.bf16.vlgmr.msrb.gmra.mxu3 %v4731_v27  ;;  %3282 = vmatpush.bf16.msra.mxu2 %v2758_v36  ;;  %v1814_v1 = vunpack.c.0.s8 %v5139_v43  ;;  %v1830_v51 = vunpack.c.1.s8 %v5139_v43 }
 0x329   :  { %v2759_v6 = vpack.c.bf16 %v2375_v2, %v2359_v38  ;;  %3262 = vmatmul.bf16.vlgmr.msra.gmra.mxu0 %v4729_v50  ;;  %v2070_v29 = vunpack.c.0.s8 %v5141_v9  ;;  %v2086_v20 = vunpack.c.1.s8 %v5141_v9  ;;  %v1815_v16 = vunpack.c.0.s8 %v1543_v19  ;;  %v3011_v38 = vpop.f32.mrf.mxu2  ;;  %v3025_v2 = vpop.f32.mrf.mxu3 }
 0x32a   :  { %3296 = vmatpush.bf16.msra.mxu3 %v2886_v61  ;;  %v2887_v35 = vpack.c.bf16 %v2631_v3, %v2615_v14  ;;  %3276 = vmatmul.bf16.vlgmr.msra.gmra.mxu1 %v4731_v27  ;;  %v2326_v26 = vcvt.s32.f32 %v1814_v1  ;;  %v2342_v24 = vcvt.s32.f32 %v1830_v51  ;;  %v1831_v10 = vunpack.c.1.s8 %v1543_v19 }
 0x32b   :  { %3310 = vmatpush.bf16.msrb.mxu0 %v2759_v6  ;;  %v2582_v59 = vcvt.s32.f32 %v2070_v29  ;;  %v2598_v34 = vcvt.s32.f32 %v2086_v20  ;;  %v2327_v32 = vcvt.s32.f32 %v1815_v16  ;;  %v2071_v43 = vunpack.c.0.s8 %v5146_v13  ;;  %v5169_v29 = vld [vmem:[#allocation5 + $0xf0] sm:$0xff] }
 0x32c   :  { %3324 = vmatpush.bf16.msrb.mxu1 %v2887_v35  ;;  %v2742_v52 = vpack.c.bf16 %v2342_v24, %v2326_v26  ;;  %v2343_v18 = vcvt.s32.f32 %v1831_v10  ;;  %v2087_v41 = vunpack.c.1.s8 %v5146_v13  ;;  %v1782_v54 = vunpack.c.2.s8 %v1526_v44  ;;  %v1574_v16 = vld [vmem:[#allocation5 + $0x2f0] sm:$0xff]  ;;  %v3041_v24 = vpop.f32.mrf.mxu0 }
 0x32d   :  { %v2870_v9 = vpack.c.bf16 %v2598_v34, %v2582_v59  ;;  %v2583_v40 = vcvt.s32.f32 %v2071_v43  ;;  %v1798_v49 = vunpack.c.3.s8 %v1526_v44  ;;  %v2038_v47 = vunpack.c.2.s8 %v1590_v57  ;;  %v3055_v59 = vpop.f32.mrf.mxu1 }
 0x32e   :  { %3283 = vmatpush.bf16.msra.mxu2 %v2742_v52  ;;  %v2743_v19 = vpack.c.bf16 %v2343_v18, %v2327_v32  ;;  %v2599_v45 = vcvt.s32.f32 %v2087_v41  ;;  %v2294_v56 = vcvt.s32.f32 %v1782_v54  ;;  %v2054_v39 = vunpack.c.3.s8 %v1590_v57 }
 0x32f   :  { %3297 = vmatpush.bf16.msra.mxu3 %v2870_v9  ;;  %v2310_v4 = vcvt.s32.f32 %v1798_v49  ;;  %v2550_v22 = vcvt.s32.f32 %v2038_v47  ;;  %v1783_v53 = vunpack.c.2.s8 %v1527_v11  ;;  %v1799_v23 = vunpack.c.3.s8 %v1527_v11  ;;  %v5173_v9 = vld [vmem:[#allocation5 + $0x2f8] sm:$0xff] }
 0x330   :  { %3311 = vmatpush.bf16.msrb.mxu0 %v2743_v19  ;;  %v2871_v13 = vpack.c.bf16 %v2599_v45, %v2583_v40  ;;  %v2566_v30 = vcvt.s32.f32 %v2054_v39  ;;  %v2039_v63 = vunpack.c.2.s8 %v1591_v37  ;;  %v2055_v58 = vunpack.c.3.s8 %v1591_v37 }
 0x331   :  { %v2726_v17 = vpack.c.bf16 %v2310_v4, %v2294_v56  ;;  %v2295_v28 = vcvt.s32.f32 %v1783_v53  ;;  %v2311_v60 = vcvt.s32.f32 %v1799_v23  ;;  %v5165_v62 = vadd.f32 %v2971_v31, %v2957_v7  ;;  %v5177_v23 = vpop.f32.mrf.mxu2 }
 0x332   :  { %3325 = vmatpush.bf16.msrb.mxu1 %v2871_v13  ;;  %v2854_v8 = vpack.c.bf16 %v2566_v30, %v2550_v22  ;;  %v2551_v42 = vcvt.s32.f32 %v2039_v63  ;;  %v2567_v0 = vcvt.s32.f32 %v2055_v58  ;;  %v5167_v36 = vadd.f32 %v3053_v12, %v3039_v25  ;;  %v5179_v13 = vpop.f32.mrf.mxu3 }
 0x333   :  { %3284 = vmatpush.bf16.msra.mxu2 %v2726_v17  ;;  %v2727_v61 = vpack.c.bf16 %v2311_v60, %v2295_v28  ;;  %v1750_v3 = vunpack.c.0.s8 %v1526_v44  ;;  %v1766_v6 = vunpack.c.1.s8 %v1526_v44  ;;  %v2006_v1 = vunpack.c.0.s8 %v1590_v57 }
 0x334   :  { %3298 = vmatpush.bf16.msra.mxu3 %v2854_v8  ;;  %v2855_v14 = vpack.c.bf16 %v2567_v0, %v2551_v42  ;;  %v2022_v35 = vunpack.c.1.s8 %v1590_v57  ;;  %v1751_v51 = vunpack.c.0.s8 %v1527_v11  ;;  %v1767_v20 = vunpack.c.1.s8 %v1527_v11  ;;  %v1511_v57 = vld [vmem:[#allocation5 + $0xf8] sm:$0xff] }
 0x335   :  { %3312 = vmatpush.bf16.msrb.mxu0 %v2727_v61  ;;  %v2262_v7 = vcvt.s32.f32 %v1750_v3  ;;  %v2278_v31 = vcvt.s32.f32 %v1766_v6  ;;  %v2518_v26 = vcvt.s32.f32 %v2006_v1  ;;  %v2007_v32 = vunpack.c.0.s8 %v1591_v37  ;;  %v5183_v42 = vpop.f32.mrf.mxu0 }
 0x336   :  { %3326 = vmatpush.bf16.msrb.mxu1 %v2855_v14  ;;  %v2534_v10 = vcvt.s32.f32 %v2022_v35  ;;  %v2263_v34 = vcvt.s32.f32 %v1751_v51  ;;  %v2279_v52 = vcvt.s32.f32 %v1767_v20  ;;  %v2023_v44 = vunpack.c.1.s8 %v1591_v37 }
 0x337   :  { %v2710_v43 = vpack.c.bf16 %v2278_v31, %v2262_v7  ;;  %v1718_v18 = vunpack.c.2.s8 %v5169_v29  ;;  %v2519_v54 = vcvt.s32.f32 %v2007_v32  ;;  %v1734_v25 = vunpack.c.3.s8 %v5169_v29  ;;  %v5185_v0 = vpop.f32.mrf.mxu1  ;;  %v1494_v7 = vld [vmem:[#allocation5 + $0x70] sm:$0xff] }
 0x338   :  { %v2838_v41 = vpack.c.bf16 %v2534_v10, %v2518_v26  ;;  %v1974_v12 = vunpack.c.2.s8 %v1574_v16  ;;  %v2711_v11 = vpack.c.bf16 %v2279_v52, %v2263_v34  ;;  %v2535_v40 = vcvt.s32.f32 %v2023_v44  ;;  %v1558_v10 = vld [vmem:[#allocation5 + $0x270] sm:$0xff]  ;;  %v1495_v44 = vld [vmem:[#allocation5 + $0x78] sm:$0xff] }
 0x339   :  { %3285 = vmatpush.bf16.msra.mxu2 %v2710_v43  ;;  %v2230_v49 = vcvt.s32.f32 %v1718_v18  ;;  %v1990_v47 = vunpack.c.3.s8 %v1574_v16  ;;  %v2246_v19 = vcvt.s32.f32 %v1734_v25  ;;  %v1719_v56 = vunpack.c.2.s8 %v1511_v57  ;;  %v5193_v18 = vpop.f32.mrf.mxu2 }
 0x33a   :  { %3299 = vmatpush.bf16.msra.mxu3 %v2838_v41  ;;  %v2486_v45 = vcvt.s32.f32 %v1974_v12  ;;  %v1735_v37 = vunpack.c.3.s8 %v1511_v57  ;;  %3313 = vmatpush.bf16.msrb.mxu0 %v2711_v11  ;;  %v2839_v39 = vpack.c.bf16 %v2535_v40, %v2519_v54  ;;  %v1975_v22 = vunpack.c.2.s8 %v5173_v9 }
 0x33b   :  { %v2502_v4 = vcvt.s32.f32 %v1990_v47  ;;  %v1991_v53 = vunpack.c.3.s8 %v5173_v9  ;;  %v2694_v30 = vpack.c.bf16 %v2246_v19, %v2230_v49  ;;  %v2231_v63 = vcvt.s32.f32 %v1719_v56 }
 0x33c   :  { %v2247_v58 = vcvt.s32.f32 %v1735_v37  ;;  %v5181_v17 = vadd.f32 %v3025_v2, %v3011_v38  ;;  %3327 = vmatpush.bf16.msrb.mxu1 %v2839_v39  ;;  %v2487_v60 = vcvt.s32.f32 %v1975_v22  ;;  %v5187_v14 = vadd.f32 %v3055_v59, %v3041_v24 }
 0x33d   :  { %v2822_v28 = vpack.c.bf16 %v2502_v4, %v2486_v45  ;;  %v2503_v8 = vcvt.s32.f32 %v1991_v53  ;;  %3286 = vmatpush.bf16.msra.mxu2 %v2694_v30  ;;  %v1686_v3 = vunpack.c.0.s8 %v5169_v29  ;;  %v1702_v1 = vunpack.c.1.s8 %v5169_v29  ;;  %v3097_v53 = vpop.f32.mrf.mxu0 }
 0x33e   :  { %v2695_v61 = vpack.c.bf16 %v2247_v58, %v2231_v63  ;;  %v1942_v38 = vunpack.c.0.s8 %v1574_v16  ;;  %v1958_v35 = vunpack.c.1.s8 %v1574_v16  ;;  %v1687_v51 = vunpack.c.0.s8 %v1511_v57  ;;  %v5195_v16 = vpop.f32.mrf.mxu3 }
 0x33f   :  { %3300 = vmatpush.bf16.msra.mxu3 %v2822_v28  ;;  %v2823_v6 = vpack.c.bf16 %v2503_v8, %v2487_v60  ;;  %v2198_v2 = vcvt.s32.f32 %v1686_v3  ;;  %v2214_v31 = vcvt.s32.f32 %v1702_v1  ;;  %v1703_v20 = vunpack.c.1.s8 %v1511_v57  ;;  %v1559_v57 = vld [vmem:[#allocation5 + $0x278] sm:$0xff]  ;;  %v3111_v30 = vpop.f32.mrf.mxu1  ;;  %v5204_v8 = vld [vmem:[%s5383_s12] sm:$0xff] }
 0x340   :  { %3314 = vmatpush.bf16.msrb.mxu0 %v2695_v61  ;;  %v2454_v26 = vcvt.s32.f32 %v1942_v38  ;;  %v2470_v34 = vcvt.s32.f32 %v1958_v35  ;;  %v2199_v24 = vcvt.s32.f32 %v1687_v51  ;;  %v1943_v59 = vunpack.c.0.s8 %v5173_v9 }
 0x341   :  { %3328 = vmatpush.bf16.msrb.mxu1 %v2823_v6  ;;  %v2678_v32 = vpack.c.bf16 %v2214_v31, %v2198_v2  ;;  %v2215_v43 = vcvt.s32.f32 %v1703_v20  ;;  %v1959_v52 = vunpack.c.1.s8 %v5173_v9  ;;  %v1654_v29 = vunpack.c.2.s8 %v1494_v7 }
 0x342   :  { %v2806_v41 = vpack.c.bf16 %v2470_v34, %v2454_v26  ;;  %v2455_v54 = vcvt.s32.f32 %v1943_v59  ;;  %v1670_v25 = vunpack.c.3.s8 %v1494_v7  ;;  %v1910_v12 = vunpack.c.2.s8 %v1558_v10  ;;  %v5210_v59 = vld [vmem:[%s5384_s13] sm:$0xff] }
 0x343   :  { %3287 = vmatpush.bf16.msra.mxu2 %v2678_v32  ;;  %v2679_v11 = vpack.c.bf16 %v2215_v43, %v2199_v24  ;;  %v2471_v40 = vcvt.s32.f32 %v1959_v52  ;;  %v2166_v49 = vcvt.s32.f32 %v1654_v29  ;;  %v1926_v47 = vunpack.c.3.s8 %v1558_v10  ;;  %v3069_v29 = vpop.f32.mrf.mxu2 }
 0x344   :  { %3301 = vmatpush.bf16.msra.mxu3 %v2806_v41  ;;  %v2182_v19 = vcvt.s32.f32 %v1670_v25  ;;  %v2422_v45 = vcvt.s32.f32 %v1910_v12  ;;  %v1655_v9 = vunpack.c.2.s8 %v1495_v44  ;;  %v1671_v56 = vunpack.c.3.s8 %v1495_v44 }
 0x345   :  { %3315 = vmatpush.bf16.msrb.mxu0 %v2679_v11  ;;  %v2807_v37 = vpack.c.bf16 %v2471_v40, %v2455_v54  ;;  %v2438_v39 = vcvt.s32.f32 %v1926_v47  ;;  %v1911_v4 = vunpack.c.2.s8 %v1559_v57  ;;  %v1927_v22 = vunpack.c.3.s8 %v1559_v57  ;;  %v5219_v47 = vld [vmem:[%s5383_s12 + $0x8] sm:$0xff]  ;;  %s4231_s12 = smov [#allocation7]  }
 0x346   :  { %v2662_v63 = vpack.c.bf16 %v2182_v19, %v2166_v49  ;;  %v2167_v58 = vcvt.s32.f32 %v1655_v9  ;;  %v2183_v28 = vcvt.s32.f32 %v1671_v56  ;;  %v5199_v60 = vadd.f32 %v5179_v13, %v5177_v23  ;;  %v3083_v41 = vpop.f32.mrf.mxu3 }
 0x347   :  { %3329 = vmatpush.bf16.msrb.mxu1 %v2807_v37  ;;  %v2790_v61 = vpack.c.bf16 %v2438_v39, %v2422_v45  ;;  %v2423_v3 = vcvt.s32.f32 %v1911_v4  ;;  %v2439_v6 = vcvt.s32.f32 %v1927_v22  ;;  %v1622_v1 = vunpack.c.0.s8 %v1494_v7 }
 0x348   :  { %3288 = vmatpush.bf16.msra.mxu2 %v2662_v63  ;;  %v2663_v38 = vpack.c.bf16 %v2183_v28, %v2167_v58  ;;  %v1638_v2 = vunpack.c.1.s8 %v1494_v7  ;;  %v1878_v35 = vunpack.c.0.s8 %v1558_v10  ;;  %v1894_v26 = vunpack.c.1.s8 %v1558_v10 }
 0x349   :  { %3302 = vmatpush.bf16.msra.mxu3 %v2790_v61  ;;  %v2791_v51 = vpack.c.bf16 %v2439_v6, %v2423_v3  ;;  %v2134_v31 = vcvt.s32.f32 %v1622_v1  ;;  %v1623_v23 = vunpack.c.0.s8 %v1495_v44  ;;  %v3343_v13 = vperm.slane %v5204_v8, 1 }
 0x34a   :  { %3316 = vmatpush.bf16.msrb.mxu0 %v2663_v38  ;;  %v2150_v20 = vcvt.s32.f32 %v1638_v2  ;;  %v2390_v34 = vcvt.s32.f32 %v1878_v35  ;;  %v1639_v24 = vunpack.c.1.s8 %v1495_v44  ;;  %v2406_v32 = vcvt.s32.f32 %v1894_v26 }
 0x34b   :  { %3330 = vmatpush.bf16.msrb.mxu1 %v2791_v51  ;;  %v2135_v7 = vcvt.s32.f32 %v1623_v23  ;;  %v1879_v43 = vunpack.c.0.s8 %v1559_v57  ;;  %v1895_v52 = vunpack.c.1.s8 %v1559_v57  ;;  %v5214_v25 = vadd.f32 %v5185_v0, %v5183_v42  ;;  %v5229_v42 = vld [vmem:[%s5384_s13 + $0x8] sm:$0xff]  ;;  %s3814_s13 = sshll.u32 %s4231_s12, 4  ;;  %s3815_s13 = int_to_ptr.vmem [resolvable:$true] %s3814_s13 }
 0x34c   :  { %v2646_v10 = vpack.c.bf16 %v2150_v20, %v2134_v31  ;;  %v2151_v54 = vcvt.s32.f32 %v1639_v24  ;;  %v2774_v12 = vpack.c.bf16 %v2406_v32, %v2390_v34  ;;  %v3411_v57 = vperm.slane %v5210_v59, 1 }
 0x34d   :  { %v2391_v44 = vcvt.s32.f32 %v1879_v43  ;;  %v2407_v11 = vcvt.s32.f32 %v1895_v52  ;;  %v5224_v45 = vadd.f32 %v5195_v16, %v5193_v18  ;;  %v3375_v0 = vmul.f32 %v3343_v13, %v5129_v5 }
 0x34e   :  { %3289 = vmatpush.bf16.msra.mxu2 %v2646_v10  ;;  %v2647_v19 = vpack.c.bf16 %v2151_v54, %v2135_v7  ;;  %3303 = vmatpush.bf16.msra.mxu3 %v2774_v12  ;;  %v5232_v56 = vadd.f32 %v3111_v30, %v3097_v53  ;;  %v5234_v37 = vadd.f32 %v3083_v41, %v3069_v29  ;;  %v3342_v39 = vperm.slane %v5204_v8, 0 }
 0x34f   :  { %v2775_v9 = vpack.c.bf16 %v2407_v11, %v2391_v44  ;;  %v3351_v18 = vperm.slane %v5219_v47, 1  ;;  %v3419_v16 = vperm.slane %v5229_v42, 1  ;;  %v3443_v22 = vadd.f32 %v3411_v57, %v3375_v0 }
 0x350   :  { %3317 = vmatpush.bf16.msrb.mxu0 %v2647_v19  ;;  %v3410_v53 = vperm.slane %v5210_v59, 0  ;;  %v3350_v58 = vperm.slane %v5219_v47, 0  ;;  %v3374_v28 = vmul.f32 %v3342_v39, %v5131_v46  ;;  %v3418_v6 = vperm.slane %v5229_v42, 0 }
 0x351   :  { %3331 = vmatpush.bf16.msrb.mxu1 %v2775_v9  ;;  %3290 = vmatmul.bf16.vlgmr.msra.gmra.mxu2 %v4729_v50  ;;  %v3391_v23 = vmul.f32 %v3343_v13, %v5133_v15  ;;  %v3390_v52 = vmul.f32 %v3342_v39, %v5135_v55 }
 0x352   :  { %3304 = vmatmul.bf16.vlgmr.msra.gmra.mxu3 %v4731_v27  ;;  %v3442_v2 = vadd.f32 %v3410_v53, %v3374_v28 }
 0x353   :  { %3318 = vmatmul.bf16.vlgmr.msrb.gmra.mxu0 %v4729_v50  ;;  %v3458_v44 = vadd.f32 %v3410_v53, %v3390_v52 }
 0x354   :  { %3332 = vmatmul.bf16.vlgmr.msrb.gmra.mxu1 %v4731_v27  ;;  %v3459_v27 = vadd.f32 %v3411_v57, %v3391_v23 }
 0x355   :  { %v3151_v40 = vpop.f32.mrf.mxu0 }
 0x356   :  { %v3165_v49 = vpop.f32.mrf.mxu1 }
 0x357   :  { %v3166_v4 = vadd.f32 %v3165_v49, %v3151_v40 }
 0x359   :  { %v3383_v5 = vmul.f32 %v3351_v18, %v3166_v4  ;;  %v3123_v30 = vpop.f32.mrf.mxu2 }
 0x35a   :  { %v3137_v63 = vpop.f32.mrf.mxu3 }
 0x35b   :  { %v3451_v61 = vadd.f32 %v3419_v16, %v3383_v5  ;;  %v3138_v3 = vadd.f32 %v3137_v63, %v3123_v30  ;;  %v3345_v5 = vperm.slane %v5204_v8, 3 }
 0x35d   :  { %v3475_v1 = vsub.f32 %v3443_v22, %v3451_v61  ;;  %v3382_v38 = vmul.f32 %v3350_v58, %v3138_v3  ;;  %v3153_v50 = vpop.f32.mrf.mxu0 }
 0x35e   :  { %v3167_v26 = vpop.f32.mrf.mxu1 }
 0x35f   :  { %v4009_v35 = vmul.f32 -1.442695, %v3475_v1  ;;  %v3450_v51 = vadd.f32 %v3418_v6, %v3382_v38  ;;  %v3168_v20 = vadd.f32 %v3167_v26, %v3153_v50  ;;  %v3377_v38 = vmul.f32 %v3345_v5, %v5137_v33 }
 0x360   :  { %v3344_v50 = vperm.slane %v5204_v8, 2 }
 0x361   :  { %4083 = vpow2.f32 %v4009_v35  ;;  %v3474_v31 = vsub.f32 %v3442_v2, %v3450_v51  ;;  %v3399_v46 = vmul.f32 %v3351_v18, %v3168_v20  ;;  %v3125_v32 = vpop.f32.mrf.mxu2 }
 0x362   :  { %v3139_v7 = vpop.f32.mrf.mxu3 }
 0x363   :  { %v4008_v34 = vmul.f32 -1.442695, %v3474_v31  ;;  %v3467_v24 = vadd.f32 %v3419_v16, %v3399_v46  ;;  %v3140_v29 = vadd.f32 %v3139_v7, %v3125_v32  ;;  %v3421_v7 = vperm.slane %v5229_v42, 3 }
 0x365   :  { %4085 = vpow2.f32 %v4008_v34  ;;  %v3483_v10 = vsub.f32 %v3459_v27, %v3467_v24  ;;  %v3398_v54 = vmul.f32 %v3350_v58, %v3140_v29  ;;  %v3353_v34 = vperm.slane %v5219_v47, 3 }
 0x367   :  { %v4084_v43 = vpop.eup %4083  ;;  %v4017_v11 = vmul.f32 -1.442695, %v3483_v10  ;;  %v3466_v15 = vadd.f32 %v3418_v6, %v3398_v54  ;;  %v3413_v6 = vperm.slane %v5210_v59, 3  ;;  %v3412_v54 = vperm.slane %v5210_v59, 2 }
 0x368   :  { %v3539_v41 = vadd.f32 1.0, %v4084_v43 }
 0x369   :  { %v3482_v40 = vsub.f32 %v3458_v44, %v3466_v15 }
 0x36a   :  { %4087 = vrcp.f32 %v3539_v41  ;;  %vm3574_vm2 = vweird.f32 %v3539_v41  ;;  %v3580_v30 = vand.u32 2147483648, %v3539_v41  ;;  %v3578_v28 = vand.u32 2147483647, %v3539_v41 }
 0x36b   :  { %v4086_v12 = vpop.eup %4085  ;;  %4089 = vpow2.f32 %v4017_v11  ;;  %v4016_v49 = vmul.f32 -1.442695, %v3482_v40  ;;  %v3376_v40 = vmul.f32 %v3344_v50, %v5151_v48 }
 0x36c   :  { %v3538_v13 = vadd.f32 1.0, %v4086_v12  ;;  %v3581_v26 = vor.u32 1.1754944e-38, %v3580_v30  ;;  %vm3579_vm7 = vcmp.eq.f32.partialorder %v3578_v28, 8.507059e+37 }
 0x36d   :  { %v3444_v30 = vadd.f32 %v3412_v54, %v3376_v40 }
 0x36e   :  { %4091 = vrcp.f32 %v3538_v13  ;;  %v3565_v63 = vand.u32 2147483648, %v3538_v13  ;;  %v3563_v3 = vand.u32 2147483647, %v3538_v13  ;;  %vm3559_vm5 = vweird.f32 %v3538_v13 }
 0x36f   :  { %4093 = vpow2.f32 %v4016_v49 }
 0x370   :  { %v4088_v57 = vpop.eup %4087  ;;  %v3566_v23 = vor.u32 1.1754944e-38, %v3565_v63  ;;  %vm3564_vm8 = vcmp.eq.f32.partialorder %v3563_v3, 8.507059e+37  ;;  %v3393_v63 = vmul.f32 %v3345_v5, %v5156_v21 }
 0x371   :  { %v3570_v19 = vmul.f32 %v4088_v57, %v3539_v41  ;;  %v4090_v0 = vpop.eup %4089  ;;  %vm3575_vm1 = vweird.f32 %v4088_v57  ;;  %v3445_v41 = vadd.f32 %v3413_v6, %v3377_v38 }
 0x372   :  { %v5249_v39 = vadd.f32 1.0, %v4090_v0  ;;  %vm5256_vm4 = vmor %vm3574_vm2, %vm3575_vm1 }
 0x373   :  { %v3571_v9 = vsub.f32 1.0, %v3570_v19  ;;  %v3420_v19 = vperm.slane %v5229_v42, 2 }
 0x374   :  { %v4092_v55 = vpop.eup %4091  ;;  %4095 = vrcp.f32 %v5249_v39  ;;  %vm3694_vm9 = vweird.f32 %v5249_v39 }
 0x375   :  { %v3572_v4 = vmul.f32 %v4088_v57, %v3571_v9  ;;  %v3555_v18 = vmul.f32 %v4092_v55, %v3538_v13  ;;  %v4094_v16 = vpop.eup %4093  ;;  %vm3560_vm3 = vweird.f32 %v4092_v55  ;;  %v3352_v13 = vperm.slane %v5219_v47, 2 }
 0x376   :  { %v5253_v58 = vadd.f32 1.0, %v4094_v16  ;;  %vm3561_vm6 = vmor %vm3559_vm5, %vm3560_vm3 }
 0x377   :  { %v3573_v22 = vadd.f32 %v4088_v57, %v3572_v4  ;;  %v3556_v53 = vsub.f32 1.0, %v3555_v18 }
 0x378   :  { %4097 = vrcp.f32 %v5253_v58  ;;  %v3685_v4 = vand.u32 2147483648, %v5253_v58  ;;  %vm3679_vm13 = vweird.f32 %v5253_v58 }
 0x379   :  { %v3557_v61 = vmul.f32 %v4092_v55, %v3556_v53  ;;  %v3577_v2 = vsel %vm5256_vm4, %v4088_v57, %v3573_v22  ;;  %v3698_v22 = vand.u32 2147483647, %v5249_v39  ;;  %v3683_v53 = vand.u32 2147483647, %v5253_v58 }
 0x37a   :  { %v5266_v31 = vpop.eup %4095  ;;  %v3582_v27 = vsel %vm3579_vm7, %v3581_v26, %v3577_v2  ;;  %v3686_v26 = vor.u32 1.1754944e-38, %v3685_v4 }
 0x37b   :  { %v3558_v35 = vadd.f32 %v4092_v55, %v3557_v61  ;;  %v3690_v33 = vmul.f32 %v5266_v31, %v5249_v39  ;;  %vm3695_vm10 = vweird.f32 %v5266_v31  ;;  %vm3699_vm15 = vcmp.eq.f32.partialorder %v3698_v22, 8.507059e+37 }
 0x37c   :  { %v3207_v51 = vpop.f32.mrf.mxu0  ;;  %vm5293_vm12 = vmor %vm3694_vm9, %vm3695_vm10  ;;  %vm3684_vm0 = vcmp.eq.f32.partialorder %v3683_v53, 8.507059e+37 }
 0x37d   :  { %v3562_v46 = vsel %vm3561_vm6, %v4092_v55, %v3558_v35  ;;  %v3691_v52 = vsub.f32 1.0, %v3690_v33  ;;  %v3700_v55 = vand.u32 2147483648, %v5249_v39 }
 0x37e   :  { %v3221_v20 = vpop.f32.mrf.mxu1  ;;  %v3567_v24 = vsel %vm3564_vm8, %v3566_v23, %v3562_v46  ;;  %v4098_v29 = vpop.eup %4097 }
 0x37f   :  { %v3222_v32 = vadd.f32 %v3221_v20, %v3207_v51  ;;  %v3794_v43 = vpack.c.bf16 %v3582_v27, %v3567_v24  ;;  %v3692_v12 = vmul.f32 %v5266_v31, %v3691_v52  ;;  %v3675_v44 = vmul.f32 %v4098_v29, %v5253_v58 }
 0x380   :  { %v3179_v11 = vpop.f32.mrf.mxu2  ;;  %vm3680_vm11 = vweird.f32 %v4098_v29  ;;  %v3701_v51 = vor.u32 1.1754944e-38, %v3700_v55  ;;  %v3461_v27 = vadd.f32 %v3413_v6, %v3393_v63 }
 0x381   :  { %v3385_v10 = vmul.f32 %v3353_v34, %v3222_v32  ;;  %3802 = vst [vmem:[#allocation7] sm:$0xff] %v3794_v43  ;;  %v3193_v15 = vpop.f32.mrf.mxu3  ;;  %v3693_v0 = vadd.f32 %v5266_v31, %v3692_v12  ;;  %v3676_v9 = vsub.f32 1.0, %v3675_v44  ;;  %vm3681_vm14 = vmor %vm3679_vm13, %vm3680_vm11  ;;  %v3392_v43 = vmul.f32 %v3344_v50, %v5165_v62 }
 0x382   :  { %v3194_v57 = vadd.f32 %v3193_v15, %v3179_v11 }
 0x383   :  { %v3453_v49 = vadd.f32 %v3421_v7, %v3385_v10  ;;  %v3677_v48 = vmul.f32 %v4098_v29, %v3676_v9  ;;  %v3697_v39 = vsel %vm5293_vm12, %v5266_v31, %v3693_v0  ;;  %v3460_v44 = vadd.f32 %v3412_v54, %v3392_v43 }
 0x384   :  { %v3384_v16 = vmul.f32 %v3352_v13, %v3194_v57  ;;  %v3209_v1 = vpop.f32.mrf.mxu0  ;;  %v3702_v20 = vsel %vm3699_vm15, %v3701_v51, %v3697_v39 }
 0x385   :  { %v3477_v18 = vsub.f32 %v3445_v41, %v3453_v49  ;;  %v3678_v2 = vadd.f32 %v4098_v29, %v3677_v48 }
 0x386   :  { %v3452_v3 = vadd.f32 %v3420_v19, %v3384_v16  ;;  %v3223_v38 = vpop.f32.mrf.mxu1 }
 0x387   :  { %v4011_v61 = vmul.f32 -1.442695, %v3477_v18  ;;  %v3224_v35 = vadd.f32 %v3223_v38, %v3209_v1  ;;  %v3682_v5 = vsel %vm3681_vm14, %v4098_v29, %v3678_v2  ;;  %v3347_v1 = vperm.slane %v5204_v8, 5 }
 0x388   :  { %v3476_v21 = vsub.f32 %v3444_v30, %v3452_v3  ;;  %v3687_v46 = vsel %vm3684_vm0, %v3686_v26, %v3682_v5  ;;  %v3181_v32 = vpop.f32.mrf.mxu2 }
 0x389   :  { %4099 = vpow2.f32 %v4011_v61  ;;  %v3401_v23 = vmul.f32 %v3353_v34, %v3224_v35  ;;  %v3798_v31 = vpack.c.bf16 %v3702_v20, %v3687_v46  ;;  %v3195_v58 = vpop.f32.mrf.mxu3  ;;  %v3415_v46 = vperm.slane %v5210_v59, 5 }
 0x38a   :  { %v4010_v33 = vmul.f32 -1.442695, %v3476_v21  ;;  %v3196_v52 = vadd.f32 %v3195_v58, %v3181_v32 }
 0x38b   :  { %v3469_v24 = vadd.f32 %v3421_v7, %v3401_v23  ;;  %3806 = vst [vmem:[#allocation7 + $0x20] sm:$0xff] %v3798_v31 }
 0x38c   :  { %4101 = vpow2.f32 %v4010_v33  ;;  %v3400_v34 = vmul.f32 %v3352_v13, %v3196_v52  ;;  %v3346_v33 = vperm.slane %v5204_v8, 4 }
 0x38d   :  { %v3485_v29 = vsub.f32 %v3461_v27, %v3469_v24  ;;  %v3379_v27 = vmul.f32 %v3347_v1, %v5167_v36 }
 0x38e   :  { %v3468_v11 = vadd.f32 %v3420_v19, %v3400_v34 }
 0x38f   :  { %v4100_v41 = vpop.eup %4099  ;;  %v4019_v12 = vmul.f32 -1.442695, %v3485_v29  ;;  %v3355_v29 = vperm.slane %v5219_v47, 5 }
 0x390   :  { %v3541_v10 = vadd.f32 1.0, %v4100_v41  ;;  %v3484_v7 = vsub.f32 %v3460_v44, %v3468_v11 }
 0x392   :  { %4103 = vrcp.f32 %v3541_v10  ;;  %v4102_v6 = vpop.eup %4101  ;;  %v4018_v40 = vmul.f32 -1.442695, %v3484_v7  ;;  %vm3604_vm2 = vweird.f32 %v3541_v10  ;;  %v3610_v16 = vand.u32 2147483648, %v3541_v10 }
 0x393   :  { %4105 = vpow2.f32 %v4019_v12  ;;  %v3540_v15 = vadd.f32 1.0, %v4102_v6  ;;  %v3608_v48 = vand.u32 2147483647, %v3541_v10  ;;  %v3414_v12 = vperm.slane %v5210_v59, 4 }
 0x394   :  { %v3611_v38 = vor.u32 1.1754944e-38, %v3610_v16  ;;  %v3423_v6 = vperm.slane %v5229_v42, 5 }
 0x395   :  { %4107 = vrcp.f32 %v3540_v15  ;;  %v3595_v22 = vand.u32 2147483648, %v3540_v15  ;;  %v3593_v30 = vand.u32 2147483647, %v3540_v15  ;;  %vm3589_vm5 = vweird.f32 %v3540_v15 }
 0x396   :  { %4109 = vpow2.f32 %v4018_v40  ;;  %vm3609_vm7 = vcmp.eq.f32.partialorder %v3608_v48, 8.507059e+37 }
 0x397   :  { %v3596_v39 = vor.u32 1.1754944e-38, %v3595_v22  ;;  %vm3594_vm8 = vcmp.eq.f32.partialorder %v3593_v30, 8.507059e+37 }
 0x398   :  { %v4104_v49 = vpop.eup %4103 }
 0x399   :  { %v4106_v62 = vpop.eup %4105  ;;  %v3600_v50 = vmul.f32 %v4104_v49, %v3541_v10  ;;  %vm3605_vm1 = vweird.f32 %v4104_v49  ;;  %v3378_v10 = vmul.f32 %v3346_v33, %v5181_v17 }
 0x39a   :  { %v5306_v57 = vadd.f32 1.0, %v4106_v62  ;;  %vm3606_vm4 = vmor %vm3604_vm2, %vm3605_vm1 }
 0x39b   :  { %v3601_v0 = vsub.f32 1.0, %v3600_v50  ;;  %v4108_v9 = vpop.eup %4107 }
 0x39c   :  { %4111 = vrcp.f32 %v5306_v57  ;;  %v4110_v13 = vpop.eup %4109  ;;  %v3585_v19 = vmul.f32 %v4108_v9, %v3540_v15  ;;  %vm3590_vm3 = vweird.f32 %v4108_v9  ;;  %v3728_v58 = vand.u32 2147483647, %v5306_v57 }
 0x39d   :  { %v3602_v54 = vmul.f32 %v4104_v49, %v3601_v0  ;;  %v5309_v55 = vadd.f32 1.0, %v4110_v13  ;;  %vm3591_vm6 = vmor %vm3589_vm5, %vm3590_vm3  ;;  %v3730_v43 = vand.u32 2147483648, %v5306_v57  ;;  %vm3724_vm10 = vweird.f32 %v5306_v57 }
 0x39e   :  { %v3586_v18 = vsub.f32 1.0, %v3585_v19  ;;  %vm3729_vm14 = vcmp.eq.f32.partialorder %v3728_v58, 8.507059e+37  ;;  %v3422_v13 = vperm.slane %v5229_v42, 4 }
 0x39f   :  { %v3603_v4 = vadd.f32 %v4104_v49, %v3602_v54  ;;  %4113 = vrcp.f32 %v5309_v55  ;;  %v3715_v52 = vand.u32 2147483648, %v5309_v55  ;;  %v3713_v34 = vand.u32 2147483647, %v5309_v55 }
 0x3a0   :  { %v3587_v53 = vmul.f32 %v4108_v9, %v3586_v18  ;;  %vm3709_vm13 = vweird.f32 %v5309_v55  ;;  %v3731_v17 = vor.u32 1.1754944e-38, %v3730_v43  ;;  %v3447_v54 = vadd.f32 %v3415_v46, %v3379_v27 }
 0x3a1   :  { %v3607_v28 = vsel %vm3606_vm4, %v4104_v49, %v3603_v4  ;;  %v3354_v49 = vperm.slane %v5219_v47, 4  ;;  %v3716_v62 = vor.u32 1.1754944e-38, %v3715_v52  ;;  %vm3714_vm0 = vcmp.eq.f32.partialorder %v3713_v34, 8.507059e+37 }
 0x3a2   :  { %v4112_v63 = vpop.eup %4111  ;;  %v3588_v61 = vadd.f32 %v4108_v9, %v3587_v53  ;;  %v3612_v26 = vsel %vm3609_vm7, %v3611_v38, %v3607_v28  ;;  %v3446_v53 = vadd.f32 %v3414_v12, %v3378_v10  ;;  %v3395_v28 = vmul.f32 %v3347_v1, %v5187_v14 }
 0x3a3   :  { %v3720_v3 = vmul.f32 %v4112_v63, %v5306_v57  ;;  %vm3725_vm9 = vweird.f32 %v4112_v63 }
 0x3a4   :  { %v3592_v2 = vsel %vm3591_vm6, %v4108_v9, %v3588_v61  ;;  %vm5328_vm12 = vmor %vm3724_vm10, %vm3725_vm9 }
 0x3a5   :  { %v3721_v35 = vsub.f32 1.0, %v3720_v3  ;;  %v4114_v51 = vpop.eup %4113  ;;  %v3597_v21 = vsel %vm3594_vm8, %v3596_v39, %v3592_v2 }
 0x3a6   :  { %v3795_v5 = vpack.c.bf16 %v3612_v26, %v3597_v21  ;;  %v3705_v20 = vmul.f32 %v4114_v51, %v5309_v55  ;;  %v3263_v32 = vpop.f32.mrf.mxu0  ;;  %vm3710_vm11 = vweird.f32 %v4114_v51 }
 0x3a7   :  { %v3722_v23 = vmul.f32 %v4112_v63, %v3721_v35  ;;  %v3277_v36 = vpop.f32.mrf.mxu1  ;;  %vm3711_vm15 = vmor %vm3709_vm13, %vm3710_vm11 }
 0x3a8   :  { %3803 = vst [vmem:[#allocation7 + $0x8] sm:$0xff] %v3795_v5  ;;  %v3706_v24 = vsub.f32 1.0, %v3705_v20  ;;  %v3278_v11 = vadd.f32 %v3277_v36, %v3263_v32  ;;  %v3463_v5 = vadd.f32 %v3415_v46, %v3395_v28 }
 0x3a9   :  { %v3723_v31 = vadd.f32 %v4112_v63, %v3722_v23 }
 0x3aa   :  { %v3707_v41 = vmul.f32 %v4114_v51, %v3706_v24  ;;  %v3235_v40 = vpop.f32.mrf.mxu2  ;;  %v3387_v50 = vmul.f32 %v3355_v29, %v3278_v11 }
 0x3ab   :  { %v3727_v7 = vsel %vm5328_vm12, %v4112_v63, %v3723_v31  ;;  %v3249_v57 = vpop.f32.mrf.mxu3 }
 0x3ac   :  { %v3708_v15 = vadd.f32 %v4114_v51, %v3707_v41  ;;  %v3250_v9 = vadd.f32 %v3249_v57, %v3235_v40  ;;  %v3732_v19 = vsel %vm3729_vm14, %v3731_v17, %v3727_v7  ;;  %v3455_v18 = vadd.f32 %v3423_v6, %v3387_v50 }
 0x3ae   :  { %v3712_v0 = vsel %vm3711_vm15, %v4114_v51, %v3708_v15  ;;  %v3386_v16 = vmul.f32 %v3354_v49, %v3250_v9  ;;  %v3265_v22 = vpop.f32.mrf.mxu0  ;;  %v3479_v48 = vsub.f32 %v3447_v54, %v3455_v18  ;;  %v3394_v51 = vmul.f32 %v3346_v33, %v5199_v60 }
 0x3af   :  { %v3717_v4 = vsel %vm3714_vm0, %v3716_v62, %v3712_v0  ;;  %v3279_v63 = vpop.f32.mrf.mxu1 }
 0x3b0   :  { %v3799_v55 = vpack.c.bf16 %v3732_v19, %v3717_v4  ;;  %v3454_v30 = vadd.f32 %v3422_v13, %v3386_v16  ;;  %v4013_v61 = vmul.f32 -1.442695, %v3479_v48  ;;  %v3280_v3 = vadd.f32 %v3279_v63, %v3265_v22 }
 0x3b1   :  { %v3462_v31 = vadd.f32 %v3414_v12, %v3394_v51  ;;  %v3417_v51 = vperm.slane %v5210_v59, 7 }
 0x3b2   :  { %3807 = vst [vmem:[#allocation7 + $0x28] sm:$0xff] %v3799_v55  ;;  %v3478_v38 = vsub.f32 %v3446_v53, %v3454_v30  ;;  %v3237_v39 = vpop.f32.mrf.mxu2  ;;  %4115 = vpow2.f32 %v4013_v61  ;;  %v3403_v2 = vmul.f32 %v3355_v29, %v3280_v3  ;;  %v3349_v30 = vperm.slane %v5204_v8, 7 }
 0x3b3   :  { %v3251_v35 = vpop.f32.mrf.mxu3 }
 0x3b4   :  { %v4012_v26 = vmul.f32 -1.442695, %v3478_v38  ;;  %v3252_v21 = vadd.f32 %v3251_v35, %v3237_v39  ;;  %v3471_v23 = vadd.f32 %v3423_v6, %v3403_v2  ;;  %v3381_v35 = vmul.f32 %v3349_v30, %v5214_v25 }
 0x3b6   :  { %4117 = vpow2.f32 %v4012_v26  ;;  %v3402_v20 = vmul.f32 %v3354_v49, %v3252_v21  ;;  %v3487_v27 = vsub.f32 %v3463_v5, %v3471_v23  ;;  %v3357_v5 = vperm.slane %v5219_v47, 7 }
 0x3b7   :  { %v3348_v23 = vperm.slane %v5204_v8, 6  ;;  %v3356_v8 = vperm.slane %v5219_v47, 6 }
 0x3b8   :  { %v3470_v24 = vadd.f32 %v3422_v13, %v3402_v20  ;;  %v4116_v32 = vpop.eup %4115  ;;  %v4021_v14 = vmul.f32 -1.442695, %v3487_v27 }
 0x3b9   :  { %v3543_v1 = vadd.f32 1.0, %v4116_v32 }
 0x3ba   :  { %v3486_v58 = vsub.f32 %v3462_v31, %v3470_v24  ;;  %4119 = vpow2.f32 %v4021_v14  ;;  %v3425_v14 = vperm.slane %v5229_v42, 7 }
 0x3bb   :  { %4121 = vrcp.f32 %v3543_v1  ;;  %vm3634_vm1 = vweird.f32 %v3543_v1  ;;  %v3640_v15 = vand.u32 2147483648, %v3543_v1  ;;  %v3638_v17 = vand.u32 2147483647, %v3543_v1 }
 0x3bc   :  { %v4118_v43 = vpop.eup %4117  ;;  %v4020_v29 = vmul.f32 -1.442695, %v3486_v58 }
 0x3bd   :  { %v3542_v52 = vadd.f32 1.0, %v4118_v43  ;;  %v3641_v13 = vor.u32 1.1754944e-38, %v3640_v15  ;;  %vm3639_vm7 = vcmp.eq.f32.partialorder %v3638_v17, 8.507059e+37 }
 0x3bf   :  { %4123 = vrcp.f32 %v3542_v52  ;;  %v3625_v40 = vand.u32 2147483648, %v3542_v52  ;;  %v3623_v50 = vand.u32 2147483647, %v3542_v52  ;;  %vm3619_vm5 = vweird.f32 %v3542_v52 }
 0x3c0   :  { %4125 = vpow2.f32 %v4020_v29  ;;  %v4120_v60 = vpop.eup %4119 }
 0x3c1   :  { %v4122_v33 = vpop.eup %4121  ;;  %v5343_v46 = vadd.f32 1.0, %v4120_v60  ;;  %v3626_v54 = vor.u32 1.1754944e-38, %v3625_v40  ;;  %vm3624_vm8 = vcmp.eq.f32.partialorder %v3623_v50, 8.507059e+37  ;;  %v3449_v60 = vadd.f32 %v3417_v51, %v3381_v35 }
 0x3c2   :  { %v3630_v41 = vmul.f32 %v4122_v33, %v3543_v1  ;;  %vm3635_vm2 = vweird.f32 %v4122_v33 }
 0x3c3   :  { %4127 = vrcp.f32 %v5343_v46  ;;  %vm3636_vm4 = vmor %vm3634_vm1, %vm3635_vm2  ;;  %vm3754_vm10 = vweird.f32 %v5343_v46  ;;  %v3760_v61 = vand.u32 2147483648, %v5343_v46  ;;  %v3758_v38 = vand.u32 2147483647, %v5343_v46 }
 0x3c4   :  { %v3631_v36 = vsub.f32 1.0, %v3630_v41 }
 0x3c5   :  { %v4124_v34 = vpop.eup %4123  ;;  %v3761_v24 = vor.u32 1.1754944e-38, %v3760_v61  ;;  %vm3759_vm15 = vcmp.eq.f32.partialorder %v3758_v38, 8.507059e+37 }
 0x3c6   :  { %v4126_v10 = vpop.eup %4125  ;;  %v3615_v12 = vmul.f32 %v4124_v34, %v3542_v52  ;;  %v3632_v44 = vmul.f32 %v4122_v33, %v3631_v36  ;;  %vm3620_vm3 = vweird.f32 %v4124_v34 }
 0x3c7   :  { %v3550_v11 = vadd.f32 1.0, %v4126_v10  ;;  %vm3621_vm6 = vmor %vm3619_vm5, %vm3620_vm3 }
 0x3c8   :  { %v3616_v6 = vsub.f32 1.0, %v3615_v12  ;;  %v3633_v7 = vadd.f32 %v4122_v33, %v3632_v44  ;;  %v3424_v12 = vperm.slane %v5229_v42, 6 }
 0x3c9   :  { %4129 = vrcp.f32 %v3550_v11  ;;  %v4128_v49 = vpop.eup %4127  ;;  %v3745_v3 = vand.u32 2147483648, %v3550_v11  ;;  %v3743_v2 = vand.u32 2147483647, %v3550_v11  ;;  %vm3739_vm13 = vweird.f32 %v3550_v11 }
 0x3ca   :  { %v3617_v62 = vmul.f32 %v4124_v34, %v3616_v6  ;;  %v3750_v57 = vmul.f32 %v4128_v49, %v5343_v46  ;;  %v3637_v0 = vsel %vm3636_vm4, %v4122_v33, %v3633_v7  ;;  %vm3755_vm9 = vweird.f32 %v4128_v49 }
 0x3cb   :  { %v3642_v55 = vsel %vm3639_vm7, %v3641_v13, %v3637_v0  ;;  %vm5353_vm12 = vmor %vm3754_vm10, %vm3755_vm9  ;;  %v3746_v25 = vor.u32 1.1754944e-38, %v3745_v3  ;;  %vm3744_vm0 = vcmp.eq.f32.partialorder %v3743_v2, 8.507059e+37  ;;  %v3416_v33 = vperm.slane %v5210_v59, 6 }
 0x3cc   :  { %v3618_v9 = vadd.f32 %v4124_v34, %v3617_v62  ;;  %v3751_v19 = vsub.f32 1.0, %v3750_v57  ;;  %v3397_v7 = vmul.f32 %v3349_v30, %v5232_v56 }
 0x3ce   :  { %v3622_v4 = vsel %vm3621_vm6, %v4124_v34, %v3618_v9  ;;  %v3752_v22 = vmul.f32 %v4128_v49, %v3751_v19  ;;  %v3380_v34 = vmul.f32 %v3348_v23, %v5224_v45  ;;  %v3396_v45 = vmul.f32 %v3348_v23, %v5234_v37 }
 0x3cf   :  { %v4130_v18 = vpop.eup %4129  ;;  %v3627_v16 = vsel %vm3624_vm8, %v3626_v54, %v3622_v4  ;;  %v3465_v0 = vadd.f32 %v3417_v51, %v3397_v7 }
 0x3d0   :  { %v3796_v48 = vpack.c.bf16 %v3642_v55, %v3627_v16  ;;  %v3735_v53 = vmul.f32 %v4130_v18, %v3550_v11  ;;  %v3753_v63 = vadd.f32 %v4128_v49, %v3752_v22  ;;  %vm3740_vm11 = vweird.f32 %v4130_v18  ;;  %v3319_v21 = vpop.f32.mrf.mxu0 }
 0x3d1   :  { %v3333_v31 = vpop.f32.mrf.mxu1  ;;  %vm3741_vm14 = vmor %vm3739_vm13, %vm3740_vm11  ;;  %v3448_v40 = vadd.f32 %v3416_v33, %v3380_v34  ;;  %v3464_v4 = vadd.f32 %v3416_v33, %v3396_v45 }
 0x3d2   :  { %3804 = vst [vmem:[#allocation7 + $0x10] sm:$0xff] %v3796_v48  ;;  %v3736_v28 = vsub.f32 1.0, %v3735_v53  ;;  %v3757_v20 = vsel %vm5353_vm12, %v4128_v49, %v3753_v63  ;;  %v3334_v32 = vadd.f32 %v3333_v31, %v3319_v21 }
 0x3d3   :  { %v3762_v58 = vsel %vm3759_vm15, %v3761_v24, %v3757_v20 }
 0x3d4   :  { %v3737_v39 = vmul.f32 %v4130_v18, %v3736_v28  ;;  %v3389_v52 = vmul.f32 %v3357_v5, %v3334_v32  ;;  %v3291_v29 = vpop.f32.mrf.mxu2 }
 0x3d5   :  { %v3305_v41 = vpop.f32.mrf.mxu3 }
 0x3d6   :  { %v3738_v27 = vadd.f32 %v4130_v18, %v3737_v39  ;;  %v3457_v36 = vadd.f32 %v3425_v14, %v3389_v52  ;;  %v3306_v10 = vadd.f32 %v3305_v41, %v3291_v29 }
 0x3d8   :  { %v3742_v1 = vsel %vm3741_vm14, %v4130_v18, %v3738_v27  ;;  %v3481_v44 = vsub.f32 %v3449_v60, %v3457_v36  ;;  %v3388_v11 = vmul.f32 %v3356_v8, %v3306_v10  ;;  %v3321_v6 = vpop.f32.mrf.mxu0 }
 0x3d9   :  { %v3747_v43 = vsel %vm3744_vm0, %v3746_v25, %v3742_v1  ;;  %v3335_v15 = vpop.f32.mrf.mxu1 }
 0x3da   :  { %v3800_v46 = vpack.c.bf16 %v3762_v58, %v3747_v43  ;;  %v4015_v47 = vmul.f32 -1.442695, %v3481_v44  ;;  %v3456_v49 = vadd.f32 %v3424_v12, %v3388_v11  ;;  %v3336_v17 = vadd.f32 %v3335_v15, %v3321_v6 }
 0x3dc   :  { %3808 = vst [vmem:[#allocation7 + $0x30] sm:$0xff] %v3800_v46  ;;  %4131 = vpow2.f32 %v4015_v47  ;;  %v3480_v59 = vsub.f32 %v3448_v40, %v3456_v49  ;;  %v3405_v62 = vmul.f32 %v3357_v5, %v3336_v17  ;;  %v3293_v50 = vpop.f32.mrf.mxu2 }
 0x3dd   :  { %v3307_v57 = vpop.f32.mrf.mxu3 }
 0x3de   :  { %v4014_v42 = vmul.f32 -1.442695, %v3480_v59  ;;  %v3473_v9 = vadd.f32 %v3425_v14, %v3405_v62  ;;  %v3308_v13 = vadd.f32 %v3307_v57, %v3293_v50 }
 0x3e0   :  { %4133 = vpow2.f32 %v4014_v42  ;;  %v3489_v54 = vsub.f32 %v3465_v0, %v3473_v9  ;;  %v3404_v19 = vmul.f32 %v3356_v8, %v3308_v13 }
 0x3e2   :  { %v4132_v56 = vpop.eup %4131  ;;  %v4023_v18 = vmul.f32 -1.442695, %v3489_v54  ;;  %v3472_v55 = vadd.f32 %v3424_v12, %v3404_v19 }
 0x3e3   :  { %v3545_v16 = vadd.f32 1.0, %v4132_v56 }
 0x3e4   :  { %4135 = vpow2.f32 %v4023_v18  ;;  %v3488_v22 = vsub.f32 %v3464_v4, %v3472_v55 }
 0x3e5   :  { %4137 = vrcp.f32 %v3545_v16  ;;  %vm3664_vm2 = vweird.f32 %v3545_v16  ;;  %v3668_v23 = vand.u32 2147483647, %v3545_v16  ;;  %v3670_v20 = vand.u32 2147483648, %v3545_v16 }
 0x3e6   :  { %v4134_v48 = vpop.eup %4133  ;;  %v4022_v53 = vmul.f32 -1.442695, %v3488_v22 }
 0x3e7   :  { %v3544_v30 = vadd.f32 1.0, %v4134_v48  ;;  %vm3669_vm6 = vcmp.eq.f32.partialorder %v3668_v23, 8.507059e+37  ;;  %v3671_v43 = vor.u32 1.1754944e-38, %v3670_v20 }
 0x3e8   :  { %4139 = vpow2.f32 %v4022_v53 }
 0x3e9   :  { %4141 = vrcp.f32 %v3544_v30  ;;  %v3655_v27 = vand.u32 2147483648, %v3544_v30  ;;  %v3653_v24 = vand.u32 2147483647, %v3544_v30  ;;  %vm3649_vm5 = vweird.f32 %v3544_v30 }
 0x3ea   :  { %v4136_v37 = vpop.eup %4135 }
 0x3eb   :  { %v4138_v63 = vpop.eup %4137  ;;  %v3553_v28 = vadd.f32 1.0, %v4136_v37  ;;  %v3656_v52 = vor.u32 1.1754944e-38, %v3655_v27  ;;  %vm3654_vm8 = vcmp.eq.f32.partialorder %v3653_v24, 8.507059e+37 }
 0x3ec   :  { %v3660_v61 = vmul.f32 %v4138_v63, %v3545_v16  ;;  %vm3665_vm1 = vweird.f32 %v4138_v63 }
 0x3ed   :  { %4143 = vrcp.f32 %v3553_v28  ;;  %vm3666_vm4 = vmor %vm3664_vm2, %vm3665_vm1  ;;  %vm3784_vm10 = vweird.f32 %v3553_v28  ;;  %v3790_v10 = vand.u32 2147483648, %v3553_v28  ;;  %v3788_v44 = vand.u32 2147483647, %v3553_v28 }
 0x3ee   :  { %v4140_v3 = vpop.eup %4139  ;;  %v3661_v38 = vsub.f32 1.0, %v3660_v61 }
 0x3ef   :  { %v4142_v39 = vpop.eup %4141  ;;  %v3552_v2 = vadd.f32 1.0, %v4140_v3  ;;  %v3791_v40 = vor.u32 1.1754944e-38, %v3790_v10  ;;  %vm3789_vm15 = vcmp.eq.f32.partialorder %v3788_v44, 8.507059e+37 }
 0x3f0   :  { %v3662_v35 = vmul.f32 %v4138_v63, %v3661_v38  ;;  %v3645_v51 = vmul.f32 %v4142_v39, %v3544_v30  ;;  %vm3650_vm3 = vweird.f32 %v4142_v39 }
 0x3f1   :  { %4145 = vrcp.f32 %v3552_v2  ;;  %vm3651_vm7 = vmor %vm3649_vm5, %vm3650_vm3  ;;  %v3775_v12 = vand.u32 2147483648, %v3552_v2  ;;  %v3773_v6 = vand.u32 2147483647, %v3552_v2  ;;  %vm3769_vm13 = vweird.f32 %v3552_v2 }
 0x3f2   :  { %v3663_v26 = vadd.f32 %v4138_v63, %v3662_v35  ;;  %v3646_v21 = vsub.f32 1.0, %v3645_v51 }
 0x3f3   :  { %v4144_v5 = vpop.eup %4143  ;;  %v3776_v47 = vor.u32 1.1754944e-38, %v3775_v12  ;;  %vm3774_vm0 = vcmp.eq.f32.partialorder %v3773_v6, 8.507059e+37 }
 0x3f4   :  { %v3647_v31 = vmul.f32 %v4142_v39, %v3646_v21  ;;  %v3780_v25 = vmul.f32 %v4144_v5, %v3553_v28  ;;  %v3667_v32 = vsel %vm3666_vm4, %v4138_v63, %v3663_v26  ;;  %vm3785_vm9 = vweird.f32 %v4144_v5 }
 0x3f5   :  { %v3672_v33 = vsel %vm3669_vm6, %v3671_v43, %v3667_v32  ;;  %vm3786_vm12 = vmor %vm3784_vm10, %vm3785_vm9 }
 0x3f6   :  { %v3648_v14 = vadd.f32 %v4142_v39, %v3647_v31  ;;  %v3781_v1 = vsub.f32 1.0, %v3780_v25 }
 0x3f7   :  { %v4146_v58 = vpop.eup %4145 }
 0x3f8   :  { %v3652_v29 = vsel %vm3651_vm7, %v4142_v39, %v3648_v14  ;;  %v3782_v8 = vmul.f32 %v4144_v5, %v3781_v1  ;;  %v3765_v60 = vmul.f32 %v4146_v58, %v3552_v2  ;;  %vm3770_vm11 = vweird.f32 %v4146_v58 }
 0x3f9   :  { %v3657_v46 = vsel %vm3654_vm8, %v3656_v52, %v3652_v29  ;;  %vm3771_vm14 = vmor %vm3769_vm13, %vm3770_vm11 }
 0x3fa   :  { %v3797_v41 = vpack.c.bf16 %v3672_v33, %v3657_v46  ;;  %v3783_v34 = vadd.f32 %v4144_v5, %v3782_v8  ;;  %v3766_v36 = vsub.f32 1.0, %v3765_v60 }
 0x3fc   :  { %3805 = vst [vmem:[#allocation7 + $0x18] sm:$0xff] %v3797_v41  ;;  %v3767_v11 = vmul.f32 %v4146_v58, %v3766_v36  ;;  %v3787_v7 = vsel %vm3786_vm12, %v4144_v5, %v3783_v34 }
 0x3fd   :  { %v3792_v17 = vsel %vm3789_vm15, %v3791_v40, %v3787_v7 }
 0x3fe   :  { %v3768_v15 = vadd.f32 %v4146_v58, %v3767_v11 }
 0x400   :  { %v3772_v49 = vsel %vm3771_vm14, %v4146_v58, %v3768_v15 }
 0x401   :  { %v3777_v59 = vsel %vm3774_vm0, %v3776_v47, %v3772_v49 }
 0x402   :  { %v3801_v62 = vpack.c.bf16 %v3792_v17, %v3777_v59 }
 0x404   :  { %3809 = vst [vmem:[#allocation7 + $0x38] sm:$0xff] %v3801_v62 }
 0x405   :  { %3822 = dma.vmem_to_hbm [thread:$0]  %s3815_s13, 1024, %s3817_s17, [#allocation4], %s4232_s18, %s4232_s18, %s4233_s19  }
 0x406   :  { %4223 = dma.done.wait [#allocation4], 1024  }
 0x407   :  { %4224 = vsyncadd [#allocation4], 4294966272 }
 0x408   :  { %3827 = vsyncpa [#allocation3], 1 }
 0x409   :  { %3828 = vsyncpa [#allocation6], 1 }
 0x40a   :  { %3829 = vsyncpa [#allocation4], 1 }

</bundles_post_ra>
